<compile_context>
chip_gen: v5e
topology: v5e:2x2
jax: 0.10.0
libtpu: 0.0.40
codegen_flags: <defaults>
</compile_context>

<pallas_src>
import functools
import numpy as np
import jax
import jax.numpy as jnp
from jax.experimental import pallas as pl
from jax.experimental.pallas import tpu as pltpu


# ---------------------------------------------------------------------------
# In-kernel helpers
# ---------------------------------------------------------------------------

def _cheb_apply(s3, x2, w_refs, accs, *, K, B, N):
    """Chebyshev (random-walk) diffusion stack of x2, contracted against stacked weights.

    s3     : (B, N, N)  batch-broadcast support (same S for every batch element)
    x2     : (B*N, F)   features, batch folded into the sublane/row axis
    w_refs : tuple of refs, each (M, F, H) with M = K + 1
    accs   : list of accumulators broadcastable to (B*N, H)

    Returns accs[i] + sum_m T_m(x) @ w_refs[i][m] with T_0 = x, T_1 = S x,
    T_m = 2 S T_{m-1} - T_{m-2}.  The diffusion terms are computed ONCE and shared
    by every weight stack in w_refs.
    """
    def mm(a, w):
        return jnp.dot(a, w, preferred_element_type=jnp.float32)

    def spmm(x3):  # per-batch S @ x, batched on the MXU
        return jnp.einsum('bnm,bmf->bnf', s3, x3,
                          preferred_element_type=jnp.float32)

    accs = [acc + mm(x2, w[0]) for acc, w in zip(accs, w_refs)]
    if K >= 1:
        x3_0 = x2.reshape(B, N, -1)
        x3_1 = spmm(x3_0)
        accs = [acc + mm(x3_1.reshape(B * N, -1), w[1]) for acc, w in zip(accs, w_refs)]
        for m in range(2, K + 1):
            x3_2 = 2.0 * spmm(x3_1) - x3_0
            accs = [acc + mm(x3_2.reshape(B * N, -1), w[m]) for acc, w in zip(accs, w_refs)]
            x3_1, x3_0 = x3_2, x3_1
    return accs


def _dcgru_cell(s3, x2, h2, wxr, whr, wxu, whu, wxc, whc, br, bu, bc, *, K, B, N):
    """One DCGRU cell step.  x2: (B*N, Din), h2: (B*N, H) -> new hidden (B*N, H)."""
    # x-diffusion stack shared by the r / u gates and the candidate (bias folded into the acc).
    r_acc, u_acc, c_acc = _cheb_apply(
        s3, x2, (wxr, wxu, wxc), [br[...], bu[...], bc[...]], K=K, B=B, N=N)
    # h-diffusion stack shared by the r / u gates.
    r_acc, u_acc = _cheb_apply(s3, h2, (whr, whu), [r_acc, u_acc], K=K, B=B, N=N)
    r = jax.nn.sigmoid(r_acc)
    u = jax.nn.sigmoid(u_acc)
    # (r * h)-diffusion stack feeding the candidate.
    (c_acc,) = _cheb_apply(s3, r * h2, (whc,), [c_acc], K=K, B=B, N=N)
    c = jnp.tanh(c_acc)
    return u * h2 + (1.0 - u) * c


def _dcrnn_encoder_kernel(*refs, L, K, B, N):
    """Fused DCRNN encoder: grid axis 0 = time; all layers advance inside one grid step.

    refs layout: [x_t, support, h0, 9 params per layer ...] + [out_top, h_final] + [h_scratch].
    """
    x_ref, s_ref, h0_ref = refs[0], refs[1], refs[2]
    params = refs[3:3 + 9 * L]
    out_ref = refs[3 + 9 * L]        # (1, B*N, H) top-layer output at step t
    hfin_ref = refs[4 + 9 * L]       # (L, B*N, H) final hidden states (written at t == T-1)
    h_scr = refs[5 + 9 * L]          # (L, B*N, H) VMEM-resident hidden states (carried over t)

    t = pl.program_id(0)

    @pl.when(t == 0)
    def _():
        h_scr[...] = h0_ref[...]

    s3 = s_ref[...]                  # (B, N, N)
    x2 = x_ref[0]                    # (B*N, Din) input to layer 0 at step t
    for l in range(L):               # static unroll over layers
        wxr, whr, wxu, whu, wxc, whc, br, bu, bc = params[9 * l:9 * (l + 1)]
        h_new = _dcgru_cell(s3, x2, h_scr[l], wxr, whr, wxu, whu, wxc, whc,
                            br, bu, bc, K=K, B=B, N=N)
        h_scr[l] = h_new
        x2 = h_new                   # feeds the next layer

    out_ref[0] = x2                  # top-layer output for this step

    @pl.when(t == pl.num_programs(0) - 1)
    def _():
        hfin_ref[...] = h_scr[...]


# ---------------------------------------------------------------------------
# Wrapper: one pallas_call for the whole encoder
# ---------------------------------------------------------------------------

def dcrnn_encoder_forward(seq, init_hidden, layer_params, support, K):
    """seq: (T, B, N, Din), init_hidden: list of (B, N, H) per layer, support: (N, N).

    Returns (stacked final hidden states (L, B, N*H), top-layer outputs (T, B, N*H)).
    """
    T, B, N, Din = seq.shape
    H = init_hidden[0].shape[-1]
    L = len(layer_params)
    BN = B * N

    x_seq = seq.reshape(T, BN, Din).astype(jnp.float32)                     # batch folded in rows
    h0 = jnp.stack([h.reshape(BN, H) for h in init_hidden]).astype(jnp.float32)
    # Batch-broadcast support: O(B N^2) resident VMEM, replaces the O(B^2 N^2) block-diagonal.
    s3 = jnp.broadcast_to(support.astype(jnp.float32)[None], (B, N, N))

    flat_params = []
    in_specs = [
        pl.BlockSpec((1, BN, Din), lambda t: (t, 0, 0)),      # x_t streamed per step
        pl.BlockSpec((B, N, N), lambda t: (0, 0, 0)),         # support, resident
        pl.BlockSpec((L, BN, H), lambda t: (0, 0, 0)),        # initial hidden, resident
    ]
    for prm in layer_params:
        for name in ("wxr", "whr", "wxu", "whu", "wxc", "whc"):
            w = prm[name]
            flat_params.append(w)
            in_specs.append(pl.BlockSpec(w.shape, lambda t: (0, 0, 0)))     # resident weights
        for name in ("br", "bu", "bc"):
            b = prm[name]
            flat_params.append(b)
            in_specs.append(pl.BlockSpec(b.shape, lambda t: (0, 0)))        # resident biases

    out_top, h_fin = pl.pallas_call(
        functools.partial(_dcrnn_encoder_kernel, L=L, K=K, B=B, N=N),
        out_shape=(jax.ShapeDtypeStruct((T, BN, H), jnp.float32),
                   jax.ShapeDtypeStruct((L, BN, H), jnp.float32)),
        grid_spec=pltpu.PrefetchScalarGridSpec(
            num_scalar_prefetch=0,
            grid=(T,),
            in_specs=in_specs,
            out_specs=[pl.BlockSpec((1, BN, H), lambda t: (t, 0, 0)),       # per-step top output
                       pl.BlockSpec((L, BN, H), lambda t: (0, 0, 0))],      # final hidden states
            scratch_shapes=[pltpu.VMEM((L, BN, H), jnp.float32)],
        ),
        compiler_params=pltpu.CompilerParams(
            dimension_semantics=("arbitrary",)),               # time recurrence is sequential
    )(x_seq, s3, h0, *flat_params)

    output_hidden = h_fin.reshape(L, B, N * H)     # pure reshape: (B*N, H) rows == (B, N*H)
    outputs = out_top.reshape(T, B, N * H)
    return output_hidden, outputs


# ---------------------------------------------------------------------------
# Parameter / support construction (matches the PyTorch module's layout)
# ---------------------------------------------------------------------------

def init_dcgru_params(key, input_dim, hid_dim, M):
    """Match DiffusionGraphConv.__init__: xavier_normal_(gain=1.414) on (C*M, O), bias = 0.

    PyTorch flattens the contraction axis as row = c*M + m (x permuted to (B, N, C, M) before the
    reshape), so the (C*M, O) weight reshapes to (C, M, O).  We split it by linearity:
    x-part (first Din feature rows) / h-part (last H rows), and by output column: r / u / cand.
    """
    C = input_dim + hid_dim
    H = hid_dim
    Din = input_dim
    kg, kc = jax.random.split(key)

    def xavier(k, rows, cols):
        std = 1.414 * np.sqrt(2.0 / (rows + cols))
        return (std * jax.random.normal(k, (rows, cols))).astype(jnp.float32)

    wg = xavier(kg, C * M, 2 * H).reshape(C, M, 2 * H)   # gate weight, columns [r | u]
    wc = xavier(kc, C * M, H).reshape(C, M, H)           # candidate weight

    def split_xh(w):   # (C, M, O) -> (M, Din, O), (M, H, O)
        return (jnp.transpose(w[:Din], (1, 0, 2)), jnp.transpose(w[Din:], (1, 0, 2)))

    wxr, whr = split_xh(wg[..., :H])
    wxu, whu = split_xh(wg[..., H:])
    wxc, whc = split_xh(wc)

    # DiffusionGraphConv biases use the constructor default bias_start=0.0 (the bias_start=1.0
    # passed at call time is ignored by the reference forward), so all biases are zero.
    zeros = lambda: jnp.zeros((1, H), jnp.float32)
    return dict(wxr=wxr, whr=whr, wxu=wxu, whu=whu, wxc=wxc, whc=whc,
                br=zeros(), bu=zeros(), bc=zeros())


def random_walk_support(adj):
    """calculate_random_walk_matrix(adj).T as a dense matrix: (D^-1 A)^T."""
    d = adj.sum(axis=1)
    d_inv = np.where(d > 0, 1.0 / d, 0.0)
    rw = d_inv[:, None] * adj
    return np.asarray(rw.T, dtype=np.float32)


# ---------------------------------------------------------------------------
# Pure-JAX reference (same math, no Pallas) for validation
# ---------------------------------------------------------------------------

def _reference_forward(seq, init_hidden, layer_params, support, K):
    T, B, N, Din = seq.shape
    H = init_hidden[0].shape[-1]
    hp = jax.lax.Precision.HIGHEST

    def cheb(x):  # x: (B, N, F) -> list of K+1 diffusion terms
        terms = [x]
        if K >= 1:
            x0, x1 = x, jnp.einsum('nm,bmf->bnf', support, x, precision=hp)
            terms.append(x1)
            for _ in range(2, K + 1):
                x2 = 2.0 * jnp.einsum('nm,bmf->bnf', support, x1, precision=hp) - x0
                terms.append(x2)
                x1, x0 = x2, x1
        return terms

    def contract(terms, w):  # sum_m terms[m] @ w[m]
        return sum(jnp.einsum('bnf,fh->bnh', tm, w[m], precision=hp)
                   for m, tm in enumerate(terms))

    hs = list(init_hidden)
    outs = []
    for t in range(T):
        x = seq[t]
        for l, p in enumerate(layer_params):
            xt = cheb(x)
            ht = cheb(hs[l])
            r = jax.nn.sigmoid(contract(xt, p["wxr"]) + contract(ht, p["whr"]) + p["br"])
            u = jax.nn.sigmoid(contract(xt, p["wxu"]) + contract(ht, p["whu"]) + p["bu"])
            rht = cheb(r * hs[l])
            c = jnp.tanh(contract(xt, p["wxc"]) + contract(rht, p["whc"]) + p["bc"])
            hs[l] = u * hs[l] + (1.0 - u) * c
            x = hs[l]
        outs.append(x)
    output_hidden = jnp.stack([h.reshape(B, N * H) for h in hs], axis=0)
    outputs = jnp.stack([o.reshape(B, N * H) for o in outs], axis=0)
    return output_hidden, outputs


# ---------------------------------------------------------------------------
# Main
# ---------------------------------------------------------------------------

if __name__ == "__main__":
    # Small, module-consistent shapes.
    T, B = 8, 2                 # seq length, batch
    N = 16                      # num_nodes
    DIN = 2                     # input_dim
    H = 32                      # hid_dim
    K = 2                       # max_diffusion_step
    L = 2                       # num_rnn_layers
    M = 1 * K + 1               # one support (filter_type='random_walk') -> K+1 matrices

    key = jax.random.PRNGKey(0)
    k_adj, k_seq, k_p0, k_p1 = jax.random.split(key, 4)

    # Deterministic adjacency (positive, so the random-walk matrix has no inf rows).
    adj = np.asarray(jax.random.uniform(k_adj, (N, N)), dtype=np.float64)
    adj = adj + np.eye(N)
    support = jnp.asarray(random_walk_support(adj))               # (N, N) float32

    # Parameters: layer 0 has input_dim=DIN, deeper layers input_dim=H.
    layer_params = [init_dcgru_params(k_p0, DIN, H, M),
                    init_dcgru_params(k_p1, H, H, M)][:L]

    # Inputs and DCGRUCell.init_hidden-style zero states.
    seq = jax.random.normal(k_seq, (T, B, N, DIN), dtype=jnp.float32)
    init_hidden = [jnp.zeros((B, N, H), jnp.float32) for _ in range(L)]

    fwd = jax.jit(functools.partial(dcrnn_encoder_forward, K=K))
    output_hidden, outputs = fwd(seq, init_hidden, layer_params, support)
    jax.block_until_ready((output_hidden, outputs))

    assert output_hidden.shape == (L, B, N * H)
    assert outputs.shape == (T, B, N * H)
    assert bool(jnp.all(jnp.isfinite(output_hidden))) and bool(jnp.all(jnp.isfinite(outputs)))

    # Validate against a pure-JAX implementation of the same recurrence.
    ref_hidden, ref_outputs = _reference_forward(seq, init_hidden, layer_params, support, K)
    err = max(float(jnp.max(jnp.abs(output_hidden - ref_hidden))),
              float(jnp.max(jnp.abs(outputs - ref_outputs))))
    assert err < 5e-2, f"kernel vs reference max|diff| = {err}"

    print("KERNEL_OK")
</pallas_src>

<mosaic_0001>
module attributes {stable_mosaic.version = 11 : i64} {
  func.func @_dcrnn_encoder_kernel(%arg0: i32, %arg1: memref<1x32x2xf32, #tpu.memory_space<vmem>>, %arg2: memref<2x16x16xf32, #tpu.memory_space<vmem>>, %arg3: memref<2x32x32xf32, #tpu.memory_space<vmem>>, %arg4: memref<3x2x32xf32, #tpu.memory_space<vmem>>, %arg5: memref<3x32x32xf32, #tpu.memory_space<vmem>>, %arg6: memref<3x2x32xf32, #tpu.memory_space<vmem>>, %arg7: memref<3x32x32xf32, #tpu.memory_space<vmem>>, %arg8: memref<3x2x32xf32, #tpu.memory_space<vmem>>, %arg9: memref<3x32x32xf32, #tpu.memory_space<vmem>>, %arg10: memref<1x32xf32, #tpu.memory_space<vmem>>, %arg11: memref<1x32xf32, #tpu.memory_space<vmem>>, %arg12: memref<1x32xf32, #tpu.memory_space<vmem>>, %arg13: memref<3x32x32xf32, #tpu.memory_space<vmem>>, %arg14: memref<3x32x32xf32, #tpu.memory_space<vmem>>, %arg15: memref<3x32x32xf32, #tpu.memory_space<vmem>>, %arg16: memref<3x32x32xf32, #tpu.memory_space<vmem>>, %arg17: memref<3x32x32xf32, #tpu.memory_space<vmem>>, %arg18: memref<3x32x32xf32, #tpu.memory_space<vmem>>, %arg19: memref<1x32xf32, #tpu.memory_space<vmem>>, %arg20: memref<1x32xf32, #tpu.memory_space<vmem>>, %arg21: memref<1x32xf32, #tpu.memory_space<vmem>>, %arg22: memref<1x32x32xf32, #tpu.memory_space<vmem>>, %arg23: memref<2x32x32xf32, #tpu.memory_space<vmem>>, %arg24: memref<2x32x32xf32, #tpu.memory_space<vmem>>) attributes {dimension_semantics = [#tpu.dimension_semantics<arbitrary>], iteration_bounds = array<i64: 8>, scalar_prefetch = 0 : i64, scratch_operands = 1 : i64, tpu.core_type = #tpu.core_type<tc>, window_params = [{transform_indices = @transform_0, window_bounds = array<i64: 1, 32, 2>}, {pipeline_mode = #tpu.pipeline_mode<synchronous>, transform_indices = @transform_1, window_bounds = array<i64: 2, 16, 16>}, {pipeline_mode = #tpu.pipeline_mode<synchronous>, transform_indices = @transform_2, window_bounds = array<i64: 2, 32, 32>}, {pipeline_mode = #tpu.pipeline_mode<synchronous>, transform_indices = @transform_3, window_bounds = array<i64: 3, 2, 32>}, {pipeline_mode = #tpu.pipeline_mode<synchronous>, transform_indices = @transform_4, window_bounds = array<i64: 3, 32, 32>}, {pipeline_mode = #tpu.pipeline_mode<synchronous>, transform_indices = @transform_5, window_bounds = array<i64: 3, 2, 32>}, {pipeline_mode = #tpu.pipeline_mode<synchronous>, transform_indices = @transform_6, window_bounds = array<i64: 3, 32, 32>}, {pipeline_mode = #tpu.pipeline_mode<synchronous>, transform_indices = @transform_7, window_bounds = array<i64: 3, 2, 32>}, {pipeline_mode = #tpu.pipeline_mode<synchronous>, transform_indices = @transform_8, window_bounds = array<i64: 3, 32, 32>}, {pipeline_mode = #tpu.pipeline_mode<synchronous>, transform_indices = @transform_9, window_bounds = array<i64: 1, 32>}, {pipeline_mode = #tpu.pipeline_mode<synchronous>, transform_indices = @transform_10, window_bounds = array<i64: 1, 32>}, {pipeline_mode = #tpu.pipeline_mode<synchronous>, transform_indices = @transform_11, window_bounds = array<i64: 1, 32>}, {pipeline_mode = #tpu.pipeline_mode<synchronous>, transform_indices = @transform_12, window_bounds = array<i64: 3, 32, 32>}, {pipeline_mode = #tpu.pipeline_mode<synchronous>, transform_indices = @transform_13, window_bounds = array<i64: 3, 32, 32>}, {pipeline_mode = #tpu.pipeline_mode<synchronous>, transform_indices = @transform_14, window_bounds = array<i64: 3, 32, 32>}, {pipeline_mode = #tpu.pipeline_mode<synchronous>, transform_indices = @transform_15, window_bounds = array<i64: 3, 32, 32>}, {pipeline_mode = #tpu.pipeline_mode<synchronous>, transform_indices = @transform_16, window_bounds = array<i64: 3, 32, 32>}, {pipeline_mode = #tpu.pipeline_mode<synchronous>, transform_indices = @transform_17, window_bounds = array<i64: 3, 32, 32>}, {pipeline_mode = #tpu.pipeline_mode<synchronous>, transform_indices = @transform_18, window_bounds = array<i64: 1, 32>}, {pipeline_mode = #tpu.pipeline_mode<synchronous>, transform_indices = @transform_19, window_bounds = array<i64: 1, 32>}, {pipeline_mode = #tpu.pipeline_mode<synchronous>, transform_indices = @transform_20, window_bounds = array<i64: 1, 32>}, {transform_indices = @transform_21, window_bounds = array<i64: 1, 32, 32>}, {pipeline_mode = #tpu.pipeline_mode<synchronous>, transform_indices = @transform_22, window_bounds = array<i64: 2, 32, 32>}]} {
    %c0_i32 = arith.constant 0 : i32
    %0 = arith.cmpi eq, %arg0, %c0_i32 : i32
    %1 = arith.extui %0 : i1 to i32
    %c0_i32_0 = arith.constant 0 : i32
    %2 = arith.cmpi ne, %1, %c0_i32_0 : i32
    scf.if %2 {
      %c0_199 = arith.constant 0 : index
      %c0_200 = arith.constant 0 : index
      %c0_201 = arith.constant 0 : index
      %272 = vector.load %arg3[%c0_199, %c0_200, %c0_201] : memref<2x32x32xf32, #tpu.memory_space<vmem>>, vector<2x32x32xf32>
      %c0_202 = arith.constant 0 : index
      %c0_203 = arith.constant 0 : index
      %c0_204 = arith.constant 0 : index
      %273 = vector.load %arg24[%c0_202, %c0_203, %c0_204] : memref<2x32x32xf32, #tpu.memory_space<vmem>>, vector<2x32x32xf32>
      tpu.vector_store %arg24[%c0_202, %c0_203, %c0_204], %272 {strides = array<i32>} : memref<2x32x32xf32, #tpu.memory_space<vmem>>, vector<2x32x32xf32>,
    } else {
    }
    %c0 = arith.constant 0 : index
    %c0_1 = arith.constant 0 : index
    %c0_2 = arith.constant 0 : index
    %3 = vector.load %arg2[%c0, %c0_1, %c0_2] : memref<2x16x16xf32, #tpu.memory_space<vmem>>, vector<2x16x16xf32>
    %c0_3 = arith.constant 0 : index
    %c0_4 = arith.constant 0 : index
    %c0_5 = arith.constant 0 : index
    %4 = vector.load %arg1[%c0_3, %c0_4, %c0_5] : memref<1x32x2xf32, #tpu.memory_space<vmem>>, vector<1x32x2xf32>
    %5 = vector.shape_cast %4 : vector<1x32x2xf32> to vector<32x2xf32>
    %c0_6 = arith.constant 0 : index
    %c0_7 = arith.constant 0 : index
    %c0_8 = arith.constant 0 : index
    %6 = vector.load %arg24[%c0_6, %c0_7, %c0_8] : memref<2x32x32xf32, #tpu.memory_space<vmem>>, vector<1x32x32xf32>
    %7 = vector.shape_cast %6 : vector<1x32x32xf32> to vector<32x32xf32>
    %c0_9 = arith.constant 0 : index
    %c0_10 = arith.constant 0 : index
    %8 = vector.load %arg10[%c0_9, %c0_10] : memref<1x32xf32, #tpu.memory_space<vmem>>, vector<1x32xf32>
    %c0_11 = arith.constant 0 : index
    %c0_12 = arith.constant 0 : index
    %9 = vector.load %arg11[%c0_11, %c0_12] : memref<1x32xf32, #tpu.memory_space<vmem>>, vector<1x32xf32>
    %c0_13 = arith.constant 0 : index
    %c0_14 = arith.constant 0 : index
    %10 = vector.load %arg12[%c0_13, %c0_14] : memref<1x32xf32, #tpu.memory_space<vmem>>, vector<1x32xf32>
    %c0_15 = arith.constant 0 : index
    %c0_16 = arith.constant 0 : index
    %c0_17 = arith.constant 0 : index
    %11 = vector.load %arg4[%c0_15, %c0_16, %c0_17] : memref<3x2x32xf32, #tpu.memory_space<vmem>>, vector<1x2x32xf32>
    %12 = vector.shape_cast %11 : vector<1x2x32xf32> to vector<2x32xf32>
    %cst = arith.constant dense<0.000000e+00> : vector<32x32xf32>
    %13 = tpu.matmul %5, %12, %cst {dimension_numbers = #tpu.dot_dimension_numbers<[1], [0], [0], [1], [0, 0, 1, 1], [], []>} : vector<32x2xf32>, vector<2x32xf32>, vector<32x32xf32> -> vector<32x32xf32>
    %14 = vector.broadcast %8 : vector<1x32xf32> to vector<32x32xf32>
    %15 = arith.addf %14, %13 : vector<32x32xf32>
    %c0_18 = arith.constant 0 : index
    %c0_19 = arith.constant 0 : index
    %c0_20 = arith.constant 0 : index
    %16 = vector.load %arg6[%c0_18, %c0_19, %c0_20] : memref<3x2x32xf32, #tpu.memory_space<vmem>>, vector<1x2x32xf32>
    %17 = vector.shape_cast %16 : vector<1x2x32xf32> to vector<2x32xf32>
    %cst_21 = arith.constant dense<0.000000e+00> : vector<32x32xf32>
    %18 = tpu.matmul %5, %17, %cst_21 {dimension_numbers = #tpu.dot_dimension_numbers<[1], [0], [0], [1], [0, 0, 1, 1], [], []>} : vector<32x2xf32>, vector<2x32xf32>, vector<32x32xf32> -> vector<32x32xf32>
    %19 = vector.broadcast %9 : vector<1x32xf32> to vector<32x32xf32>
    %20 = arith.addf %19, %18 : vector<32x32xf32>
    %c0_22 = arith.constant 0 : index
    %c0_23 = arith.constant 0 : index
    %c0_24 = arith.constant 0 : index
    %21 = vector.load %arg8[%c0_22, %c0_23, %c0_24] : memref<3x2x32xf32, #tpu.memory_space<vmem>>, vector<1x2x32xf32>
    %22 = vector.shape_cast %21 : vector<1x2x32xf32> to vector<2x32xf32>
    %cst_25 = arith.constant dense<0.000000e+00> : vector<32x32xf32>
    %23 = tpu.matmul %5, %22, %cst_25 {dimension_numbers = #tpu.dot_dimension_numbers<[1], [0], [0], [1], [0, 0, 1, 1], [], []>} : vector<32x2xf32>, vector<2x32xf32>, vector<32x32xf32> -> vector<32x32xf32>
    %24 = vector.broadcast %10 : vector<1x32xf32> to vector<32x32xf32>
    %25 = arith.addf %24, %23 : vector<32x32xf32>
    %26 = vector.shape_cast %5 : vector<32x2xf32> to vector<2x16x2xf32>
    "tpu.trace_start"() <{level = 10 : i32, message = "bnm,bmf->bnf"}> : () -> ()
    %cst_26 = arith.constant dense<0.000000e+00> : vector<2x16x2xf32>
    %27 = tpu.matmul %3, %26, %cst_26 {dimension_numbers = #tpu.dot_dimension_numbers<[2], [1], [1], [2], [0, 0, 0, 1, 1, 2], [0], [0]>} : vector<2x16x16xf32>, vector<2x16x2xf32>, vector<2x16x2xf32> -> vector<2x16x2xf32>
    "tpu.trace_stop"() : () -> ()
    %28 = vector.shape_cast %27 : vector<2x16x2xf32> to vector<32x2xf32>
    %c1 = arith.constant 1 : index
    %c0_27 = arith.constant 0 : index
    %c0_28 = arith.constant 0 : index
    %29 = vector.load %arg4[%c1, %c0_27, %c0_28] : memref<3x2x32xf32, #tpu.memory_space<vmem>>, vector<1x2x32xf32>
    %30 = vector.shape_cast %29 : vector<1x2x32xf32> to vector<2x32xf32>
    %cst_29 = arith.constant dense<0.000000e+00> : vector<32x32xf32>
    %31 = tpu.matmul %28, %30, %cst_29 {dimension_numbers = #tpu.dot_dimension_numbers<[1], [0], [0], [1], [0, 0, 1, 1], [], []>} : vector<32x2xf32>, vector<2x32xf32>, vector<32x32xf32> -> vector<32x32xf32>
    %32 = arith.addf %15, %31 : vector<32x32xf32>
    %33 = vector.shape_cast %27 : vector<2x16x2xf32> to vector<32x2xf32>
    %c1_30 = arith.constant 1 : index
    %c0_31 = arith.constant 0 : index
    %c0_32 = arith.constant 0 : index
    %34 = vector.load %arg6[%c1_30, %c0_31, %c0_32] : memref<3x2x32xf32, #tpu.memory_space<vmem>>, vector<1x2x32xf32>
    %35 = vector.shape_cast %34 : vector<1x2x32xf32> to vector<2x32xf32>
    %cst_33 = arith.constant dense<0.000000e+00> : vector<32x32xf32>
    %36 = tpu.matmul %33, %35, %cst_33 {dimension_numbers = #tpu.dot_dimension_numbers<[1], [0], [0], [1], [0, 0, 1, 1], [], []>} : vector<32x2xf32>, vector<2x32xf32>, vector<32x32xf32> -> vector<32x32xf32>
    %37 = arith.addf %20, %36 : vector<32x32xf32>
    %38 = vector.shape_cast %27 : vector<2x16x2xf32> to vector<32x2xf32>
    %c1_34 = arith.constant 1 : index
    %c0_35 = arith.constant 0 : index
    %c0_36 = arith.constant 0 : index
    %39 = vector.load %arg8[%c1_34, %c0_35, %c0_36] : memref<3x2x32xf32, #tpu.memory_space<vmem>>, vector<1x2x32xf32>
    %40 = vector.shape_cast %39 : vector<1x2x32xf32> to vector<2x32xf32>
    %cst_37 = arith.constant dense<0.000000e+00> : vector<32x32xf32>
    %41 = tpu.matmul %38, %40, %cst_37 {dimension_numbers = #tpu.dot_dimension_numbers<[1], [0], [0], [1], [0, 0, 1, 1], [], []>} : vector<32x2xf32>, vector<2x32xf32>, vector<32x32xf32> -> vector<32x32xf32>
    %42 = arith.addf %25, %41 : vector<32x32xf32>
    "tpu.trace_start"() <{level = 10 : i32, message = "bnm,bmf->bnf"}> : () -> ()
    %cst_38 = arith.constant dense<0.000000e+00> : vector<2x16x2xf32>
    %43 = tpu.matmul %3, %27, %cst_38 {dimension_numbers = #tpu.dot_dimension_numbers<[2], [1], [1], [2], [0, 0, 0, 1, 1, 2], [0], [0]>} : vector<2x16x16xf32>, vector<2x16x2xf32>, vector<2x16x2xf32> -> vector<2x16x2xf32>
    "tpu.trace_stop"() : () -> ()
    %cst_39 = arith.constant 2.000000e+00 : f32
    %44 = vector.broadcast %cst_39 : f32 to vector<2x16x2xf32>
    %45 = arith.mulf %44, %43 : vector<2x16x2xf32>
    %46 = arith.subf %45, %26 : vector<2x16x2xf32>
    %47 = vector.shape_cast %46 : vector<2x16x2xf32> to vector<32x2xf32>
    %c2 = arith.constant 2 : index
    %c0_40 = arith.constant 0 : index
    %c0_41 = arith.constant 0 : index
    %48 = vector.load %arg4[%c2, %c0_40, %c0_41] : memref<3x2x32xf32, #tpu.memory_space<vmem>>, vector<1x2x32xf32>
    %49 = vector.shape_cast %48 : vector<1x2x32xf32> to vector<2x32xf32>
    %cst_42 = arith.constant dense<0.000000e+00> : vector<32x32xf32>
    %50 = tpu.matmul %47, %49, %cst_42 {dimension_numbers = #tpu.dot_dimension_numbers<[1], [0], [0], [1], [0, 0, 1, 1], [], []>} : vector<32x2xf32>, vector<2x32xf32>, vector<32x32xf32> -> vector<32x32xf32>
    %51 = arith.addf %32, %50 : vector<32x32xf32>
    %52 = vector.shape_cast %46 : vector<2x16x2xf32> to vector<32x2xf32>
    %c2_43 = arith.constant 2 : index
    %c0_44 = arith.constant 0 : index
    %c0_45 = arith.constant 0 : index
    %53 = vector.load %arg6[%c2_43, %c0_44, %c0_45] : memref<3x2x32xf32, #tpu.memory_space<vmem>>, vector<1x2x32xf32>
    %54 = vector.shape_cast %53 : vector<1x2x32xf32> to vector<2x32xf32>
    %cst_46 = arith.constant dense<0.000000e+00> : vector<32x32xf32>
    %55 = tpu.matmul %52, %54, %cst_46 {dimension_numbers = #tpu.dot_dimension_numbers<[1], [0], [0], [1], [0, 0, 1, 1], [], []>} : vector<32x2xf32>, vector<2x32xf32>, vector<32x32xf32> -> vector<32x32xf32>
    %56 = arith.addf %37, %55 : vector<32x32xf32>
    %57 = vector.shape_cast %46 : vector<2x16x2xf32> to vector<32x2xf32>
    %c2_47 = arith.constant 2 : index
    %c0_48 = arith.constant 0 : index
    %c0_49 = arith.constant 0 : index
    %58 = vector.load %arg8[%c2_47, %c0_48, %c0_49] : memref<3x2x32xf32, #tpu.memory_space<vmem>>, vector<1x2x32xf32>
    %59 = vector.shape_cast %58 : vector<1x2x32xf32> to vector<2x32xf32>
    %cst_50 = arith.constant dense<0.000000e+00> : vector<32x32xf32>
    %60 = tpu.matmul %57, %59, %cst_50 {dimension_numbers = #tpu.dot_dimension_numbers<[1], [0], [0], [1], [0, 0, 1, 1], [], []>} : vector<32x2xf32>, vector<2x32xf32>, vector<32x32xf32> -> vector<32x32xf32>
    %61 = arith.addf %42, %60 : vector<32x32xf32>
    %c0_51 = arith.constant 0 : index
    %c0_52 = arith.constant 0 : index
    %c0_53 = arith.constant 0 : index
    %62 = vector.load %arg5[%c0_51, %c0_52, %c0_53] : memref<3x32x32xf32, #tpu.memory_space<vmem>>, vector<1x32x32xf32>
    %63 = vector.shape_cast %62 : vector<1x32x32xf32> to vector<32x32xf32>
    %cst_54 = arith.constant dense<0.000000e+00> : vector<32x32xf32>
    %64 = tpu.matmul %7, %63, %cst_54 {dimension_numbers = #tpu.dot_dimension_numbers<[1], [0], [0], [1], [0, 0, 1, 1], [], []>} : vector<32x32xf32>, vector<32x32xf32>, vector<32x32xf32> -> vector<32x32xf32>
    %65 = arith.addf %51, %64 : vector<32x32xf32>
    %c0_55 = arith.constant 0 : index
    %c0_56 = arith.constant 0 : index
    %c0_57 = arith.constant 0 : index
    %66 = vector.load %arg7[%c0_55, %c0_56, %c0_57] : memref<3x32x32xf32, #tpu.memory_space<vmem>>, vector<1x32x32xf32>
    %67 = vector.shape_cast %66 : vector<1x32x32xf32> to vector<32x32xf32>
    %cst_58 = arith.constant dense<0.000000e+00> : vector<32x32xf32>
    %68 = tpu.matmul %7, %67, %cst_58 {dimension_numbers = #tpu.dot_dimension_numbers<[1], [0], [0], [1], [0, 0, 1, 1], [], []>} : vector<32x32xf32>, vector<32x32xf32>, vector<32x32xf32> -> vector<32x32xf32>
    %69 = arith.addf %56, %68 : vector<32x32xf32>
    %70 = vector.shape_cast %7 : vector<32x32xf32> to vector<2x16x32xf32>
    "tpu.trace_start"() <{level = 10 : i32, message = "bnm,bmf->bnf"}> : () -> ()
    %cst_59 = arith.constant dense<0.000000e+00> : vector<2x16x32xf32>
    %71 = tpu.matmul %3, %70, %cst_59 {dimension_numbers = #tpu.dot_dimension_numbers<[2], [1], [1], [2], [0, 0, 0, 1, 1, 2], [0], [0]>} : vector<2x16x16xf32>, vector<2x16x32xf32>, vector<2x16x32xf32> -> vector<2x16x32xf32>
    "tpu.trace_stop"() : () -> ()
    %72 = vector.shape_cast %71 : vector<2x16x32xf32> to vector<32x32xf32>
    %c1_60 = arith.constant 1 : index
    %c0_61 = arith.constant 0 : index
    %c0_62 = arith.constant 0 : index
    %73 = vector.load %arg5[%c1_60, %c0_61, %c0_62] : memref<3x32x32xf32, #tpu.memory_space<vmem>>, vector<1x32x32xf32>
    %74 = vector.shape_cast %73 : vector<1x32x32xf32> to vector<32x32xf32>
    %cst_63 = arith.constant dense<0.000000e+00> : vector<32x32xf32>
    %75 = tpu.matmul %72, %74, %cst_63 {dimension_numbers = #tpu.dot_dimension_numbers<[1], [0], [0], [1], [0, 0, 1, 1], [], []>} : vector<32x32xf32>, vector<32x32xf32>, vector<32x32xf32> -> vector<32x32xf32>
    %76 = arith.addf %65, %75 : vector<32x32xf32>
    %77 = vector.shape_cast %71 : vector<2x16x32xf32> to vector<32x32xf32>
    %c1_64 = arith.constant 1 : index
    %c0_65 = arith.constant 0 : index
    %c0_66 = arith.constant 0 : index
    %78 = vector.load %arg7[%c1_64, %c0_65, %c0_66] : memref<3x32x32xf32, #tpu.memory_space<vmem>>, vector<1x32x32xf32>
    %79 = vector.shape_cast %78 : vector<1x32x32xf32> to vector<32x32xf32>
    %cst_67 = arith.constant dense<0.000000e+00> : vector<32x32xf32>
    %80 = tpu.matmul %77, %79, %cst_67 {dimension_numbers = #tpu.dot_dimension_numbers<[1], [0], [0], [1], [0, 0, 1, 1], [], []>} : vector<32x32xf32>, vector<32x32xf32>, vector<32x32xf32> -> vector<32x32xf32>
    %81 = arith.addf %69, %80 : vector<32x32xf32>
    "tpu.trace_start"() <{level = 10 : i32, message = "bnm,bmf->bnf"}> : () -> ()
    %cst_68 = arith.constant dense<0.000000e+00> : vector<2x16x32xf32>
    %82 = tpu.matmul %3, %71, %cst_68 {dimension_numbers = #tpu.dot_dimension_numbers<[2], [1], [1], [2], [0, 0, 0, 1, 1, 2], [0], [0]>} : vector<2x16x16xf32>, vector<2x16x32xf32>, vector<2x16x32xf32> -> vector<2x16x32xf32>
    "tpu.trace_stop"() : () -> ()
    %cst_69 = arith.constant 2.000000e+00 : f32
    %83 = vector.broadcast %cst_69 : f32 to vector<2x16x32xf32>
    %84 = arith.mulf %83, %82 : vector<2x16x32xf32>
    %85 = arith.subf %84, %70 : vector<2x16x32xf32>
    %86 = vector.shape_cast %85 : vector<2x16x32xf32> to vector<32x32xf32>
    %c2_70 = arith.constant 2 : index
    %c0_71 = arith.constant 0 : index
    %c0_72 = arith.constant 0 : index
    %87 = vector.load %arg5[%c2_70, %c0_71, %c0_72] : memref<3x32x32xf32, #tpu.memory_space<vmem>>, vector<1x32x32xf32>
    %88 = vector.shape_cast %87 : vector<1x32x32xf32> to vector<32x32xf32>
    %cst_73 = arith.constant dense<0.000000e+00> : vector<32x32xf32>
    %89 = tpu.matmul %86, %88, %cst_73 {dimension_numbers = #tpu.dot_dimension_numbers<[1], [0], [0], [1], [0, 0, 1, 1], [], []>} : vector<32x32xf32>, vector<32x32xf32>, vector<32x32xf32> -> vector<32x32xf32>
    %90 = arith.addf %76, %89 : vector<32x32xf32>
    %91 = vector.shape_cast %85 : vector<2x16x32xf32> to vector<32x32xf32>
    %c2_74 = arith.constant 2 : index
    %c0_75 = arith.constant 0 : index
    %c0_76 = arith.constant 0 : index
    %92 = vector.load %arg7[%c2_74, %c0_75, %c0_76] : memref<3x32x32xf32, #tpu.memory_space<vmem>>, vector<1x32x32xf32>
    %93 = vector.shape_cast %92 : vector<1x32x32xf32> to vector<32x32xf32>
    %cst_77 = arith.constant dense<0.000000e+00> : vector<32x32xf32>
    %94 = tpu.matmul %91, %93, %cst_77 {dimension_numbers = #tpu.dot_dimension_numbers<[1], [0], [0], [1], [0, 0, 1, 1], [], []>} : vector<32x32xf32>, vector<32x32xf32>, vector<32x32xf32> -> vector<32x32xf32>
    %95 = arith.addf %81, %94 : vector<32x32xf32>
    %96 = arith.negf %90 : vector<32x32xf32>
    %97 = math.exp %96 : vector<32x32xf32>
    %cst_78 = arith.constant 1.000000e+00 : f32
    %98 = vector.broadcast %cst_78 : f32 to vector<32x32xf32>
    %99 = arith.addf %98, %97 : vector<32x32xf32>
    %100 = arith.divf %98, %99 : vector<32x32xf32>
    %101 = arith.negf %95 : vector<32x32xf32>
    %102 = math.exp %101 : vector<32x32xf32>
    %cst_79 = arith.constant 1.000000e+00 : f32
    %103 = vector.broadcast %cst_79 : f32 to vector<32x32xf32>
    %104 = arith.addf %103, %102 : vector<32x32xf32>
    %105 = arith.divf %103, %104 : vector<32x32xf32>
    %106 = arith.mulf %100, %7 : vector<32x32xf32>
    %c0_80 = arith.constant 0 : index
    %c0_81 = arith.constant 0 : index
    %c0_82 = arith.constant 0 : index
    %107 = vector.load %arg9[%c0_80, %c0_81, %c0_82] : memref<3x32x32xf32, #tpu.memory_space<vmem>>, vector<1x32x32xf32>
    %108 = vector.shape_cast %107 : vector<1x32x32xf32> to vector<32x32xf32>
    %cst_83 = arith.constant dense<0.000000e+00> : vector<32x32xf32>
    %109 = tpu.matmul %106, %108, %cst_83 {dimension_numbers = #tpu.dot_dimension_numbers<[1], [0], [0], [1], [0, 0, 1, 1], [], []>} : vector<32x32xf32>, vector<32x32xf32>, vector<32x32xf32> -> vector<32x32xf32>
    %110 = arith.addf %61, %109 : vector<32x32xf32>
    %111 = vector.shape_cast %106 : vector<32x32xf32> to vector<2x16x32xf32>
    "tpu.trace_start"() <{level = 10 : i32, message = "bnm,bmf->bnf"}> : () -> ()
    %cst_84 = arith.constant dense<0.000000e+00> : vector<2x16x32xf32>
    %112 = tpu.matmul %3, %111, %cst_84 {dimension_numbers = #tpu.dot_dimension_numbers<[2], [1], [1], [2], [0, 0, 0, 1, 1, 2], [0], [0]>} : vector<2x16x16xf32>, vector<2x16x32xf32>, vector<2x16x32xf32> -> vector<2x16x32xf32>
    "tpu.trace_stop"() : () -> ()
    %113 = vector.shape_cast %112 : vector<2x16x32xf32> to vector<32x32xf32>
    %c1_85 = arith.constant 1 : index
    %c0_86 = arith.constant 0 : index
    %c0_87 = arith.constant 0 : index
    %114 = vector.load %arg9[%c1_85, %c0_86, %c0_87] : memref<3x32x32xf32, #tpu.memory_space<vmem>>, vector<1x32x32xf32>
    %115 = vector.shape_cast %114 : vector<1x32x32xf32> to vector<32x32xf32>
    %cst_88 = arith.constant dense<0.000000e+00> : vector<32x32xf32>
    %116 = tpu.matmul %113, %115, %cst_88 {dimension_numbers = #tpu.dot_dimension_numbers<[1], [0], [0], [1], [0, 0, 1, 1], [], []>} : vector<32x32xf32>, vector<32x32xf32>, vector<32x32xf32> -> vector<32x32xf32>
    %117 = arith.addf %110, %116 : vector<32x32xf32>
    "tpu.trace_start"() <{level = 10 : i32, message = "bnm,bmf->bnf"}> : () -> ()
    %cst_89 = arith.constant dense<0.000000e+00> : vector<2x16x32xf32>
    %118 = tpu.matmul %3, %112, %cst_89 {dimension_numbers = #tpu.dot_dimension_numbers<[2], [1], [1], [2], [0, 0, 0, 1, 1, 2], [0], [0]>} : vector<2x16x16xf32>, vector<2x16x32xf32>, vector<2x16x32xf32> -> vector<2x16x32xf32>
    "tpu.trace_stop"() : () -> ()
    %cst_90 = arith.constant 2.000000e+00 : f32
    %119 = vector.broadcast %cst_90 : f32 to vector<2x16x32xf32>
    %120 = arith.mulf %119, %118 : vector<2x16x32xf32>
    %121 = arith.subf %120, %111 : vector<2x16x32xf32>
    %122 = vector.shape_cast %121 : vector<2x16x32xf32> to vector<32x32xf32>
    %c2_91 = arith.constant 2 : index
    %c0_92 = arith.constant 0 : index
    %c0_93 = arith.constant 0 : index
    %123 = vector.load %arg9[%c2_91, %c0_92, %c0_93] : memref<3x32x32xf32, #tpu.memory_space<vmem>>, vector<1x32x32xf32>
    %124 = vector.shape_cast %123 : vector<1x32x32xf32> to vector<32x32xf32>
    %cst_94 = arith.constant dense<0.000000e+00> : vector<32x32xf32>
    %125 = tpu.matmul %122, %124, %cst_94 {dimension_numbers = #tpu.dot_dimension_numbers<[1], [0], [0], [1], [0, 0, 1, 1], [], []>} : vector<32x32xf32>, vector<32x32xf32>, vector<32x32xf32> -> vector<32x32xf32>
    %126 = arith.addf %117, %125 : vector<32x32xf32>
    %127 = math.tanh %126 : vector<32x32xf32>
    %128 = arith.mulf %105, %7 : vector<32x32xf32>
    %cst_95 = arith.constant 1.000000e+00 : f32
    %129 = vector.broadcast %cst_95 : f32 to vector<32x32xf32>
    %130 = arith.subf %129, %105 : vector<32x32xf32>
    %131 = arith.mulf %130, %127 : vector<32x32xf32>
    %132 = arith.addf %128, %131 : vector<32x32xf32>
    %c0_96 = arith.constant 0 : index
    %c0_97 = arith.constant 0 : index
    %c0_98 = arith.constant 0 : index
    %133 = vector.load %arg24[%c0_96, %c0_97, %c0_98] : memref<2x32x32xf32, #tpu.memory_space<vmem>>, vector<1x32x32xf32>
    %134 = vector.shape_cast %133 : vector<1x32x32xf32> to vector<32x32xf32>
    %135 = vector.shape_cast %132 : vector<32x32xf32> to vector<1x32x32xf32>
    tpu.vector_store %arg24[%c0_96, %c0_97, %c0_98], %135 {strides = array<i32>} : memref<2x32x32xf32, #tpu.memory_space<vmem>>, vector<1x32x32xf32>,
    %c1_99 = arith.constant 1 : index
    %c0_100 = arith.constant 0 : index
    %c0_101 = arith.constant 0 : index
    %136 = vector.load %arg24[%c1_99, %c0_100, %c0_101] : memref<2x32x32xf32, #tpu.memory_space<vmem>>, vector<1x32x32xf32>
    %137 = vector.shape_cast %136 : vector<1x32x32xf32> to vector<32x32xf32>
    %c0_102 = arith.constant 0 : index
    %c0_103 = arith.constant 0 : index
    %138 = vector.load %arg19[%c0_102, %c0_103] : memref<1x32xf32, #tpu.memory_space<vmem>>, vector<1x32xf32>
    %c0_104 = arith.constant 0 : index
    %c0_105 = arith.constant 0 : index
    %139 = vector.load %arg20[%c0_104, %c0_105] : memref<1x32xf32, #tpu.memory_space<vmem>>, vector<1x32xf32>
    %c0_106 = arith.constant 0 : index
    %c0_107 = arith.constant 0 : index
    %140 = vector.load %arg21[%c0_106, %c0_107] : memref<1x32xf32, #tpu.memory_space<vmem>>, vector<1x32xf32>
    %c0_108 = arith.constant 0 : index
    %c0_109 = arith.constant 0 : index
    %c0_110 = arith.constant 0 : index
    %141 = vector.load %arg13[%c0_108, %c0_109, %c0_110] : memref<3x32x32xf32, #tpu.memory_space<vmem>>, vector<1x32x32xf32>
    %142 = vector.shape_cast %141 : vector<1x32x32xf32> to vector<32x32xf32>
    %cst_111 = arith.constant dense<0.000000e+00> : vector<32x32xf32>
    %143 = tpu.matmul %132, %142, %cst_111 {dimension_numbers = #tpu.dot_dimension_numbers<[1], [0], [0], [1], [0, 0, 1, 1], [], []>} : vector<32x32xf32>, vector<32x32xf32>, vector<32x32xf32> -> vector<32x32xf32>
    %144 = vector.broadcast %138 : vector<1x32xf32> to vector<32x32xf32>
    %145 = arith.addf %144, %143 : vector<32x32xf32>
    %c0_112 = arith.constant 0 : index
    %c0_113 = arith.constant 0 : index
    %c0_114 = arith.constant 0 : index
    %146 = vector.load %arg15[%c0_112, %c0_113, %c0_114] : memref<3x32x32xf32, #tpu.memory_space<vmem>>, vector<1x32x32xf32>
    %147 = vector.shape_cast %146 : vector<1x32x32xf32> to vector<32x32xf32>
    %cst_115 = arith.constant dense<0.000000e+00> : vector<32x32xf32>
    %148 = tpu.matmul %132, %147, %cst_115 {dimension_numbers = #tpu.dot_dimension_numbers<[1], [0], [0], [1], [0, 0, 1, 1], [], []>} : vector<32x32xf32>, vector<32x32xf32>, vector<32x32xf32> -> vector<32x32xf32>
    %149 = vector.broadcast %139 : vector<1x32xf32> to vector<32x32xf32>
    %150 = arith.addf %149, %148 : vector<32x32xf32>
    %c0_116 = arith.constant 0 : index
    %c0_117 = arith.constant 0 : index
    %c0_118 = arith.constant 0 : index
    %151 = vector.load %arg17[%c0_116, %c0_117, %c0_118] : memref<3x32x32xf32, #tpu.memory_space<vmem>>, vector<1x32x32xf32>
    %152 = vector.shape_cast %151 : vector<1x32x32xf32> to vector<32x32xf32>
    %cst_119 = arith.constant dense<0.000000e+00> : vector<32x32xf32>
    %153 = tpu.matmul %132, %152, %cst_119 {dimension_numbers = #tpu.dot_dimension_numbers<[1], [0], [0], [1], [0, 0, 1, 1], [], []>} : vector<32x32xf32>, vector<32x32xf32>, vector<32x32xf32> -> vector<32x32xf32>
    %154 = vector.broadcast %140 : vector<1x32xf32> to vector<32x32xf32>
    %155 = arith.addf %154, %153 : vector<32x32xf32>
    %156 = vector.shape_cast %132 : vector<32x32xf32> to vector<2x16x32xf32>
    "tpu.trace_start"() <{level = 10 : i32, message = "bnm,bmf->bnf"}> : () -> ()
    %cst_120 = arith.constant dense<0.000000e+00> : vector<2x16x32xf32>
    %157 = tpu.matmul %3, %156, %cst_120 {dimension_numbers = #tpu.dot_dimension_numbers<[2], [1], [1], [2], [0, 0, 0, 1, 1, 2], [0], [0]>} : vector<2x16x16xf32>, vector<2x16x32xf32>, vector<2x16x32xf32> -> vector<2x16x32xf32>
    "tpu.trace_stop"() : () -> ()
    %158 = vector.shape_cast %157 : vector<2x16x32xf32> to vector<32x32xf32>
    %c1_121 = arith.constant 1 : index
    %c0_122 = arith.constant 0 : index
    %c0_123 = arith.constant 0 : index
    %159 = vector.load %arg13[%c1_121, %c0_122, %c0_123] : memref<3x32x32xf32, #tpu.memory_space<vmem>>, vector<1x32x32xf32>
    %160 = vector.shape_cast %159 : vector<1x32x32xf32> to vector<32x32xf32>
    %cst_124 = arith.constant dense<0.000000e+00> : vector<32x32xf32>
    %161 = tpu.matmul %158, %160, %cst_124 {dimension_numbers = #tpu.dot_dimension_numbers<[1], [0], [0], [1], [0, 0, 1, 1], [], []>} : vector<32x32xf32>, vector<32x32xf32>, vector<32x32xf32> -> vector<32x32xf32>
    %162 = arith.addf %145, %161 : vector<32x32xf32>
    %163 = vector.shape_cast %157 : vector<2x16x32xf32> to vector<32x32xf32>
    %c1_125 = arith.constant 1 : index
    %c0_126 = arith.constant 0 : index
    %c0_127 = arith.constant 0 : index
    %164 = vector.load %arg15[%c1_125, %c0_126, %c0_127] : memref<3x32x32xf32, #tpu.memory_space<vmem>>, vector<1x32x32xf32>
    %165 = vector.shape_cast %164 : vector<1x32x32xf32> to vector<32x32xf32>
    %cst_128 = arith.constant dense<0.000000e+00> : vector<32x32xf32>
    %166 = tpu.matmul %163, %165, %cst_128 {dimension_numbers = #tpu.dot_dimension_numbers<[1], [0], [0], [1], [0, 0, 1, 1], [], []>} : vector<32x32xf32>, vector<32x32xf32>, vector<32x32xf32> -> vector<32x32xf32>
    %167 = arith.addf %150, %166 : vector<32x32xf32>
    %168 = vector.shape_cast %157 : vector<2x16x32xf32> to vector<32x32xf32>
    %c1_129 = arith.constant 1 : index
    %c0_130 = arith.constant 0 : index
    %c0_131 = arith.constant 0 : index
    %169 = vector.load %arg17[%c1_129, %c0_130, %c0_131] : memref<3x32x32xf32, #tpu.memory_space<vmem>>, vector<1x32x32xf32>
    %170 = vector.shape_cast %169 : vector<1x32x32xf32> to vector<32x32xf32>
    %cst_132 = arith.constant dense<0.000000e+00> : vector<32x32xf32>
    %171 = tpu.matmul %168, %170, %cst_132 {dimension_numbers = #tpu.dot_dimension_numbers<[1], [0], [0], [1], [0, 0, 1, 1], [], []>} : vector<32x32xf32>, vector<32x32xf32>, vector<32x32xf32> -> vector<32x32xf32>
    %172 = arith.addf %155, %171 : vector<32x32xf32>
    "tpu.trace_start"() <{level = 10 : i32, message = "bnm,bmf->bnf"}> : () -> ()
    %cst_133 = arith.constant dense<0.000000e+00> : vector<2x16x32xf32>
    %173 = tpu.matmul %3, %157, %cst_133 {dimension_numbers = #tpu.dot_dimension_numbers<[2], [1], [1], [2], [0, 0, 0, 1, 1, 2], [0], [0]>} : vector<2x16x16xf32>, vector<2x16x32xf32>, vector<2x16x32xf32> -> vector<2x16x32xf32>
    "tpu.trace_stop"() : () -> ()
    %cst_134 = arith.constant 2.000000e+00 : f32
    %174 = vector.broadcast %cst_134 : f32 to vector<2x16x32xf32>
    %175 = arith.mulf %174, %173 : vector<2x16x32xf32>
    %176 = arith.subf %175, %156 : vector<2x16x32xf32>
    %177 = vector.shape_cast %176 : vector<2x16x32xf32> to vector<32x32xf32>
    %c2_135 = arith.constant 2 : index
    %c0_136 = arith.constant 0 : index
    %c0_137 = arith.constant 0 : index
    %178 = vector.load %arg13[%c2_135, %c0_136, %c0_137] : memref<3x32x32xf32, #tpu.memory_space<vmem>>, vector<1x32x32xf32>
    %179 = vector.shape_cast %178 : vector<1x32x32xf32> to vector<32x32xf32>
    %cst_138 = arith.constant dense<0.000000e+00> : vector<32x32xf32>
    %180 = tpu.matmul %177, %179, %cst_138 {dimension_numbers = #tpu.dot_dimension_numbers<[1], [0], [0], [1], [0, 0, 1, 1], [], []>} : vector<32x32xf32>, vector<32x32xf32>, vector<32x32xf32> -> vector<32x32xf32>
    %181 = arith.addf %162, %180 : vector<32x32xf32>
    %182 = vector.shape_cast %176 : vector<2x16x32xf32> to vector<32x32xf32>
    %c2_139 = arith.constant 2 : index
    %c0_140 = arith.constant 0 : index
    %c0_141 = arith.constant 0 : index
    %183 = vector.load %arg15[%c2_139, %c0_140, %c0_141] : memref<3x32x32xf32, #tpu.memory_space<vmem>>, vector<1x32x32xf32>
    %184 = vector.shape_cast %183 : vector<1x32x32xf32> to vector<32x32xf32>
    %cst_142 = arith.constant dense<0.000000e+00> : vector<32x32xf32>
    %185 = tpu.matmul %182, %184, %cst_142 {dimension_numbers = #tpu.dot_dimension_numbers<[1], [0], [0], [1], [0, 0, 1, 1], [], []>} : vector<32x32xf32>, vector<32x32xf32>, vector<32x32xf32> -> vector<32x32xf32>
    %186 = arith.addf %167, %185 : vector<32x32xf32>
    %187 = vector.shape_cast %176 : vector<2x16x32xf32> to vector<32x32xf32>
    %c2_143 = arith.constant 2 : index
    %c0_144 = arith.constant 0 : index
    %c0_145 = arith.constant 0 : index
    %188 = vector.load %arg17[%c2_143, %c0_144, %c0_145] : memref<3x32x32xf32, #tpu.memory_space<vmem>>, vector<1x32x32xf32>
    %189 = vector.shape_cast %188 : vector<1x32x32xf32> to vector<32x32xf32>
    %cst_146 = arith.constant dense<0.000000e+00> : vector<32x32xf32>
    %190 = tpu.matmul %187, %189, %cst_146 {dimension_numbers = #tpu.dot_dimension_numbers<[1], [0], [0], [1], [0, 0, 1, 1], [], []>} : vector<32x32xf32>, vector<32x32xf32>, vector<32x32xf32> -> vector<32x32xf32>
    %191 = arith.addf %172, %190 : vector<32x32xf32>
    %c0_147 = arith.constant 0 : index
    %c0_148 = arith.constant 0 : index
    %c0_149 = arith.constant 0 : index
    %192 = vector.load %arg14[%c0_147, %c0_148, %c0_149] : memref<3x32x32xf32, #tpu.memory_space<vmem>>, vector<1x32x32xf32>
    %193 = vector.shape_cast %192 : vector<1x32x32xf32> to vector<32x32xf32>
    %cst_150 = arith.constant dense<0.000000e+00> : vector<32x32xf32>
    %194 = tpu.matmul %137, %193, %cst_150 {dimension_numbers = #tpu.dot_dimension_numbers<[1], [0], [0], [1], [0, 0, 1, 1], [], []>} : vector<32x32xf32>, vector<32x32xf32>, vector<32x32xf32> -> vector<32x32xf32>
    %195 = arith.addf %181, %194 : vector<32x32xf32>
    %c0_151 = arith.constant 0 : index
    %c0_152 = arith.constant 0 : index
    %c0_153 = arith.constant 0 : index
    %196 = vector.load %arg16[%c0_151, %c0_152, %c0_153] : memref<3x32x32xf32, #tpu.memory_space<vmem>>, vector<1x32x32xf32>
    %197 = vector.shape_cast %196 : vector<1x32x32xf32> to vector<32x32xf32>
    %cst_154 = arith.constant dense<0.000000e+00> : vector<32x32xf32>
    %198 = tpu.matmul %137, %197, %cst_154 {dimension_numbers = #tpu.dot_dimension_numbers<[1], [0], [0], [1], [0, 0, 1, 1], [], []>} : vector<32x32xf32>, vector<32x32xf32>, vector<32x32xf32> -> vector<32x32xf32>
    %199 = arith.addf %186, %198 : vector<32x32xf32>
    %200 = vector.shape_cast %137 : vector<32x32xf32> to vector<2x16x32xf32>
    "tpu.trace_start"() <{level = 10 : i32, message = "bnm,bmf->bnf"}> : () -> ()
    %cst_155 = arith.constant dense<0.000000e+00> : vector<2x16x32xf32>
    %201 = tpu.matmul %3, %200, %cst_155 {dimension_numbers = #tpu.dot_dimension_numbers<[2], [1], [1], [2], [0, 0, 0, 1, 1, 2], [0], [0]>} : vector<2x16x16xf32>, vector<2x16x32xf32>, vector<2x16x32xf32> -> vector<2x16x32xf32>
    "tpu.trace_stop"() : () -> ()
    %202 = vector.shape_cast %201 : vector<2x16x32xf32> to vector<32x32xf32>
    %c1_156 = arith.constant 1 : index
    %c0_157 = arith.constant 0 : index
    %c0_158 = arith.constant 0 : index
    %203 = vector.load %arg14[%c1_156, %c0_157, %c0_158] : memref<3x32x32xf32, #tpu.memory_space<vmem>>, vector<1x32x32xf32>
    %204 = vector.shape_cast %203 : vector<1x32x32xf32> to vector<32x32xf32>
    %cst_159 = arith.constant dense<0.000000e+00> : vector<32x32xf32>
    %205 = tpu.matmul %202, %204, %cst_159 {dimension_numbers = #tpu.dot_dimension_numbers<[1], [0], [0], [1], [0, 0, 1, 1], [], []>} : vector<32x32xf32>, vector<32x32xf32>, vector<32x32xf32> -> vector<32x32xf32>
    %206 = arith.addf %195, %205 : vector<32x32xf32>
    %207 = vector.shape_cast %201 : vector<2x16x32xf32> to vector<32x32xf32>
    %c1_160 = arith.constant 1 : index
    %c0_161 = arith.constant 0 : index
    %c0_162 = arith.constant 0 : index
    %208 = vector.load %arg16[%c1_160, %c0_161, %c0_162] : memref<3x32x32xf32, #tpu.memory_space<vmem>>, vector<1x32x32xf32>
    %209 = vector.shape_cast %208 : vector<1x32x32xf32> to vector<32x32xf32>
    %cst_163 = arith.constant dense<0.000000e+00> : vector<32x32xf32>
    %210 = tpu.matmul %207, %209, %cst_163 {dimension_numbers = #tpu.dot_dimension_numbers<[1], [0], [0], [1], [0, 0, 1, 1], [], []>} : vector<32x32xf32>, vector<32x32xf32>, vector<32x32xf32> -> vector<32x32xf32>
    %211 = arith.addf %199, %210 : vector<32x32xf32>
    "tpu.trace_start"() <{level = 10 : i32, message = "bnm,bmf->bnf"}> : () -> ()
    %cst_164 = arith.constant dense<0.000000e+00> : vector<2x16x32xf32>
    %212 = tpu.matmul %3, %201, %cst_164 {dimension_numbers = #tpu.dot_dimension_numbers<[2], [1], [1], [2], [0, 0, 0, 1, 1, 2], [0], [0]>} : vector<2x16x16xf32>, vector<2x16x32xf32>, vector<2x16x32xf32> -> vector<2x16x32xf32>
    "tpu.trace_stop"() : () -> ()
    %cst_165 = arith.constant 2.000000e+00 : f32
    %213 = vector.broadcast %cst_165 : f32 to vector<2x16x32xf32>
    %214 = arith.mulf %213, %212 : vector<2x16x32xf32>
    %215 = arith.subf %214, %200 : vector<2x16x32xf32>
    %216 = vector.shape_cast %215 : vector<2x16x32xf32> to vector<32x32xf32>
    %c2_166 = arith.constant 2 : index
    %c0_167 = arith.constant 0 : index
    %c0_168 = arith.constant 0 : index
    %217 = vector.load %arg14[%c2_166, %c0_167, %c0_168] : memref<3x32x32xf32, #tpu.memory_space<vmem>>, vector<1x32x32xf32>
    %218 = vector.shape_cast %217 : vector<1x32x32xf32> to vector<32x32xf32>
    %cst_169 = arith.constant dense<0.000000e+00> : vector<32x32xf32>
    %219 = tpu.matmul %216, %218, %cst_169 {dimension_numbers = #tpu.dot_dimension_numbers<[1], [0], [0], [1], [0, 0, 1, 1], [], []>} : vector<32x32xf32>, vector<32x32xf32>, vector<32x32xf32> -> vector<32x32xf32>
    %220 = arith.addf %206, %219 : vector<32x32xf32>
    %221 = vector.shape_cast %215 : vector<2x16x32xf32> to vector<32x32xf32>
    %c2_170 = arith.constant 2 : index
    %c0_171 = arith.constant 0 : index
    %c0_172 = arith.constant 0 : index
    %222 = vector.load %arg16[%c2_170, %c0_171, %c0_172] : memref<3x32x32xf32, #tpu.memory_space<vmem>>, vector<1x32x32xf32>
    %223 = vector.shape_cast %222 : vector<1x32x32xf32> to vector<32x32xf32>
    %cst_173 = arith.constant dense<0.000000e+00> : vector<32x32xf32>
    %224 = tpu.matmul %221, %223, %cst_173 {dimension_numbers = #tpu.dot_dimension_numbers<[1], [0], [0], [1], [0, 0, 1, 1], [], []>} : vector<32x32xf32>, vector<32x32xf32>, vector<32x32xf32> -> vector<32x32xf32>
    %225 = arith.addf %211, %224 : vector<32x32xf32>
    %226 = arith.negf %220 : vector<32x32xf32>
    %227 = math.exp %226 : vector<32x32xf32>
    %cst_174 = arith.constant 1.000000e+00 : f32
    %228 = vector.broadcast %cst_174 : f32 to vector<32x32xf32>
    %229 = arith.addf %228, %227 : vector<32x32xf32>
    %230 = arith.divf %228, %229 : vector<32x32xf32>
    %231 = arith.negf %225 : vector<32x32xf32>
    %232 = math.exp %231 : vector<32x32xf32>
    %cst_175 = arith.constant 1.000000e+00 : f32
    %233 = vector.broadcast %cst_175 : f32 to vector<32x32xf32>
    %234 = arith.addf %233, %232 : vector<32x32xf32>
    %235 = arith.divf %233, %234 : vector<32x32xf32>
    %236 = arith.mulf %230, %137 : vector<32x32xf32>
    %c0_176 = arith.constant 0 : index
    %c0_177 = arith.constant 0 : index
    %c0_178 = arith.constant 0 : index
    %237 = vector.load %arg18[%c0_176, %c0_177, %c0_178] : memref<3x32x32xf32, #tpu.memory_space<vmem>>, vector<1x32x32xf32>
    %238 = vector.shape_cast %237 : vector<1x32x32xf32> to vector<32x32xf32>
    %cst_179 = arith.constant dense<0.000000e+00> : vector<32x32xf32>
    %239 = tpu.matmul %236, %238, %cst_179 {dimension_numbers = #tpu.dot_dimension_numbers<[1], [0], [0], [1], [0, 0, 1, 1], [], []>} : vector<32x32xf32>, vector<32x32xf32>, vector<32x32xf32> -> vector<32x32xf32>
    %240 = arith.addf %191, %239 : vector<32x32xf32>
    %241 = vector.shape_cast %236 : vector<32x32xf32> to vector<2x16x32xf32>
    "tpu.trace_start"() <{level = 10 : i32, message = "bnm,bmf->bnf"}> : () -> ()
    %cst_180 = arith.constant dense<0.000000e+00> : vector<2x16x32xf32>
    %242 = tpu.matmul %3, %241, %cst_180 {dimension_numbers = #tpu.dot_dimension_numbers<[2], [1], [1], [2], [0, 0, 0, 1, 1, 2], [0], [0]>} : vector<2x16x16xf32>, vector<2x16x32xf32>, vector<2x16x32xf32> -> vector<2x16x32xf32>
    "tpu.trace_stop"() : () -> ()
    %243 = vector.shape_cast %242 : vector<2x16x32xf32> to vector<32x32xf32>
    %c1_181 = arith.constant 1 : index
    %c0_182 = arith.constant 0 : index
    %c0_183 = arith.constant 0 : index
    %244 = vector.load %arg18[%c1_181, %c0_182, %c0_183] : memref<3x32x32xf32, #tpu.memory_space<vmem>>, vector<1x32x32xf32>
    %245 = vector.shape_cast %244 : vector<1x32x32xf32> to vector<32x32xf32>
    %cst_184 = arith.constant dense<0.000000e+00> : vector<32x32xf32>
    %246 = tpu.matmul %243, %245, %cst_184 {dimension_numbers = #tpu.dot_dimension_numbers<[1], [0], [0], [1], [0, 0, 1, 1], [], []>} : vector<32x32xf32>, vector<32x32xf32>, vector<32x32xf32> -> vector<32x32xf32>
    %247 = arith.addf %240, %246 : vector<32x32xf32>
    "tpu.trace_start"() <{level = 10 : i32, message = "bnm,bmf->bnf"}> : () -> ()
    %cst_185 = arith.constant dense<0.000000e+00> : vector<2x16x32xf32>
    %248 = tpu.matmul %3, %242, %cst_185 {dimension_numbers = #tpu.dot_dimension_numbers<[2], [1], [1], [2], [0, 0, 0, 1, 1, 2], [0], [0]>} : vector<2x16x16xf32>, vector<2x16x32xf32>, vector<2x16x32xf32> -> vector<2x16x32xf32>
    "tpu.trace_stop"() : () -> ()
    %cst_186 = arith.constant 2.000000e+00 : f32
    %249 = vector.broadcast %cst_186 : f32 to vector<2x16x32xf32>
    %250 = arith.mulf %249, %248 : vector<2x16x32xf32>
    %251 = arith.subf %250, %241 : vector<2x16x32xf32>
    %252 = vector.shape_cast %251 : vector<2x16x32xf32> to vector<32x32xf32>
    %c2_187 = arith.constant 2 : index
    %c0_188 = arith.constant 0 : index
    %c0_189 = arith.constant 0 : index
    %253 = vector.load %arg18[%c2_187, %c0_188, %c0_189] : memref<3x32x32xf32, #tpu.memory_space<vmem>>, vector<1x32x32xf32>
    %254 = vector.shape_cast %253 : vector<1x32x32xf32> to vector<32x32xf32>
    %cst_190 = arith.constant dense<0.000000e+00> : vector<32x32xf32>
    %255 = tpu.matmul %252, %254, %cst_190 {dimension_numbers = #tpu.dot_dimension_numbers<[1], [0], [0], [1], [0, 0, 1, 1], [], []>} : vector<32x32xf32>, vector<32x32xf32>, vector<32x32xf32> -> vector<32x32xf32>
    %256 = arith.addf %247, %255 : vector<32x32xf32>
    %257 = math.tanh %256 : vector<32x32xf32>
    %258 = arith.mulf %235, %137 : vector<32x32xf32>
    %cst_191 = arith.constant 1.000000e+00 : f32
    %259 = vector.broadcast %cst_191 : f32 to vector<32x32xf32>
    %260 = arith.subf %259, %235 : vector<32x32xf32>
    %261 = arith.mulf %260, %257 : vector<32x32xf32>
    %262 = arith.addf %258, %261 : vector<32x32xf32>
    %c1_192 = arith.constant 1 : index
    %c0_193 = arith.constant 0 : index
    %c0_194 = arith.constant 0 : index
    %263 = vector.load %arg24[%c1_192, %c0_193, %c0_194] : memref<2x32x32xf32, #tpu.memory_space<vmem>>, vector<1x32x32xf32>
    %264 = vector.shape_cast %263 : vector<1x32x32xf32> to vector<32x32xf32>
    %265 = vector.shape_cast %262 : vector<32x32xf32> to vector<1x32x32xf32>
    tpu.vector_store %arg24[%c1_192, %c0_193, %c0_194], %265 {strides = array<i32>} : memref<2x32x32xf32, #tpu.memory_space<vmem>>, vector<1x32x32xf32>,
    %c0_195 = arith.constant 0 : index
    %c0_196 = arith.constant 0 : index
    %c0_197 = arith.constant 0 : index
    %266 = vector.load %arg22[%c0_195, %c0_196, %c0_197] : memref<1x32x32xf32, #tpu.memory_space<vmem>>, vector<1x32x32xf32>
    %267 = vector.shape_cast %266 : vector<1x32x32xf32> to vector<32x32xf32>
    %268 = vector.shape_cast %262 : vector<32x32xf32> to vector<1x32x32xf32>
    tpu.vector_store %arg22[%c0_195, %c0_196, %c0_197], %268 {strides = array<i32>} : memref<1x32x32xf32, #tpu.memory_space<vmem>>, vector<1x32x32xf32>,
    %c7_i32 = arith.constant 7 : i32
    %269 = arith.cmpi eq, %arg0, %c7_i32 : i32
    %270 = arith.extui %269 : i1 to i32
    %c0_i32_198 = arith.constant 0 : i32
    %271 = arith.cmpi ne, %270, %c0_i32_198 : i32
    scf.if %271 {
      %c0_199 = arith.constant 0 : index
      %c0_200 = arith.constant 0 : index
      %c0_201 = arith.constant 0 : index
      %272 = vector.load %arg24[%c0_199, %c0_200, %c0_201] : memref<2x32x32xf32, #tpu.memory_space<vmem>>, vector<2x32x32xf32>
      %c0_202 = arith.constant 0 : index
      %c0_203 = arith.constant 0 : index
      %c0_204 = arith.constant 0 : index
      %273 = vector.load %arg23[%c0_202, %c0_203, %c0_204] : memref<2x32x32xf32, #tpu.memory_space<vmem>>, vector<2x32x32xf32>
      tpu.vector_store %arg23[%c0_202, %c0_203, %c0_204], %272 {strides = array<i32>} : memref<2x32x32xf32, #tpu.memory_space<vmem>>, vector<2x32x32xf32>,
    } else {
    }
    return
  }
  func.func @transform_0(%arg0: i32) -> (i32, i32, i32) {
    %c0_i32 = arith.constant 0 : i32
    %c0_i32_0 = arith.constant 0 : i32
    %c0_i32_1 = arith.constant 0 : i32
    return %arg0, %c0_i32, %c0_i32_0 : i32, i32, i32
  }
  func.func @transform_1(%arg0: i32) -> (i32, i32, i32) {
    %c0_i32 = arith.constant 0 : i32
    %c0_i32_0 = arith.constant 0 : i32
    %c0_i32_1 = arith.constant 0 : i32
    %c0_i32_2 = arith.constant 0 : i32
    return %c0_i32, %c0_i32_0, %c0_i32_1 : i32, i32, i32
  }
  func.func @transform_2(%arg0: i32) -> (i32, i32, i32) {
    %c0_i32 = arith.constant 0 : i32
    %c0_i32_0 = arith.constant 0 : i32
    %c0_i32_1 = arith.constant 0 : i32
    %c0_i32_2 = arith.constant 0 : i32
    return %c0_i32, %c0_i32_0, %c0_i32_1 : i32, i32, i32
  }
  func.func @transform_3(%arg0: i32) -> (i32, i32, i32) {
    %c0_i32 = arith.constant 0 : i32
    %c0_i32_0 = arith.constant 0 : i32
    %c0_i32_1 = arith.constant 0 : i32
    %c0_i32_2 = arith.constant 0 : i32
    return %c0_i32, %c0_i32_0, %c0_i32_1 : i32, i32, i32
  }
  func.func @transform_4(%arg0: i32) -> (i32, i32, i32) {
    %c0_i32 = arith.constant 0 : i32
    %c0_i32_0 = arith.constant 0 : i32
    %c0_i32_1 = arith.constant 0 : i32
    %c0_i32_2 = arith.constant 0 : i32
    return %c0_i32, %c0_i32_0, %c0_i32_1 : i32, i32, i32
  }
  func.func @transform_5(%arg0: i32) -> (i32, i32, i32) {
    %c0_i32 = arith.constant 0 : i32
    %c0_i32_0 = arith.constant 0 : i32
    %c0_i32_1 = arith.constant 0 : i32
    %c0_i32_2 = arith.constant 0 : i32
    return %c0_i32, %c0_i32_0, %c0_i32_1 : i32, i32, i32
  }
  func.func @transform_6(%arg0: i32) -> (i32, i32, i32) {
    %c0_i32 = arith.constant 0 : i32
    %c0_i32_0 = arith.constant 0 : i32
    %c0_i32_1 = arith.constant 0 : i32
    %c0_i32_2 = arith.constant 0 : i32
    return %c0_i32, %c0_i32_0, %c0_i32_1 : i32, i32, i32
  }
  func.func @transform_7(%arg0: i32) -> (i32, i32, i32) {
    %c0_i32 = arith.constant 0 : i32
    %c0_i32_0 = arith.constant 0 : i32
    %c0_i32_1 = arith.constant 0 : i32
    %c0_i32_2 = arith.constant 0 : i32
    return %c0_i32, %c0_i32_0, %c0_i32_1 : i32, i32, i32
  }
  func.func @transform_8(%arg0: i32) -> (i32, i32, i32) {
    %c0_i32 = arith.constant 0 : i32
    %c0_i32_0 = arith.constant 0 : i32
    %c0_i32_1 = arith.constant 0 : i32
    %c0_i32_2 = arith.constant 0 : i32
    return %c0_i32, %c0_i32_0, %c0_i32_1 : i32, i32, i32
  }
  func.func @transform_9(%arg0: i32) -> (i32, i32) {
    %c0_i32 = arith.constant 0 : i32
    %c0_i32_0 = arith.constant 0 : i32
    %c0_i32_1 = arith.constant 0 : i32
    return %c0_i32, %c0_i32_0 : i32, i32
  }
  func.func @transform_10(%arg0: i32) -> (i32, i32) {
    %c0_i32 = arith.constant 0 : i32
    %c0_i32_0 = arith.constant 0 : i32
    %c0_i32_1 = arith.constant 0 : i32
    return %c0_i32, %c0_i32_0 : i32, i32
  }
  func.func @transform_11(%arg0: i32) -> (i32, i32) {
    %c0_i32 = arith.constant 0 : i32
    %c0_i32_0 = arith.constant 0 : i32
    %c0_i32_1 = arith.constant 0 : i32
    return %c0_i32, %c0_i32_0 : i32, i32
  }
  func.func @transform_12(%arg0: i32) -> (i32, i32, i32) {
    %c0_i32 = arith.constant 0 : i32
    %c0_i32_0 = arith.constant 0 : i32
    %c0_i32_1 = arith.constant 0 : i32
    %c0_i32_2 = arith.constant 0 : i32
    return %c0_i32, %c0_i32_0, %c0_i32_1 : i32, i32, i32
  }
  func.func @transform_13(%arg0: i32) -> (i32, i32, i32) {
    %c0_i32 = arith.constant 0 : i32
    %c0_i32_0 = arith.constant 0 : i32
    %c0_i32_1 = arith.constant 0 : i32
    %c0_i32_2 = arith.constant 0 : i32
    return %c0_i32, %c0_i32_0, %c0_i32_1 : i32, i32, i32
  }
  func.func @transform_14(%arg0: i32) -> (i32, i32, i32) {
    %c0_i32 = arith.constant 0 : i32
    %c0_i32_0 = arith.constant 0 : i32
    %c0_i32_1 = arith.constant 0 : i32
    %c0_i32_2 = arith.constant 0 : i32
    return %c0_i32, %c0_i32_0, %c0_i32_1 : i32, i32, i32
  }
  func.func @transform_15(%arg0: i32) -> (i32, i32, i32) {
    %c0_i32 = arith.constant 0 : i32
    %c0_i32_0 = arith.constant 0 : i32
    %c0_i32_1 = arith.constant 0 : i32
    %c0_i32_2 = arith.constant 0 : i32
    return %c0_i32, %c0_i32_0, %c0_i32_1 : i32, i32, i32
  }
  func.func @transform_16(%arg0: i32) -> (i32, i32, i32) {
    %c0_i32 = arith.constant 0 : i32
    %c0_i32_0 = arith.constant 0 : i32
    %c0_i32_1 = arith.constant 0 : i32
    %c0_i32_2 = arith.constant 0 : i32
    return %c0_i32, %c0_i32_0, %c0_i32_1 : i32, i32, i32
  }
  func.func @transform_17(%arg0: i32) -> (i32, i32, i32) {
    %c0_i32 = arith.constant 0 : i32
    %c0_i32_0 = arith.constant 0 : i32
    %c0_i32_1 = arith.constant 0 : i32
    %c0_i32_2 = arith.constant 0 : i32
    return %c0_i32, %c0_i32_0, %c0_i32_1 : i32, i32, i32
  }
  func.func @transform_18(%arg0: i32) -> (i32, i32) {
    %c0_i32 = arith.constant 0 : i32
    %c0_i32_0 = arith.constant 0 : i32
    %c0_i32_1 = arith.constant 0 : i32
    return %c0_i32, %c0_i32_0 : i32, i32
  }
  func.func @transform_19(%arg0: i32) -> (i32, i32) {
    %c0_i32 = arith.constant 0 : i32
    %c0_i32_0 = arith.constant 0 : i32
    %c0_i32_1 = arith.constant 0 : i32
    return %c0_i32, %c0_i32_0 : i32, i32
  }
  func.func @transform_20(%arg0: i32) -> (i32, i32) {
    %c0_i32 = arith.constant 0 : i32
    %c0_i32_0 = arith.constant 0 : i32
    %c0_i32_1 = arith.constant 0 : i32
    return %c0_i32, %c0_i32_0 : i32, i32
  }
  func.func @transform_21(%arg0: i32) -> (i32, i32, i32) {
    %c0_i32 = arith.constant 0 : i32
    %c0_i32_0 = arith.constant 0 : i32
    %c0_i32_1 = arith.constant 0 : i32
    return %arg0, %c0_i32, %c0_i32_0 : i32, i32, i32
  }
  func.func @transform_22(%arg0: i32) -> (i32, i32, i32) {
    %c0_i32 = arith.constant 0 : i32
    %c0_i32_0 = arith.constant 0 : i32
    %c0_i32_1 = arith.constant 0 : i32
    %c0_i32_2 = arith.constant 0 : i32
    return %c0_i32, %c0_i32_0, %c0_i32_1 : i32, i32, i32
  }
}

</mosaic_0001>

<bundles_post_ra>
// kernel: dcrnn_encoder_forward.1
= control target key start
LH: loop header
LB: loop body
LE: loop exit
PB: predicated region body
PF: predicated region fallthrough
CT: control target
= control target key end

     0   :  { %s5447_s0 = inlined_call_operand.vmem [shape: f32[8,32,2], index: 0, kind: input, shape index: {}]   ;;  %s5448_s1 = inlined_call_operand.vmem [shape: f32[2,16,16], index: 1, kind: input, shape index: {}]   ;;  %s5449_s2 = inlined_call_operand.vmem [shape: f32[2,32,32], index: 2, kind: input, shape index: {}]   ;;  %s5450_s3 = inlined_call_operand.vmem [shape: f32[3,2,32], index: 3, kind: input, shape index: {}]   ;;  %s5451_s4 = inlined_call_operand.vmem [shape: f32[3,32,32], index: 4, kind: input, shape index: {}]   ;;  %s5452_s5 = inlined_call_operand.vmem [shape: f32[3,2,32], index: 5, kind: input, shape index: {}]   ;;  %s5453_s6 = inlined_call_operand.vmem [shape: f32[3,32,32], index: 6, kind: input, shape index: {}]   ;;  %s5454_s7 = inlined_call_operand.vmem [shape: f32[3,2,32], index: 7, kind: input, shape index: {}]   ;;  %s5455_s8 = inlined_call_operand.vmem [shape: f32[3,32,32], index: 8, kind: input, shape index: {}]   ;;  %s5456_s9 = inlined_call_operand.vmem [shape: f32[1,32], index: 9, kind: input, shape index: {}]   ;;  %s5457_s10 = inlined_call_operand.vmem [shape: f32[1,32], index: 10, kind: input, shape index: {}]   ;;  %s5458_s11 = inlined_call_operand.vmem [shape: f32[1,32], index: 11, kind: input, shape index: {}]   ;;  %s5459_s12 = inlined_call_operand.vmem [shape: f32[3,32,32], index: 12, kind: input, shape index: {}]   ;;  %s5460_s13 = inlined_call_operand.hbm [shape: f32[3,32,32], index: 13, kind: input, shape index: {}]   ;;  %s5461_s14 = inlined_call_operand.hbm [shape: f32[3,32,32], index: 14, kind: input, shape index: {}]   ;;  %s5462_s15 = inlined_call_operand.hbm [shape: f32[3,32,32], index: 15, kind: input, shape index: {}]   ;;  %s5463_s16 = inlined_call_operand.hbm [shape: f32[3,32,32], index: 16, kind: input, shape index: {}]   ;;  %s5464_s17 = inlined_call_operand.hbm [shape: f32[3,32,32], index: 17, kind: input, shape index: {}]   ;;  %s5465_s18 = inlined_call_operand.vmem [shape: f32[1,32], index: 18, kind: input, shape index: {}]   ;;  %s5466_s19 = inlined_call_operand.vmem [shape: f32[1,32], index: 19, kind: input, shape index: {}]   ;;  %s5467_s20 = inlined_call_operand.hbm [shape: f32[1,32], index: 20, kind: input, shape index: {}]   ;;  %s5468_s21 = inlined_call_operand.vmem [shape: f32[8,32,32], index: 21, kind: output, shape index: {0}]   ;;  %s5469_s22 = inlined_call_operand.vmem [shape: f32[2,32,32], index: 22, kind: output, shape index: {1}]  }
   0x1   :  { %5477 = sst [smem:[#allocation18_spill]] %s5447_s0 }
   0x2   :  { %5478 = sst [smem:[#allocation19_spill]] %s5448_s1 }
   0x3   :  { %5479 = sst [smem:[#allocation20_spill]] %s5449_s2 }
   0x4   :  { %5480 = sst [smem:[#allocation21_spill]] %s5450_s3 }
   0x5   :  { %5481 = sst [smem:[#allocation22_spill]] %s5451_s4 }
   0x6   :  { %5482 = sst [smem:[#allocation23_spill]] %s5452_s5 }
   0x7   :  { %5483 = sst [smem:[#allocation24_spill]] %s5453_s6 }
   0x8   :  { %5484 = sst [smem:[#allocation25_spill]] %s5460_s13 }
   0x9   :  { %5485 = sst [smem:[#allocation26_spill]] %s5461_s14 }
   0xa   :  { %5486 = sst [smem:[#allocation27_spill]] %s5463_s16 }
   0xb   :  { %28 = vsyncpa [#allocation4], 0 }
   0xc   :  { %29 = vsyncpa [#allocation6], 0 }
   0xd   :  { %30 = vsyncpa [#allocation9], 0 }
   0xe   :  { %31 = vsyncpa [#allocation12], 0  ;;  %s4308_s3 = smov 0  }
   0xf LB: > { %5487 = sst [smem:[#allocation17_spill]] %s4183_s3  ;;  %s4314_s28 = sadd.s32 4294967295, %s4183_s3   ;;  %s4183_s3 = sphi %s4308_s3, %s37_s3  }
  0x10   : > { %p3537_p0 = scmp.ge.s32.totalorder %s4183_s3, 1  ;;  %p535_p1 = scmp.lt.s32.totalorder %s4183_s3, 9 }
  0x11   : > { %p3538_p2 = scmp.ne.s32.totalorder %s4314_s28, 0  ;;  %p3861_p3 = scmp.eq.s32.totalorder %s4314_s28, 0 }
  0x12   : > { %s5488_s14 = sld [smem:[#allocation26_spill]]  ;;  %p4323_p4 = pnand %p3537_p0, %p535_p1 }
  0x13   : > { %s5490_s16 = sld [smem:[#allocation27_spill]]  ;;  %s4185_s24 = smov [#allocation5]  }
  0x14   : > { %p3842_p5 = pneg %p4323_p4  ;;  %s598_s6 = sshll.u32 %s4185_s24, 4  ;;  %s599_s6 = int_to_ptr.vmem [resolvable:$true] %s598_s6 }
  0x15   : > { %s4186_s26 = smov [#allocation8]   ;;  %s5492_s13 = sld [smem:[#allocation25_spill]] }
  0x16   : > { %p4334_p6 = pnand %p3861_p3, %p3842_p5  ;;  %s626_s2 = sshll.u32 %s4186_s26, 4  ;;  %s627_s2 = int_to_ptr.vmem [resolvable:$true] %s626_s2 }
  0x17   : > { %s4187_s23 = smov 128   ;;  %s4188_s1 = smov 8  }
  0x18   : > { %s596_s4 = sshll.u32 %s5488_s14, 4  ;;  %s4189_s24 = smov [#allocation3]   ;;  %s597_s4 = int_to_ptr.hbm [resolvable:$true] %s596_s4 }
  0x19   : > { %s624_s5 = sshll.u32 %s5490_s16, 4  ;;  %s584_s14 = sshll.u32 %s4189_s24, 4  ;;  %s625_s5 = int_to_ptr.hbm [resolvable:$true] %s624_s5  ;;  %s585_s14 = int_to_ptr.vmem [resolvable:$true] %s584_s14 }
  0x1a   : > { %3848 = dma.hbm_to_vmem [thread:$0]  (!%p4334_p6), %s597_s4, 1536, %s599_s6, [#allocation6], %s4187_s23, %s4187_s23, %s4188_s1  }
  0x1b   : > { %s582_s30 = sshll.u32 %s5492_s13, 4  ;;  %s610_s26 = sshll.u32 %s5462_s15, 4  ;;  %s583_s30 = int_to_ptr.hbm [resolvable:$true] %s582_s30  ;;  %s611_s26 = int_to_ptr.hbm [resolvable:$true] %s610_s26 }
  0x1c   : > { %3854 = dma.hbm_to_vmem [thread:$0]  (!%p4334_p6), %s625_s5, 1536, %s627_s2, [#allocation9], %s4187_s23, %s4187_s23, %s4188_s1  }
  0x1d   : > { %3845 = dma.hbm_to_vmem [thread:$0]  (!%p4334_p6), %s583_s30, 1536, %s585_s14, [#allocation4], %s4187_s23, %s4187_s23, %s4188_s1  }
  0x1e   : > { %s638_s13 = sshll.u32 %s5464_s17, 4  ;;  %s4190_s4 = smov [#allocation7]   ;;  %s639_s13 = int_to_ptr.hbm [resolvable:$true] %s638_s13 }
  0x1f   : > { %s612_s6 = sshll.u32 %s4190_s4, 4  ;;  %s4191_s5 = smov [#allocation10]   ;;  %s613_s6 = int_to_ptr.vmem [resolvable:$true] %s612_s6 }
  0x20   : > { %3851 = dma.hbm_to_vmem [thread:$0]  (!%p4334_p6), %s611_s26, 1536, %s613_s6, [#allocation6], %s4187_s23, %s4187_s23, %s4188_s1  }
  0x21   : > { %s640_s2 = sshll.u32 %s4191_s5, 4  ;;  %s659_s3 = sshll.u32 %s5467_s20, 4  ;;  %s641_s2 = int_to_ptr.vmem [resolvable:$true] %s640_s2  ;;  %s660_s3 = int_to_ptr.hbm [resolvable:$true] %s659_s3 }
  0x22   : > { %3857 = dma.hbm_to_vmem [thread:$0]  (!%p4334_p6), %s639_s13, 1536, %s641_s2, [#allocation9], %s4187_s23, %s4187_s23, %s4188_s1  }
  0x23   : > { %s4192_s14 = smov [#allocation11]   ;;  %682 = sbr.rel (%p4323_p4) target bundleno = 2485 (0x9b5), region = 104 }
  0x24   : > { %s661_s30 = sshll.u32 %s4192_s14, 4  ;;  %s662_s30 = int_to_ptr.vmem [resolvable:$true] %s661_s30 }
  0x25   : > { %3860 = dma.hbm_to_vmem [thread:$0]  (!%p4334_p6), %s660_s3, 16, %s662_s30, [#allocation12]  }
  0x28   : > { %4166 = dma.done.wait (%p3861_p3), [#allocation4], 1536  }
  0x29   : > { %4168 = vsyncadd (%p3861_p3), [#allocation4], 4294965760 }
  0x2a   : > { %4170 = dma.done.wait (%p3861_p3), [#allocation6], 3072  }
  0x2b   : > { %4172 = vsyncadd (%p3861_p3), [#allocation6], 4294964224 }
  0x2c   : > { %4174 = dma.done.wait (%p3861_p3), [#allocation9], 3072  }
  0x2d   : > { %4176 = vsyncadd (%p3861_p3), [#allocation9], 4294964224 }
  0x2e   : > { %4178 = dma.done.wait (%p3861_p3), [#allocation12], 16  }
  0x2f   : > { %4180 = vsyncadd (%p3861_p3), [#allocation12], 4294967280  ;;  %p770_p7 = scmp.lt.s32.totalorder %s4314_s28, 7  ;;  %s5493_s1 = sld [smem:[#allocation18_spill]] }
  0x30   : > { %s5494_s2 = sld [smem:[#allocation20_spill]] (!%p3538_p2) }
  0x31   : > { %s771_s13 = scalar_select %p770_p7, %s4314_s28, 7 }
  0x32   : > { %783 = sbr.rel (%p3538_p2) target bundleno = 64 (0x40), region = 132 }
  0x33   : > { %s3815_s0 = sshll.u32 %s771_s13, 5 }
  0x34   : > { %s4390_s4 = scalar_lea.vmem %s5468_s21, %s3815_s0 }
  0x35   : > { %s4385_s26 = scalar_lea.vmem %s5493_s1, %s3815_s0 }
  0x37   : > { %v784_v0 = vld [vmem:[%s5494_s2] sm:$0xff]  ;;  %vm792_vm0 = vcmask 261120   ;;  %v785_v1 = vld [vmem:[%s5494_s2 + $0x8] sm:$0xff]  ;;  %v786_v2 = vld [vmem:[%s5494_s2 + $0x10] sm:$0xff] }
  0x38   : > { %793 = vst.msk [vmem:[#allocation2] sm:$0xff] %vm792_vm0, %v784_v0  ;;  %v787_v3 = vld [vmem:[%s5494_s2 + $0x18] sm:$0xff]  ;;  %v788_v4 = vld [vmem:[%s5494_s2 + $0x20] sm:$0xff]  ;;  %v789_v5 = vld [vmem:[%s5494_s2 + $0x28] sm:$0xff] }
  0x39   : > { %794 = vst.msk [vmem:[#allocation2 + $0x8] sm:$0xff] %vm792_vm0, %v785_v1  ;;  %v790_v6 = vld [vmem:[%s5494_s2 + $0x30] sm:$0xff]  ;;  %v791_v7 = vld [vmem:[%s5494_s2 + $0x38] sm:$0xff] }
  0x3a   : > { %795 = vst.msk [vmem:[#allocation2 + $0x10] sm:$0xff] %vm792_vm0, %v786_v2 }
  0x3b   : > { %796 = vst.msk [vmem:[#allocation2 + $0x18] sm:$0xff] %vm792_vm0, %v787_v3 }
  0x3c   : > { %797 = vst.msk [vmem:[#allocation2 + $0x20] sm:$0xff] %vm792_vm0, %v788_v4 }
  0x3d   : > { %798 = vst.msk [vmem:[#allocation2 + $0x28] sm:$0xff] %vm792_vm0, %v789_v5 }
  0x3e   : > { %799 = vst.msk [vmem:[#allocation2 + $0x30] sm:$0xff] %vm792_vm0, %v790_v6 }
  0x3f   : > { %800 = vst.msk [vmem:[#allocation2 + $0x38] sm:$0xff] %vm792_vm0, %v791_v7 }
  0x40 PF: > { %vm830_vm1 = vcmask 1041408   ;;  %s5495_s3 = sld [smem:[#allocation23_spill]]  ;;  %v4422_v9 = vld [vmem:[%s4385_s26 + $0x10] sm:$0xff]  ;;  %vm817_vm2 = vcmask 15360   ;;  %v4426_v10 = vld [vmem:[%s4385_s26 + $0x8] sm:$0xff]  ;;  %v4429_v11 = vld [vmem:[%s4385_s26] sm:$0xff] }
  0x41   : > { %v4438_v12 = vld [vmem:[%s4385_s26 + $0x18] sm:$0xff]  ;;  %s5497_s0 = sld [smem:[#allocation21_spill]]  ;;  %v910_v14 = vld [vmem:[%s5454_s7] sm:$0x3]  ;;  %vm950_vm3 = vcmask 130048   ;;  %vm1319_vm4 = vcmask 261120  }
  0x42   : > { %3567 = vmatpush.msk.msra.mxu2 %vm830_vm1, %v910_v14  ;;  %s5498_s27 = sld [smem:[#allocation19_spill]]  ;;  %v3588_v21 = vld [vmem:[%s5454_s7 + $0x2] sm:$0x3]  ;;  %v3610_v35 = vld [vmem:[%s5454_s7 + $0x4] sm:$0x3]  ;;  %v4563_v36 = vld [vmem:[#allocation2 + $0x8] sm:$0xff] }
  0x43   : > { %3568 = vmatmul.msk.f32.vlgmr.msra.gmra.mxu2 %vm817_vm2, %v4429_v11  ;;  %s5499_s5 = sld [smem:[#allocation22_spill]]  ;;  %v4547_v32 = vld [vmem:[#allocation2] sm:$0xff]  ;;  %v4569_v37 = vld [vmem:[#allocation2 + $0x10] sm:$0xff]  ;;  %v4573_v38 = vld [vmem:[#allocation2 + $0x18] sm:$0xff]  ;;  %p3812_p8 = scmp.ne.s32.totalorder %s4314_s28, 7 }
  0x44   : > { %3589 = vmatpush.msk.msrb.mxu2 %vm830_vm1, %v3588_v21  ;;  %s5500_s30 = sld [smem:[#allocation24_spill]] }
  0x46   : > { %s5496_s14 = smov %s5495_s3  ;;  %v870_v8 = vld [vmem:[%s5495_s3] sm:$0x3]  ;;  %3611 = vmatpush.msk.msra.mxu2 %vm830_vm1, %v3610_v35 }
  0x47   : > { %3817 = vmatpush.msk.msra.mxu3 %vm830_vm1, %v870_v8  ;;  %3562 = vmatpush.msk.msra.mxu1 %vm830_vm1, %v870_v8  ;;  %v816_v13 = vld [vmem:[%s5497_s0] sm:$0x3]  ;;  %v3576_v19 = vld [vmem:[%s5497_s0 + $0x2] sm:$0x3]  ;;  %v3604_v33 = vld [vmem:[%s5496_s14 + $0x4] sm:$0x3] }
  0x48   : > { %3565 = vmatmul.msk.f32.vlgmr.msra.gmra.mxu3 %vm817_vm2, %v4422_v9  ;;  %3563 = vmatmul.msk.f32.vlgmr.msra.gmra.mxu1 %vm817_vm2, %v4429_v11  ;;  %v4462_v15 = vld [vmem:[%s5498_s27] sm:$0xff]  ;;  %v4473_v16 = vld [vmem:[%s5498_s27 + $0x8] sm:$0xff]  ;;  %v4484_v17 = vld [vmem:[%s5498_s27 + $0x10] sm:$0xff] }
  0x49   : > { %971 = vmatpush.msrb.mxu3 %v4426_v10  ;;  %3557 = vmatpush.msk.msra.mxu0 %vm830_vm1, %v816_v13  ;;  %v4495_v18 = vld [vmem:[%s5498_s27 + $0x18] sm:$0xff]  ;;  %v3582_v20 = vld [vmem:[%s5496_s14 + $0x2] sm:$0x3]  ;;  %v1317_v29 = vld [vmem:[%s5499_s5 + $0x10] sm:$0xff] }
  0x4a   : > { %3558 = vmatmul.msk.f32.vlgmr.msra.gmra.mxu0 %vm817_vm2, %v4429_v11  ;;  %3583 = vmatpush.msk.msrb.mxu1 %vm830_vm1, %v3582_v20  ;;  %v1318_v28 = vld [vmem:[%s5499_s5 + $0x18] sm:$0xff]  ;;  %v1316_v30 = vld [vmem:[%s5499_s5 + $0x8] sm:$0xff]  ;;  %v1315_v31 = vld [vmem:[%s5499_s5] sm:$0xff] }
  0x4b   : > { %972 = vmatpush.msrb.mxu3 %v4429_v11  ;;  %3569 = vmatmul.msk.f32.gmra.mxu2 %vm817_vm2, %v4426_v10  ;;  %v3598_v34 = vld [vmem:[%s5497_s0 + $0x4] sm:$0x3]  ;;  %v1368_v39 = vld [vmem:[%s5500_s30 + $0x18] sm:$0xff]  ;;  %v1367_v40 = vld [vmem:[%s5500_s30 + $0x10] sm:$0xff] }
  0x4c   : > { %3577 = vmatpush.msk.msrb.mxu0 %vm830_vm1, %v3576_v19  ;;  %3605 = vmatpush.msk.msra.mxu1 %vm830_vm1, %v3604_v33  ;;  %v1366_v42 = vld [vmem:[%s5500_s30 + $0x8] sm:$0xff]  ;;  %v1365_v45 = vld [vmem:[%s5500_s30] sm:$0xff]  ;;  %v3631_v4 = vld [vmem:[%s5499_s5 + $0x38] sm:$0xff] }
  0x4d   : > { %1000 = vmatpush.msra.mxu3 %v4438_v12  ;;  %v3639_v5 = vld [vmem:[%s5500_s30 + $0x38] sm:$0xff]  ;;  %v3630_v6 = vld [vmem:[%s5499_s5 + $0x30] sm:$0xff]  ;;  %v3629_v8 = vld [vmem:[%s5499_s5 + $0x28] sm:$0xff] }
  0x4e   : > { %3599 = vmatpush.msk.msra.mxu0 %vm830_vm1, %v3598_v34  ;;  %v3638_v7 = vld [vmem:[%s5500_s30 + $0x30] sm:$0xff]  ;;  %v3636_v13 = vld [vmem:[%s5500_s30 + $0x20] sm:$0xff] }
  0x4f   : > { %1001 = vmatpush.msra.mxu3 %v4422_v9 }
  0x50   : > { %3566 = vmatmul.msk.f32.gmra.mxu3 %vm817_vm2, %v4438_v12  ;;  %3564 = vmatmul.msk.f32.gmra.mxu1 %vm817_vm2, %v4426_v10 }
  0x52   : > { %3559 = vmatmul.msk.f32.gmra.mxu0 %vm817_vm2, %v4426_v10 }
  0x53   : > { %3570 = vmatmul.msk.f32.gmra.mxu2 %vm817_vm2, %v4422_v9 }
  0x58   : > { %3572 = vmatmul.msk.f32.vlgmr.msrb.gmra.mxu3 %vm950_vm3, %v4462_v15 }
  0x5a   : > { %3560 = vmatmul.msk.f32.gmra.mxu0 %vm817_vm2, %v4422_v9 }
  0x5b   : > { %3571 = vmatmul.msk.f32.gmra.mxu2 %vm817_vm2, %v4438_v12 }
  0x60   : > { %3573 = vmatmul.msk.f32.gmra.mxu3 %vm950_vm3, %v4473_v16 }
  0x62   : > { %3561 = vmatmul.msk.f32.gmra.mxu0 %vm817_vm2, %v4438_v12 }
  0x68   : > { %3574 = vmatmul.msk.f32.vlgmr.msra.gmra.mxu3 %vm950_vm3, %v4484_v17 }
  0x70   : > { %3575 = vmatmul.msk.f32.gmra.mxu3 %vm950_vm3, %v4495_v18 }
  0xc5   : > { %v4627_v57 = vpop.f32.mrf.mxu1 }
  0xc6   : > { %v4621_v55 = vpop.f32.mrf.mxu2 }
  0xcb   : > { %v4511_v22 = vpop.f32.mrf.mxu3 }
  0xcd   : > { %v4631_v59 = vpop.f32.mrf.mxu1 }
  0xce   : > { %v4625_v56 = vpop.f32.mrf.mxu2 }
  0xd3   : > { %v4513_v23 = vpop.f32.mrf.mxu3 }
  0xd6   : > { %v4629_v58 = vpop.f32.mrf.mxu2 }
  0xdb   : > { %v974_v24 = vpop.f32.mrf.mxu3 }
  0xdc   : > { %3578 = vmatmul.msk.f32.vlgmr.msrb.gmra.mxu0 %vm817_vm2, %v974_v24  ;;  %3584 = vmatmul.msk.f32.vlgmr.msrb.gmra.mxu1 %vm817_vm2, %v974_v24 }
  0xdd   : > { %3590 = vmatmul.msk.f32.vlgmr.msrb.gmra.mxu2 %vm817_vm2, %v974_v24  ;;  %1416 = vmatpush.msrb.mxu1 %v4563_v36 }
  0xde   : > { %1439 = vmatpush.msrb.mxu2 %v4573_v38  ;;  %1381 = vmatpush.msrb.mxu0 %v1368_v39  ;;  %v4633_v60 = vpop.f32.mrf.mxu2 }
  0xdf   : > { %1417 = vmatpush.msrb.mxu1 %v4547_v32 }
  0xe0   : > { %1440 = vmatpush.msrb.mxu2 %v4569_v37  ;;  %1382 = vmatpush.msrb.mxu0 %v1367_v40 }
  0xe2   : > { %1383 = vmatpush.msrb.mxu0 %v1366_v42 }
  0xe3   : > { %v977_v25 = vpop.f32.mrf.mxu3 }
  0xe4   : > { %3579 = vmatmul.msk.f32.gmra.mxu0 %vm817_vm2, %v977_v25  ;;  %3585 = vmatmul.msk.f32.gmra.mxu1 %vm817_vm2, %v977_v25 }
  0xe5   : > { %3591 = vmatmul.msk.f32.gmra.mxu2 %vm817_vm2, %v977_v25  ;;  %1149 = vmatpush.msrb.mxu3 %v977_v25 }
  0xe6   : > { %1384 = vmatpush.msrb.mxu0 %v1365_v45 }
  0xe7   : > { %1150 = vmatpush.msrb.mxu3 %v974_v24 }
  0xe8   : > { %3594 = vmatmul.msk.f32.vlgmr.msrb.gmra.mxu3 %vm950_vm3, %v4462_v15 }
  0xeb   : > { %v1003_v26 = vpop.f32.mrf.mxu3 }
  0xec   : > { %3580 = vmatmul.msk.f32.gmra.mxu0 %vm817_vm2, %v1003_v26  ;;  %3586 = vmatmul.msk.f32.gmra.mxu1 %vm817_vm2, %v1003_v26 }
  0xed   : > { %3592 = vmatmul.msk.f32.gmra.mxu2 %vm817_vm2, %v1003_v26 }
  0xf0   : > { %3595 = vmatmul.msk.f32.gmra.mxu3 %vm950_vm3, %v4473_v16 }
  0xf3   : > { %v1006_v27 = vpop.f32.mrf.mxu3 }
  0xf4   : > { %3581 = vmatmul.msk.f32.gmra.mxu0 %vm817_vm2, %v1006_v27  ;;  %3587 = vmatmul.msk.f32.gmra.mxu1 %vm817_vm2, %v1006_v27 }
  0xf5   : > { %3593 = vmatmul.msk.f32.gmra.mxu2 %vm817_vm2, %v1006_v27  ;;  %1172 = vmatpush.msra.mxu3 %v1006_v27 }
  0xf7   : > { %1173 = vmatpush.msra.mxu3 %v1003_v26  ;;  %v4689_v26 = vpop.f32.mrf.mxu0 }
  0xf8   : > { %3596 = vmatmul.msk.f32.vlgmr.msra.gmra.mxu3 %vm950_vm3, %v4484_v17 }
  0xf9   : > { %1344 = vmatpush.msrb.mxu3 %v1318_v28 }
  0xfb   : > { %1345 = vmatpush.msrb.mxu3 %v1317_v29 }
  0xfd   : > { %1346 = vmatpush.msrb.mxu3 %v1316_v30 }
  0xff   : > { %1347 = vmatpush.msrb.mxu3 %v1315_v31  ;;  %v4695_v29 = vpop.f32.mrf.mxu0 }
 0x100   : > { %3597 = vmatmul.msk.f32.gmra.mxu3 %vm950_vm3, %v4495_v18 }
 0x101   : > { %1477 = vmatpush.msra.mxu3 %v3631_v4  ;;  %v3656_v4 = vld [vmem:[%s5500_s30 + $0x40] sm:$0xff] }
 0x103   : > { %1478 = vmatpush.msra.mxu3 %v3630_v6 }
 0x105   : > { %1479 = vmatpush.msra.mxu3 %v3629_v8 }
 0x107   : > { %v4701_v34 = vpop.f32.mrf.mxu0 }
 0x108   : > { %3616 = vmatmul.msk.f32.vlgmr.msrb.gmra.mxu3 %vm1319_vm4, %v4547_v32 }
 0x10f   : > { %v4711_v35 = vpop.f32.mrf.mxu0 }
 0x110   : > { %3617 = vmatmul.msk.f32.gmra.mxu3 %vm1319_vm4, %v4563_v36 }
 0x118   : > { %3618 = vmatmul.msk.f32.gmra.mxu3 %vm1319_vm4, %v4569_v37 }
 0x120   : > { %3619 = vmatmul.msk.f32.gmra.mxu3 %vm1319_vm4, %v4573_v38 }
 0x159   : > { %v4635_v61 = vpop.f32.mrf.mxu1  ;;  %v1043_v39 = vpop.f32.mrf.mxu0 }
 0x160   : > { %v4637_v62 = vpop.f32.mrf.mxu2 }
 0x161   : > { %v4639_v63 = vpop.f32.mrf.mxu1  ;;  %v1046_v40 = vpop.f32.mrf.mxu0 }
 0x168   : > { %v4641_v0 = vpop.f32.mrf.mxu2 }
 0x169   : > { %v4643_v1 = vpop.f32.mrf.mxu1 }
 0x16b   : > { %v1152_v41 = vpop.f32.mrf.mxu3 }
 0x16c   : > { %v1181_v43 = vmul.f32 2.0, %v1152_v41  ;;  %v4715_v41 = vpop.f32.mrf.mxu0 }
 0x16e   : > { %v1185_v44 = vsub.f32 %v1181_v43, %v4429_v11 }
 0x170   : > { %3600 = vmatmul.msk.f32.vlgmr.msra.gmra.mxu0 %vm817_vm2, %v1185_v44  ;;  %3606 = vmatmul.msk.f32.vlgmr.msra.gmra.mxu1 %vm817_vm2, %v1185_v44  ;;  %v4645_v2 = vpop.f32.mrf.mxu2 }
 0x171   : > { %3612 = vmatmul.msk.f32.vlgmr.msra.gmra.mxu2 %vm817_vm2, %v1185_v44  ;;  %v4647_v3 = vpop.f32.mrf.mxu1  ;;  %1515 = vmatpush.msra.mxu1 %v3639_v5 }
 0x173   : > { %v1155_v46 = vpop.f32.mrf.mxu3  ;;  %1516 = vmatpush.msra.mxu1 %v3638_v7 }
 0x174   : > { %v1182_v47 = vmul.f32 2.0, %v1155_v46  ;;  %v4717_v42 = vpop.f32.mrf.mxu0 }
 0x176   : > { %v1186_v48 = vsub.f32 %v1182_v47, %v4426_v10  ;;  %v3651_v47 = vld [vmem:[%s5499_s5 + $0x58] sm:$0xff] }
 0x178   : > { %3601 = vmatmul.msk.f32.gmra.mxu0 %vm817_vm2, %v1186_v48  ;;  %3607 = vmatmul.msk.f32.gmra.mxu1 %vm817_vm2, %v1186_v48  ;;  %v4667_v10 = vpop.f32.mrf.mxu2 }
 0x179   : > { %3613 = vmatmul.msk.f32.gmra.mxu2 %vm817_vm2, %v1186_v48  ;;  %v3659_v48 = vld [vmem:[%s5500_s30 + $0x58] sm:$0xff] }
 0x17b   : > { %v1175_v49 = vpop.f32.mrf.mxu3 }
 0x17c   : > { %v1183_v50 = vmul.f32 2.0, %v1175_v49  ;;  %v3650_v49 = vld [vmem:[%s5499_s5 + $0x50] sm:$0xff] }
 0x17e   : > { %v1187_v51 = vsub.f32 %v1183_v50, %v4422_v9  ;;  %v3637_v9 = vld [vmem:[%s5500_s30 + $0x28] sm:$0xff]  ;;  %v3658_v50 = vld [vmem:[%s5500_s30 + $0x50] sm:$0xff] }
 0x17f   : > { %1517 = vmatpush.msra.mxu1 %v3637_v9 }
 0x180   : > { %3602 = vmatmul.msk.f32.gmra.mxu0 %vm817_vm2, %v1187_v51  ;;  %3608 = vmatmul.msk.f32.gmra.mxu1 %vm817_vm2, %v1187_v51 }
 0x181   : > { %3614 = vmatmul.msk.f32.gmra.mxu2 %vm817_vm2, %v1187_v51  ;;  %1518 = vmatpush.msra.mxu1 %v3636_v13  ;;  %v3649_v51 = vld [vmem:[%s5499_s5 + $0x48] sm:$0xff] }
 0x183   : > { %v1178_v52 = vpop.f32.mrf.mxu3 }
 0x184   : > { %v1184_v53 = vmul.f32 2.0, %v1178_v52  ;;  %v3657_v52 = vld [vmem:[%s5500_s30 + $0x48] sm:$0xff] }
 0x186   : > { %v1188_v54 = vsub.f32 %v1184_v53, %v4438_v12  ;;  %v3628_v12 = vld [vmem:[%s5499_s5 + $0x20] sm:$0xff] }
 0x187   : > { %1480 = vmatpush.msra.mxu3 %v3628_v12 }
 0x188   : > { %3603 = vmatmul.msk.f32.gmra.mxu0 %vm817_vm2, %v1188_v54  ;;  %3609 = vmatmul.msk.f32.gmra.mxu1 %vm817_vm2, %v1188_v54 }
 0x189   : > { %3615 = vmatmul.msk.f32.gmra.mxu2 %vm817_vm2, %v1188_v54  ;;  %1657 = vmatpush.msrb.mxu3 %v3659_v48  ;;  %v3648_v54 = vld [vmem:[%s5499_s5 + $0x40] sm:$0xff] }
 0x18b   : > { %1658 = vmatpush.msrb.mxu3 %v3658_v50 }
 0x18d   : > { %1659 = vmatpush.msrb.mxu3 %v3657_v52 }
 0x18f   : > { %1660 = vmatpush.msrb.mxu3 %v3656_v4  ;;  %v3890_v4 = vld [vmem:[%s5456_s9] ss:$0 sm:$0xff] }
 0x190   : > { %3620 = vmatmul.msk.f32.vlgmr.msrb.gmra.mxu0 %vm1319_vm4, %v4547_v32  ;;  %3624 = vmatmul.msk.f32.vlgmr.msrb.gmra.mxu1 %vm950_vm3, %v4462_v15 }
 0x191   : > { %3626 = vmatmul.msk.f32.vlgmr.msrb.gmra.mxu2 %vm950_vm3, %v4484_v17 }
 0x198   : > { %3621 = vmatmul.msk.f32.gmra.mxu0 %vm1319_vm4, %v4563_v36  ;;  %3625 = vmatmul.msk.f32.gmra.mxu1 %vm950_vm3, %v4473_v16 }
 0x199   : > { %3627 = vmatmul.msk.f32.gmra.mxu2 %vm950_vm3, %v4495_v18 }
 0x1a0   : > { %3622 = vmatmul.msk.f32.gmra.mxu0 %vm1319_vm4, %v4569_v37 }
 0x1a8   : > { %3623 = vmatmul.msk.f32.gmra.mxu0 %vm1319_vm4, %v4573_v38 }
 0x1ed   : > { %v4669_v11 = vpop.f32.mrf.mxu1  ;;  %v1223_v43 = vpop.f32.mrf.mxu0 }
 0x1f4   : > { %v4677_v14 = vpop.f32.mrf.mxu2 }
 0x1f5   : > { %v4679_v19 = vpop.f32.mrf.mxu1  ;;  %v1226_v44 = vpop.f32.mrf.mxu0 }
 0x1fc   : > { %v4681_v20 = vpop.f32.mrf.mxu2 }
 0x1fd   : > { %v4683_v21 = vpop.f32.mrf.mxu1  ;;  %v4719_v45 = vpop.f32.mrf.mxu0 }
 0x204   : > { %v4685_v24 = vpop.f32.mrf.mxu2 }
 0x205   : > { %v4687_v25 = vpop.f32.mrf.mxu1  ;;  %v4721_v46 = vpop.f32.mrf.mxu0 }
 0x20c   : > { %v4691_v27 = vpop.f32.mrf.mxu2 }
 0x20d   : > { %v1419_v28 = vpop.f32.mrf.mxu1  ;;  %v4741_v53 = vpop.f32.mrf.mxu0 }
 0x20e   : > { %3632 = vmatmul.msk.f32.vlgmr.msra.gmra.mxu3 %vm1319_vm4, %v1419_v28  ;;  %3640 = vmatmul.msk.f32.vlgmr.msra.gmra.mxu1 %vm1319_vm4, %v1419_v28 }
 0x214   : > { %v1442_v30 = vpop.f32.mrf.mxu2 }
 0x215   : > { %v1422_v31 = vpop.f32.mrf.mxu1  ;;  %v4749_v5 = vpop.f32.mrf.mxu0 }
 0x216   : > { %3633 = vmatmul.msk.f32.gmra.mxu3 %vm1319_vm4, %v1422_v31  ;;  %3641 = vmatmul.msk.f32.gmra.mxu1 %vm1319_vm4, %v1422_v31 }
 0x217   : > { %1550 = vmatpush.msra.mxu2 %v1422_v31 }
 0x219   : > { %1551 = vmatpush.msra.mxu2 %v1419_v28 }
 0x21a   : > { %3644 = vmatmul.msk.f32.vlgmr.msra.gmra.mxu2 %vm950_vm3, %v4462_v15 }
 0x21b   : > { %1619 = vmatpush.msrb.mxu2 %v3651_v47 }
 0x21c   : > { %v1445_v33 = vpop.f32.mrf.mxu2 }
 0x21d   : > { %1573 = vmatpush.msra.mxu0 %v1445_v33  ;;  %1620 = vmatpush.msrb.mxu2 %v3650_v49  ;;  %v4751_v6 = vpop.f32.mrf.mxu0 }
 0x21e   : > { %3634 = vmatmul.msk.f32.gmra.mxu3 %vm1319_vm4, %v1442_v30  ;;  %3642 = vmatmul.msk.f32.gmra.mxu1 %vm1319_vm4, %v1442_v30 }
 0x21f   : > { %1574 = vmatpush.msra.mxu0 %v1442_v30  ;;  %1621 = vmatpush.msrb.mxu2 %v3649_v51  ;;  %v1349_v51 = vpop.f32.mrf.mxu3 }
 0x220   : > { %3646 = vmatmul.msk.f32.vlgmr.msra.gmra.mxu0 %vm950_vm3, %v4484_v17 }
 0x221   : > { %1622 = vmatpush.msrb.mxu2 %v3648_v54 }
 0x222   : > { %3645 = vmatmul.msk.f32.gmra.mxu2 %vm950_vm3, %v4473_v16 }
 0x225   : > { %v4753_v7 = vpop.f32.mrf.mxu0 }
 0x226   : > { %3635 = vmatmul.msk.f32.gmra.mxu3 %vm1319_vm4, %v1445_v33  ;;  %3643 = vmatmul.msk.f32.gmra.mxu1 %vm1319_vm4, %v1445_v33 }
 0x227   : > { %v1352_v52 = vpop.f32.mrf.mxu3 }
 0x228   : > { %3647 = vmatmul.msk.f32.gmra.mxu0 %vm950_vm3, %v4495_v18 }
 0x22f   : > { %v1355_v54 = vpop.f32.mrf.mxu3 }
 0x29d   : > { %v1553_v8 = vpop.f32.mrf.mxu2  ;;  %v1576_v28 = vpop.f32.mrf.mxu0 }
 0x29e   : > { %v1582_v9 = vmul.f32 2.0, %v1553_v8  ;;  %v1584_v33 = vmul.f32 2.0, %v1576_v28  ;;  %v1358_v8 = vpop.f32.mrf.mxu3 }
 0x2a0   : > { %v1586_v12 = vsub.f32 %v1582_v9, %v4547_v32  ;;  %v1588_v47 = vsub.f32 %v1584_v33, %v4569_v37  ;;  %v866_v9 = vadd.f32 %v3890_v4, %v4689_v26  ;;  %v1837_v33 = vld [vmem:[%s5455_s8 + $0x18] sm:$0xff] }
 0x2a1   : > { %1862 = vmatpush.msrb.mxu0 %v1837_v33 }
 0x2a2   : > { %3652 = vmatmul.msk.f32.vlgmr.msrb.gmra.mxu2 %vm1319_vm4, %v1586_v12  ;;  %3660 = vmatmul.msk.f32.vlgmr.msrb.gmra.mxu3 %vm1319_vm4, %v1586_v12  ;;  %v1055_v12 = vadd.f32 %v1043_v39, %v866_v9 }
 0x2a4   : > { %v1235_v28 = vadd.f32 %v1223_v43, %v1055_v12  ;;  %v868_v43 = vadd.f32 %v3890_v4, %v4701_v34  ;;  %v869_v34 = vadd.f32 %v3890_v4, %v4711_v35 }
 0x2a5   : > { %v1556_v13 = vpop.f32.mrf.mxu2  ;;  %v1579_v48 = vpop.f32.mrf.mxu0 }
 0x2a6   : > { %v1583_v30 = vmul.f32 2.0, %v1556_v13  ;;  %v1585_v49 = vmul.f32 2.0, %v1579_v48  ;;  %v1482_v13 = vpop.f32.mrf.mxu3 }
 0x2a8   : > { %v1587_v31 = vsub.f32 %v1583_v30, %v4563_v36  ;;  %v1589_v50 = vsub.f32 %v1585_v49, %v4573_v38  ;;  %v867_v30 = vadd.f32 %v3890_v4, %v4695_v29  ;;  %v1836_v49 = vld [vmem:[%s5455_s8 + $0x10] sm:$0xff]  ;;  %v1835_v29 = vld [vmem:[%s5455_s8 + $0x8] sm:$0xff] }
 0x2a9   : > { %1863 = vmatpush.msrb.mxu0 %v1836_v49 }
 0x2aa   : > { %3653 = vmatmul.msk.f32.gmra.mxu2 %vm1319_vm4, %v1587_v31  ;;  %3661 = vmatmul.msk.f32.gmra.mxu3 %vm1319_vm4, %v1587_v31  ;;  %v1361_v31 = vadd.f32 %v1349_v51, %v1235_v28 }
 0x2ab   : > { %1864 = vmatpush.msrb.mxu0 %v1835_v29 }
 0x2ac   : > { %v1494_v48 = vadd.f32 %v1482_v13, %v1361_v31  ;;  %v1057_v13 = vadd.f32 %v4715_v41, %v868_v43 }
 0x2ae   : > { %v1485_v39 = vpop.f32.mrf.mxu3 }
 0x2b2   : > { %3654 = vmatmul.msk.f32.gmra.mxu2 %vm1319_vm4, %v1588_v47  ;;  %3662 = vmatmul.msk.f32.gmra.mxu3 %vm1319_vm4, %v1588_v47  ;;  %v1056_v47 = vadd.f32 %v1046_v40, %v867_v30  ;;  %v1834_v40 = vld [vmem:[%s5455_s8] sm:$0xff]  ;;  %v1237_v30 = vadd.f32 %v4719_v45, %v1057_v13 }
 0x2b3   : > { %1865 = vmatpush.msrb.mxu0 %v1834_v40 }
 0x2b4   : > { %v1236_v26 = vadd.f32 %v1226_v44, %v1056_v47 }
 0x2b6   : > { %v1362_v12 = vadd.f32 %v1352_v52, %v1236_v26  ;;  %v1488_v47 = vpop.f32.mrf.mxu3  ;;  %v1058_v52 = vadd.f32 %v4717_v42, %v869_v34 }
 0x2b8   : > { %v1495_v44 = vadd.f32 %v1485_v39, %v1362_v12  ;;  %v1238_v41 = vadd.f32 %v4721_v46, %v1058_v52 }
 0x2ba   : > { %3655 = vmatmul.msk.f32.gmra.mxu2 %vm1319_vm4, %v1589_v50  ;;  %3663 = vmatmul.msk.f32.gmra.mxu3 %vm1319_vm4, %v1589_v50  ;;  %v1364_v13 = vadd.f32 %v1358_v8, %v1238_v41 }
 0x2be   : > { %v1491_v40 = vpop.f32.mrf.mxu3 }
 0x325   : > { %v1624_v50 = vpop.f32.mrf.mxu2 }
 0x326   : > { %v1636_v9 = vadd.f32 %v1624_v50, %v1494_v48  ;;  %v1363_v50 = vadd.f32 %v1355_v54, %v1237_v30  ;;  %v1497_v54 = vadd.f32 %v1491_v40, %v1364_v13 }
 0x328   : > { %v3664_v51 = vmul.f32 -1.442695, %v1636_v9  ;;  %v1496_v9 = vadd.f32 %v1488_v47, %v1363_v50 }
 0x32a   : > { %3895 = vpow2.f32 %v3664_v51 }
 0x32d   : > { %v1627_v28 = vpop.f32.mrf.mxu2 }
 0x32e   : > { %v1637_v31 = vadd.f32 %v1627_v28, %v1495_v44 }
 0x330   : > { %v3896_v33 = vpop.eup %3895  ;;  %v3665_v48 = vmul.f32 -1.442695, %v1637_v31 }
 0x331   : > { %v1690_v49 = vadd.f32 1.0, %v3896_v33 }
 0x332   : > { %3897 = vpow2.f32 %v3665_v48 }
 0x333   : > { %3899 = vrcp.f32 %v1690_v49  ;;  %v1705_v4 = vand.u32 2147483648, %v1690_v49  ;;  %v1703_v42 = vand.u32 2147483647, %v1690_v49  ;;  %vm1699_vm6 = vweird.f32 %v1690_v49 }
 0x335   : > { %v1630_v26 = vpop.f32.mrf.mxu2  ;;  %v1706_v34 = vor.u32 1.1754944e-38, %v1705_v4  ;;  %vm1704_vm8 = vcmp.eq.f32.partialorder %v1703_v42, 8.507059e+37 }
 0x336   : > { %v1638_v29 = vadd.f32 %v1630_v26, %v1496_v9 }
 0x338   : > { %v3898_v39 = vpop.eup %3897  ;;  %v3666_v43 = vmul.f32 -1.442695, %v1638_v29 }
 0x339   : > { %v3900_v45 = vpop.eup %3899  ;;  %v1691_v51 = vadd.f32 1.0, %v3898_v39 }
 0x33a   : > { %v1695_v12 = vmul.f32 %v3900_v45, %v1690_v49  ;;  %3901 = vpow2.f32 %v3666_v43  ;;  %vm1700_vm5 = vweird.f32 %v3900_v45 }
 0x33b   : > { %3903 = vrcp.f32 %v1691_v51  ;;  %vm1701_vm7 = vmor %vm1699_vm6, %vm1700_vm5  ;;  %v1720_v29 = vand.u32 2147483648, %v1691_v51  ;;  %v1718_v41 = vand.u32 2147483647, %v1691_v51  ;;  %vm1714_vm10 = vweird.f32 %v1691_v51 }
 0x33c   : > { %v1696_v35 = vsub.f32 1.0, %v1695_v12 }
 0x33d   : > { %v1633_v44 = vpop.f32.mrf.mxu2  ;;  %vm1719_vm12 = vcmp.eq.f32.partialorder %v1718_v41, 8.507059e+37 }
 0x33e   : > { %v1697_v28 = vmul.f32 %v3900_v45, %v1696_v35  ;;  %v1639_v30 = vadd.f32 %v1633_v44, %v1497_v54 }
 0x340   : > { %v3902_v31 = vpop.eup %3901  ;;  %v1698_v46 = vadd.f32 %v3900_v45, %v1697_v28  ;;  %v3667_v48 = vmul.f32 -1.442695, %v1639_v30 }
 0x341   : > { %v3904_v33 = vpop.eup %3903  ;;  %v1692_v47 = vadd.f32 1.0, %v3902_v31 }
 0x342   : > { %v1702_v50 = vsel %vm1701_vm7, %v3900_v45, %v1698_v46  ;;  %v1710_v8 = vmul.f32 %v3904_v33, %v1691_v51  ;;  %vm1715_vm9 = vweird.f32 %v3904_v33  ;;  %v1721_v45 = vor.u32 1.1754944e-38, %v1720_v29 }
 0x343   : > { %3905 = vrcp.f32 %v1692_v47  ;;  %v1707_v9 = vsel %vm1704_vm8, %v1706_v34, %v1702_v50  ;;  %vm1716_vm11 = vmor %vm1714_vm10, %vm1715_vm9  ;;  %v1735_v28 = vand.u32 2147483648, %v1692_v47  ;;  %v1733_v42 = vand.u32 2147483647, %v1692_v47 }
 0x344   : > { %3907 = vpow2.f32 %v3667_v48  ;;  %v4791_v52 = vmul.f32 %v1707_v9, %v4547_v32  ;;  %v1711_v26 = vsub.f32 1.0, %v1710_v8  ;;  %vm1729_vm14 = vweird.f32 %v1692_v47 }
 0x345   : > { %v1736_v31 = vor.u32 1.1754944e-38, %v1735_v28  ;;  %vm1734_vm0 = vcmp.eq.f32.partialorder %v1733_v42, 8.507059e+37 }
 0x346   : > { %3672 = vmatmul.msk.f32.vlgmr.msrb.gmra.mxu0 %vm1319_vm4, %v4791_v52  ;;  %v1712_v49 = vmul.f32 %v3904_v33, %v1711_v26 }
 0x348   : > { %v1713_v39 = vadd.f32 %v3904_v33, %v1712_v49 }
 0x349   : > { %v3906_v43 = vpop.eup %3905 }
 0x34a   : > { %v3908_v40 = vpop.eup %3907  ;;  %v1717_v12 = vsel %vm1716_vm11, %v3904_v33, %v1713_v39  ;;  %v1725_v13 = vmul.f32 %v3906_v43, %v1692_v47  ;;  %vm1730_vm13 = vweird.f32 %v3906_v43 }
 0x34b   : > { %v1693_v35 = vadd.f32 1.0, %v3908_v40  ;;  %v1722_v54 = vsel %vm1719_vm12, %v1721_v45, %v1717_v12  ;;  %vm1731_vm15 = vmor %vm1729_vm14, %vm1730_vm13  ;;  %v1520_v45 = vpop.f32.mrf.mxu1  ;;  %v3681_v40 = vld [vmem:[%s5455_s8 + $0x28] sm:$0xff]  ;;  %v3680_v12 = vld [vmem:[%s5455_s8 + $0x20] sm:$0xff] }
 0x34c   : > { %v4796_v4 = vmul.f32 %v1722_v54, %v4563_v36  ;;  %v1726_v44 = vsub.f32 1.0, %v1725_v13 }
 0x34d   : > { %3909 = vrcp.f32 %v1693_v35  ;;  %v1750_v9 = vand.u32 2147483648, %v1693_v35  ;;  %v1748_v47 = vand.u32 2147483647, %v1693_v35  ;;  %vm1744_vm2 = vweird.f32 %v1693_v35 }
 0x34e   : > { %3673 = vmatmul.msk.f32.gmra.mxu0 %vm1319_vm4, %v4796_v4  ;;  %1897 = vmatpush.msrb.mxu1 %v4796_v4  ;;  %v1727_v51 = vmul.f32 %v3906_v43, %v1726_v44 }
 0x34f   : > { %v1751_v49 = vor.u32 1.1754944e-38, %v1750_v9  ;;  %vm1749_vm6 = vcmp.eq.f32.partialorder %v1748_v47, 8.507059e+37 }
 0x350   : > { %1898 = vmatpush.msrb.mxu1 %v4791_v52  ;;  %v1728_v30 = vadd.f32 %v3906_v43, %v1727_v51 }
 0x351   : > { %3676 = vmatmul.msk.f32.vlgmr.msrb.gmra.mxu1 %vm950_vm3, %v4462_v15 }
 0x352   : > { %v1732_v46 = vsel %vm1731_vm15, %v3906_v43, %v1728_v30  ;;  %v3683_v43 = vld [vmem:[%s5455_s8 + $0x38] sm:$0xff]  ;;  %v1662_v30 = vpop.f32.mrf.mxu3 }
 0x353   : > { %v3910_v33 = vpop.eup %3909  ;;  %v1737_v48 = vsel %vm1734_vm0, %v1736_v31, %v1732_v46  ;;  %1958 = vmatpush.msra.mxu2 %v3683_v43  ;;  %v4834_v13 = vpop.f32.mrf.mxu1  ;;  %v3693_v31 = vld [vmem:[%s5455_s8 + $0x48] sm:$0xff] }
 0x354   : > { %v4805_v34 = vmul.f32 %v1737_v48, %v4569_v37  ;;  %v1740_v50 = vmul.f32 %v3910_v33, %v1693_v35  ;;  %vm1745_vm1 = vweird.f32 %v3910_v33 }
 0x355   : > { %vm1746_vm5 = vmor %vm1744_vm2, %vm1745_vm1 }
 0x356   : > { %3674 = vmatmul.msk.f32.gmra.mxu0 %vm1319_vm4, %v4805_v34  ;;  %v1741_v8 = vsub.f32 1.0, %v1740_v50 }
 0x358   : > { %v1742_v26 = vmul.f32 %v3910_v33, %v1741_v8 }
 0x359   : > { %3677 = vmatmul.msk.f32.gmra.mxu1 %vm950_vm3, %v4473_v16 }
 0x35a   : > { %v1743_v29 = vadd.f32 %v3910_v33, %v1742_v26  ;;  %v1665_v46 = vpop.f32.mrf.mxu3 }
 0x35b   : > { %v4836_v35 = vpop.f32.mrf.mxu1 }
 0x35c   : > { %v1747_v41 = vsel %vm1746_vm5, %v3910_v33, %v1743_v29 }
 0x35d   : > { %v1752_v37 = vsel %vm1749_vm6, %v1751_v49, %v1747_v41 }
 0x35e   : > { %v4812_v39 = vmul.f32 %v1752_v37, %v4573_v38  ;;  %v3682_v38 = vld [vmem:[%s5455_s8 + $0x30] sm:$0xff] }
 0x35f   : > { %1959 = vmatpush.msra.mxu2 %v3682_v38 }
 0x360   : > { %3675 = vmatmul.msk.f32.gmra.mxu0 %vm1319_vm4, %v4812_v39  ;;  %1920 = vmatpush.msra.mxu1 %v4812_v39 }
 0x361   : > { %1960 = vmatpush.msra.mxu2 %v3681_v40 }
 0x362   : > { %1921 = vmatpush.msra.mxu1 %v4805_v34  ;;  %v1668_v33 = vpop.f32.mrf.mxu3 }
 0x363   : > { %3678 = vmatmul.msk.f32.vlgmr.msra.gmra.mxu1 %vm950_vm3, %v4484_v17  ;;  %1961 = vmatpush.msra.mxu2 %v3680_v12  ;;  %v4838_v54 = vpop.f32.mrf.mxu1 }
 0x36a   : > { %v1671_v50 = vpop.f32.mrf.mxu3 }
 0x36b   : > { %3679 = vmatmul.msk.f32.gmra.mxu1 %vm950_vm3, %v4495_v18 }
 0x3ce   : > { %v1900_v44 = vpop.f32.mrf.mxu1 }
 0x3cf   : > { %3684 = vmatmul.msk.f32.vlgmr.msra.gmra.mxu2 %vm1319_vm4, %v1900_v44 }
 0x3d6   : > { %v1903_v28 = vpop.f32.mrf.mxu1 }
 0x3d7   : > { %3685 = vmatmul.msk.f32.gmra.mxu2 %vm1319_vm4, %v1903_v28  ;;  %1993 = vmatpush.msra.mxu3 %v1903_v28  ;;  %v3889_v28 = vld [vmem:[%s5457_s10] ss:$0 sm:$0xff] }
 0x3d9   : > { %1994 = vmatpush.msra.mxu3 %v1900_v44 }
 0x3da   : > { %3688 = vmatmul.msk.f32.vlgmr.msra.gmra.mxu3 %vm950_vm3, %v4462_v15  ;;  %v3695_v15 = vld [vmem:[%s5455_s8 + $0x58] sm:$0xff] }
 0x3db   : > { %2062 = vmatpush.msrb.mxu1 %v3695_v15 }
 0x3e0   : > { %v1923_v51 = vpop.f32.mrf.mxu1 }
 0x3e1   : > { %3686 = vmatmul.msk.f32.gmra.mxu2 %vm1319_vm4, %v1923_v51 }
 0x3e2   : > { %3689 = vmatmul.msk.f32.gmra.mxu3 %vm950_vm3, %v4473_v16  ;;  %v3694_v16 = vld [vmem:[%s5455_s8 + $0x50] sm:$0xff] }
 0x3e3   : > { %2063 = vmatpush.msrb.mxu1 %v3694_v16 }
 0x3e5   : > { %2064 = vmatpush.msrb.mxu1 %v3693_v31 }
 0x3e8   : > { %v1926_v42 = vpop.f32.mrf.mxu1 }
 0x3e9   : > { %3687 = vmatmul.msk.f32.gmra.mxu2 %vm1319_vm4, %v1926_v42  ;;  %2016 = vmatpush.msra.mxu0 %v1926_v42 }
 0x3eb   : > { %2017 = vmatpush.msra.mxu0 %v1923_v51 }
 0x3ec   : > { %3690 = vmatmul.msk.f32.vlgmr.msra.gmra.mxu0 %vm950_vm3, %v4484_v17  ;;  %v3692_v17 = vld [vmem:[%s5455_s8 + $0x40] sm:$0xff] }
 0x3ed   : > { %2065 = vmatpush.msrb.mxu1 %v3692_v17 }
 0x3f4   : > { %3691 = vmatmul.msk.f32.gmra.mxu0 %vm950_vm3, %v4495_v18  ;;  %v4864_v18 = vpop.f32.mrf.mxu0 }
 0x3fc   : > { %v4866_v48 = vpop.f32.mrf.mxu0 }
 0x404   : > { %v4868_v8 = vpop.f32.mrf.mxu0 }
 0x40c   : > { %v4871_v29 = vpop.f32.mrf.mxu0 }
 0x45d   : > { %v1996_v9 = vpop.f32.mrf.mxu3 }
 0x45e   : > { %v2025_v26 = vmul.f32 2.0, %v1996_v9 }
 0x460   : > { %v2029_v47 = vsub.f32 %v2025_v26, %v4791_v52 }
 0x462   : > { %3696 = vmatmul.msk.f32.vlgmr.msrb.gmra.mxu1 %vm1319_vm4, %v2029_v47  ;;  %v908_v47 = vadd.f32 %v3889_v28, %v4511_v22 }
 0x465   : > { %v1999_v49 = vpop.f32.mrf.mxu3 }
 0x466   : > { %v2026_v41 = vmul.f32 2.0, %v1999_v49 }
 0x468   : > { %v2030_v37 = vsub.f32 %v2026_v41, %v4796_v4  ;;  %v906_v4 = vadd.f32 %v3889_v28, %v4627_v57 }
 0x469   : > { %v2019_v43 = vpop.f32.mrf.mxu0 }
 0x46a   : > { %3697 = vmatmul.msk.f32.gmra.mxu1 %vm1319_vm4, %v2030_v37  ;;  %v2027_v38 = vmul.f32 2.0, %v2019_v43  ;;  %v1093_v51 = vadd.f32 %v4635_v61, %v906_v4  ;;  %v1095_v61 = vadd.f32 %v4643_v1, %v908_v47  ;;  %v2209_v37 = vld [vmem:[#allocation8 + $0x10] sm:$0xff]  ;;  %v2116_v43 = vld [vmem:[%s5459_s12 + $0x8] sm:$0xff] }
 0x46c   : > { %v2031_v40 = vsub.f32 %v2027_v38, %v4805_v34  ;;  %v1273_v42 = vadd.f32 %v4669_v11, %v1093_v51  ;;  %v907_v34 = vadd.f32 %v3889_v28, %v4631_v59  ;;  %v1275_v59 = vadd.f32 %v4683_v21, %v1095_v61  ;;  %v2208_v38 = vld [vmem:[#allocation8 + $0x8] sm:$0xff] }
 0x46e   : > { %v1398_v15 = vadd.f32 %v4741_v53, %v1273_v42  ;;  %v1094_v31 = vadd.f32 %v4639_v63, %v907_v34  ;;  %v1400_v53 = vadd.f32 %v4751_v6, %v1275_v59 }
 0x470   : > { %v1532_v16 = vadd.f32 %v1520_v45, %v1398_v15  ;;  %v1274_v17 = vadd.f32 %v4679_v19, %v1094_v31  ;;  %v1534_v19 = vadd.f32 %v4836_v35, %v1400_v53  ;;  %v2170_v35 = vld [vmem:[#allocation5 + $0x18] sm:$0xff] }
 0x471   : > { %v2022_v12 = vpop.f32.mrf.mxu0  ;;  %2183 = vmatpush.msrb.mxu0 %v2170_v35 }
 0x472   : > { %3698 = vmatmul.msk.f32.gmra.mxu1 %vm1319_vm4, %v2031_v40  ;;  %v2028_v44 = vmul.f32 2.0, %v2022_v12  ;;  %v1399_v9 = vadd.f32 %v4749_v5, %v1274_v17  ;;  %v1676_v22 = vadd.f32 %v1668_v33, %v1534_v19  ;;  %v4919_v40 = vld [vmem:[%s5458_s11] ss:$0 sm:$0xff] }
 0x473   : > { %v946_v42 = vadd.f32 %v4919_v40, %v4621_v55  ;;  %v947_v55 = vadd.f32 %v4919_v40, %v4625_v56 }
 0x474   : > { %v2032_v52 = vsub.f32 %v2028_v44, %v4812_v39  ;;  %v1674_v39 = vadd.f32 %v1662_v30, %v1532_v16  ;;  %v1533_v57 = vadd.f32 %v4834_v13, %v1399_v9  ;;  %v909_v30 = vadd.f32 %v3889_v28, %v4513_v23  ;;  %v2118_v23 = vld [vmem:[%s5459_s12 + $0x18] sm:$0xff]  ;;  %v2115_v44 = vld [vmem:[%s5459_s12] sm:$0xff]  ;;  %v1963_v16 = vpop.f32.mrf.mxu2 }
 0x475   : > { %2143 = vmatpush.msrb.mxu3 %v2118_v23  ;;  %v2207_v28 = vld [vmem:[#allocation8] sm:$0xff]  ;;  %v1132_v56 = vadd.f32 %v4641_v0, %v947_v55 }
 0x476   : > { %v3668_v26 = vmul.f32 -1.442695, %v1674_v39  ;;  %v1675_v11 = vadd.f32 %v1665_v46, %v1533_v57  ;;  %v1096_v5 = vadd.f32 %v4647_v3, %v909_v30  ;;  %v3670_v46 = vmul.f32 -1.442695, %v1676_v22  ;;  %v2210_v3 = vld [vmem:[#allocation8 + $0x18] sm:$0xff] }
 0x477   : > { %2223 = vmatpush.msrb.mxu2 %v2210_v3  ;;  %v1131_v39 = vadd.f32 %v4637_v62, %v946_v42 }
 0x478   : > { %3911 = vpow2.f32 %v3668_v26  ;;  %v3669_v45 = vmul.f32 -1.442695, %v1675_v11  ;;  %v1276_v1 = vadd.f32 %v4687_v25, %v1096_v5  ;;  %v2117_v25 = vld [vmem:[%s5459_s12 + $0x10] sm:$0xff] }
 0x479   : > { %2144 = vmatpush.msrb.mxu3 %v2117_v25  ;;  %2224 = vmatpush.msrb.mxu2 %v2209_v37  ;;  %v1311_v47 = vadd.f32 %v4677_v14, %v1131_v39 }
 0x47a   : > { %3699 = vmatmul.msk.f32.gmra.mxu1 %vm1319_vm4, %v2032_v52  ;;  %3913 = vpow2.f32 %v3669_v45  ;;  %v1401_v13 = vadd.f32 %v4753_v7, %v1276_v1  ;;  %v2169_v7 = vld [vmem:[#allocation5 + $0x10] sm:$0xff]  ;;  %v2167_v52 = vld [vmem:[#allocation5] sm:$0xff]  ;;  %v1312_v1 = vadd.f32 %v4681_v20, %v1132_v56 }
 0x47b   : > { %2184 = vmatpush.msrb.mxu0 %v2169_v7  ;;  %2145 = vmatpush.msrb.mxu3 %v2116_v43  ;;  %v1879_v61 = vadd.f32 %v4864_v18, %v1311_v47 }
 0x47c   : > { %v1535_v6 = vadd.f32 %v4838_v54, %v1401_v13  ;;  %2225 = vmatpush.msrb.mxu2 %v2208_v38  ;;  %v1880_v0 = vadd.f32 %v4866_v48, %v1312_v1 }
 0x47d   : > { %2146 = vmatpush.msrb.mxu3 %v2115_v44  ;;  %v1975_v45 = vadd.f32 %v1963_v16, %v1879_v61 }
 0x47e   : > { %v3912_v63 = vpop.eup %3911  ;;  %v1677_v33 = vadd.f32 %v1671_v50, %v1535_v6  ;;  %v2168_v50 = vld [vmem:[#allocation5 + $0x8] sm:$0xff]  ;;  %2226 = vmatpush.msrb.mxu2 %v2207_v28 }
 0x47f   : > { %v4899_v49 = vadd.f32 1.0, %v3912_v63  ;;  %2185 = vmatpush.msrb.mxu0 %v2168_v50  ;;  %v1966_v63 = vpop.f32.mrf.mxu2 }
 0x480   : > { %v3914_v21 = vpop.eup %3913  ;;  %v3671_v12 = vmul.f32 -1.442695, %v1677_v33  ;;  %v1976_v3 = vadd.f32 %v1966_v63, %v1880_v0 }
 0x481   : > { %3915 = vrcp.f32 %v4899_v49  ;;  %v4908_v41 = vadd.f32 1.0, %v3914_v21  ;;  %2186 = vmatpush.msrb.mxu0 %v2167_v52  ;;  %v1781_v53 = vand.u32 2147483648, %v4899_v49  ;;  %vm1775_vm8 = vweird.f32 %v4899_v49 }
 0x482   : > { %3917 = vpow2.f32 %v3670_v46  ;;  %v1779_v14 = vand.u32 2147483647, %v4899_v49 }
 0x483   : > { %3919 = vrcp.f32 %v4908_v41  ;;  %v1782_v13 = vor.u32 1.1754944e-38, %v1781_v53  ;;  %v1796_v35 = vand.u32 2147483648, %v4908_v41  ;;  %vm1790_vm12 = vweird.f32 %v4908_v41 }
 0x484   : > { %3921 = vpow2.f32 %v3671_v12  ;;  %vm1780_vm10 = vcmp.eq.f32.partialorder %v1779_v14, 8.507059e+37  ;;  %v1794_v33 = vand.u32 2147483647, %v4908_v41  ;;  %v3975_v14 = vld [vmem:[#allocation2 + $0x10] sm:$0xff] }
 0x486   : > { %vm1795_vm14 = vcmp.eq.f32.partialorder %v1794_v33, 8.507059e+37  ;;  %v2385_v33 = vld [vmem:[#allocation8 + $0x38] sm:$0xff] }
 0x487   : > { %v3916_v54 = vpop.eup %3915  ;;  %v1969_v50 = vpop.f32.mrf.mxu2  ;;  %2398 = vmatpush.msra.mxu2 %v2385_v33 }
 0x488   : > { %v3918_v4 = vpop.eup %3917  ;;  %v1771_v51 = vmul.f32 %v3916_v54, %v4899_v49  ;;  %vm1776_vm7 = vweird.f32 %v3916_v54  ;;  %v948_v49 = vadd.f32 %v4919_v40, %v4629_v58 }
 0x489   : > { %v4928_v34 = vadd.f32 1.0, %v3918_v4  ;;  %v4930_v31 = vpop.eup %3919  ;;  %vm1777_vm9 = vmor %vm1775_vm8, %vm1776_vm7 }
 0x48a   : > { %v1772_v15 = vsub.f32 1.0, %v1771_v51  ;;  %v3922_v17 = vpop.eup %3921  ;;  %v1786_v26 = vmul.f32 %v4930_v31, %v4908_v41  ;;  %vm1791_vm11 = vweird.f32 %v4930_v31  ;;  %v1133_v48 = vadd.f32 %v4645_v2, %v948_v49  ;;  %v3977_v49 = vld [vmem:[#allocation2 + $0x18] sm:$0xff] }
 0x48b   : > { %3923 = vrcp.f32 %v4928_v34  ;;  %v4939_v57 = vadd.f32 1.0, %v3922_v17  ;;  %vm1792_vm13 = vmor %vm1790_vm12, %vm1791_vm11  ;;  %v1797_v41 = vor.u32 1.1754944e-38, %v1796_v35  ;;  %v1811_v51 = vand.u32 2147483648, %v4928_v34  ;;  %v5058_v35 = vld [vmem:[%s5498_s27 + $0x18] sm:$0xff] }
 0x48c   : > { %v1773_v9 = vmul.f32 %v3916_v54, %v1772_v15  ;;  %v1787_v11 = vsub.f32 1.0, %v1786_v26  ;;  %v1313_v44 = vadd.f32 %v4685_v24, %v1133_v48  ;;  %vm1805_vm0 = vweird.f32 %v4928_v34  ;;  %v2384_v48 = vld [vmem:[#allocation8 + $0x30] sm:$0xff] }
 0x48d   : > { %3925 = vrcp.f32 %v4939_v57  ;;  %v1812_v55 = vor.u32 1.1754944e-38, %v1811_v51  ;;  %vm1820_vm6 = vweird.f32 %v4939_v57  ;;  %2399 = vmatpush.msra.mxu2 %v2384_v48 }
 0x48e   : > { %v1774_v59 = vadd.f32 %v3916_v54, %v1773_v9  ;;  %v1788_v19 = vmul.f32 %v4930_v31, %v1787_v11  ;;  %v1881_v2 = vadd.f32 %v4868_v8, %v1313_v44 }
 0x48f   : > { %v1972_v61 = vpop.f32.mrf.mxu2 }
 0x490   : > { %v1778_v22 = vsel %vm1777_vm9, %v3916_v54, %v1774_v59  ;;  %v1789_v6 = vadd.f32 %v4930_v31, %v1788_v19  ;;  %v5015_v19 = vld [vmem:[%s5498_s27] sm:$0xff] }
 0x491   : > { %v4942_v62 = vpop.eup %3923  ;;  %v1783_v46 = vsel %vm1780_vm10, %v1782_v13, %v1778_v22 }
 0x492   : > { %v1801_v5 = vmul.f32 %v4942_v62, %v4928_v34  ;;  %v2091_v20 = vsub.f32 1.0, %v1783_v46  ;;  %v2087_v7 = vmul.f32 %v1783_v46, %v4547_v32  ;;  %v1793_v12 = vsel %vm1792_vm13, %v4930_v31, %v1789_v6 }
 0x493   : > { %v4958_v23 = vpop.eup %3925  ;;  %v949_v32 = vadd.f32 %v4919_v40, %v4633_v60  ;;  %v1798_v28 = vsel %vm1795_vm14, %v1797_v41, %v1793_v12  ;;  %vm1806_vm15 = vweird.f32 %v4942_v62  ;;  %v1977_v60 = vadd.f32 %v1969_v50, %v1881_v2  ;;  %v2344_v50 = vld [vmem:[#allocation5 + $0x20] sm:$0xff] }
 0x494   : > { %v1802_v21 = vsub.f32 1.0, %v1801_v5  ;;  %v1816_v43 = vmul.f32 %v4958_v23, %v4939_v57  ;;  %v2092_v8 = vsub.f32 1.0, %v1798_v28  ;;  %v1809_v40 = vand.u32 2147483647, %v4928_v34  ;;  %vm1807_vm1 = vmor %vm1805_vm0, %vm1806_vm15 }
 0x495   : > { %v1134_v16 = vadd.f32 %v4667_v10, %v949_v32  ;;  %v2088_v17 = vmul.f32 %v1798_v28, %v4563_v36  ;;  %vm1821_vm5 = vweird.f32 %v4958_v23 }
 0x496   : > { %v1803_v54 = vmul.f32 %v4942_v62, %v1802_v21  ;;  %v1817_v4 = vsub.f32 1.0, %v1816_v43  ;;  %vm1810_vm2 = vcmp.eq.f32.partialorder %v1809_v40, 8.507059e+37  ;;  %vm1822_vm7 = vmor %vm1820_vm6, %vm1821_vm5  ;;  %v5032_v21 = vld [vmem:[%s5498_s27 + $0x8] sm:$0xff]  ;;  %v3716_v43 = vld [vmem:[%s5459_s12 + $0x20] sm:$0xff] }
 0x497   : > { %v1314_v47 = vadd.f32 %v4691_v27, %v1134_v16  ;;  %v1826_v27 = vand.u32 2147483648, %v4939_v57  ;;  %v2602_v40 = vld [vmem:[#allocation3 + $0x18] sm:$0xff] }
 0x498   : > { %v1804_v24 = vadd.f32 %v4942_v62, %v1803_v54  ;;  %v1818_v39 = vmul.f32 %v4958_v23, %v1817_v4  ;;  %v2383_v54 = vld [vmem:[#allocation8 + $0x28] sm:$0xff] }
 0x499   : > { %v1882_v34 = vadd.f32 %v4871_v29, %v1314_v47  ;;  %2400 = vmatpush.msra.mxu2 %v2383_v54  ;;  %v3738_v47 = vld [vmem:[%s5459_s12 + $0x50] sm:$0xff] }
 0x49a   : > { %v1808_v26 = vsel %vm1807_vm1, %v4942_v62, %v1804_v24  ;;  %v1819_v36 = vadd.f32 %v4958_v23, %v1818_v39  ;;  %v1824_v62 = vand.u32 2147483647, %v4939_v57  ;;  %v1827_v57 = vor.u32 1.1754944e-38, %v1826_v27  ;;  %v2527_v39 = vld [vmem:[#allocation5 + $0x58] sm:$0xff]  ;;  %v2525_v27 = vld [vmem:[#allocation5 + $0x48] sm:$0xff] }
 0x49b   : > { %v1813_v10 = vsel %vm1810_vm2, %v1812_v55, %v1808_v26  ;;  %v1978_v59 = vadd.f32 %v1972_v61, %v1882_v34  ;;  %v2526_v55 = vld [vmem:[#allocation5 + $0x50] sm:$0xff]  ;;  %v2599_v34 = vld [vmem:[#allocation3] sm:$0xff] }
 0x49c   : > { %v2093_v29 = vsub.f32 1.0, %v1813_v10  ;;  %vm1825_vm8 = vcmp.eq.f32.partialorder %v1824_v62, 8.507059e+37  ;;  %v2564_v61 = vld [vmem:[#allocation8 + $0x50] sm:$0xff] }
 0x4df   : > { %v2067_v30 = vpop.f32.mrf.mxu1 }
 0x4e0   : > { %v2079_v18 = vadd.f32 %v2067_v30, %v1975_v45  ;;  %v2089_v30 = vmul.f32 %v3975_v14, %v1813_v10  ;;  %v5112_v10 = vld [vmem:[#allocation2 + $0x20] sm:$0xff] }
 0x4e1   : > { %v5132_v14 = vld [vmem:[%s5465_s18] ss:$0 sm:$0xff] }
 0x4e2   : > { %3927 = vtanh.f32 %v2079_v18  ;;  %v1823_v18 = vsel %vm1822_vm7, %v4958_v23, %v1819_v36  ;;  %v5051_v23 = vld [vmem:[%s5498_s27 + $0x10] sm:$0xff]  ;;  %v3737_v36 = vld [vmem:[%s5459_s12 + $0x48] sm:$0xff] }
 0x4e3   : > { %v1828_v22 = vsel %vm1825_vm8, %v1827_v57, %v1823_v18 }
 0x4e4   : > { %v2094_v1 = vsub.f32 1.0, %v1828_v22  ;;  %v2090_v0 = vmul.f32 %v3977_v49, %v1828_v22 }
 0x4e7   : > { %v2070_v25 = vpop.f32.mrf.mxu1 }
 0x4e8   : > { %v3928_v58 = vpop.eup %3927  ;;  %v2080_v37 = vadd.f32 %v2070_v25, %v1976_v3  ;;  %v3719_v3 = vld [vmem:[%s5459_s12 + $0x38] sm:$0xff]  ;;  %v3718_v25 = vld [vmem:[%s5459_s12 + $0x30] sm:$0xff] }
 0x4e9   : > { %v2095_v38 = vmul.f32 %v3928_v58, %v2091_v20  ;;  %v2347_v20 = vld [vmem:[#allocation5 + $0x38] sm:$0xff]  ;;  %2322 = vmatpush.msra.mxu0 %v3719_v3  ;;  %v2346_v58 = vld [vmem:[#allocation5 + $0x30] sm:$0xff] }
 0x4ea   : > { %3929 = vtanh.f32 %v2080_v37  ;;  %v2345_v37 = vld [vmem:[#allocation5 + $0x28] sm:$0xff] }
 0x4eb   : > { %v4970_v52 = vadd.f32 %v2095_v38, %v2087_v7  ;;  %2323 = vmatpush.msra.mxu0 %v3718_v25  ;;  %v3717_v7 = vld [vmem:[%s5459_s12 + $0x28] sm:$0xff]  ;;  %v2382_v38 = vld [vmem:[#allocation8 + $0x20] sm:$0xff] }
 0x4ec   : > { %2401 = vmatpush.msra.mxu2 %v2382_v38 }
 0x4ed   : > { %2103 = vst.msk [vmem:[#allocation2] sm:$0xff] %vm1319_vm4, %v4970_v52  ;;  %3700 = vmatmul.msk.f32.vlgmr.msrb.gmra.mxu3 %vm1319_vm4, %v4970_v52  ;;  %3704 = vmatmul.msk.f32.vlgmr.msrb.gmra.mxu0 %vm1319_vm4, %v4970_v52 }
 0x4ee   : > { %3708 = vmatmul.msk.f32.vlgmr.msrb.gmra.mxu2 %vm1319_vm4, %v4970_v52  ;;  %2324 = vmatpush.msra.mxu0 %v3717_v7 }
 0x4ef   : > { %v2073_v42 = vpop.f32.mrf.mxu1 }
 0x4f0   : > { %v3930_v15 = vpop.eup %3929  ;;  %v2081_v31 = vadd.f32 %v2073_v42, %v1977_v60  ;;  %2325 = vmatpush.msra.mxu0 %v3716_v43  ;;  %v2601_v42 = vld [vmem:[#allocation3 + $0x10] sm:$0xff] }
 0x4f1   : > { %v2096_v9 = vmul.f32 %v3930_v15, %v2092_v8 }
 0x4f2   : > { %3931 = vtanh.f32 %v2081_v31  ;;  %v3739_v31 = vld [vmem:[%s5459_s12 + $0x58] sm:$0xff] }
 0x4f3   : > { %v4993_v11 = vadd.f32 %v2096_v9, %v2088_v17  ;;  %v2565_v17 = vld [vmem:[#allocation8 + $0x58] sm:$0xff]  ;;  %2502 = vmatpush.msrb.mxu0 %v3739_v31  ;;  %v2600_v9 = vld [vmem:[#allocation3 + $0x8] sm:$0xff] }
 0x4f4   : > { %2578 = vmatpush.msrb.mxu2 %v2565_v17 }
 0x4f5   : > { %2104 = vst.msk [vmem:[#allocation2 + $0x8] sm:$0xff] %vm1319_vm4, %v4993_v11  ;;  %3701 = vmatmul.msk.f32.gmra.mxu3 %vm1319_vm4, %v4993_v11  ;;  %3705 = vmatmul.msk.f32.gmra.mxu0 %vm1319_vm4, %v4993_v11 }
 0x4f6   : > { %3709 = vmatmul.msk.f32.gmra.mxu2 %vm1319_vm4, %v4993_v11  ;;  %2261 = vmatpush.msra.mxu1 %v4993_v11 }
 0x4f7   : > { %v2076_v53 = vpop.f32.mrf.mxu1  ;;  %2503 = vmatpush.msrb.mxu0 %v3738_v47  ;;  %2579 = vmatpush.msrb.mxu2 %v2564_v61 }
 0x4f8   : > { %v3932_v45 = vpop.eup %3931  ;;  %v2082_v63 = vadd.f32 %v2076_v53, %v1978_v59  ;;  %2262 = vmatpush.msra.mxu1 %v4970_v52  ;;  %v2563_v59 = vld [vmem:[#allocation8 + $0x48] sm:$0xff]  ;;  %v2524_v53 = vld [vmem:[#allocation5 + $0x40] sm:$0xff] }
 0x4f9   : > { %v2097_v56 = vmul.f32 %v3932_v45, %v2093_v29  ;;  %3712 = vmatmul.msk.f32.vlgmr.msra.gmra.mxu1 %vm950_vm3, %v5015_v19  ;;  %v3736_v29 = vld [vmem:[%s5459_s12 + $0x40] sm:$0xff]  ;;  %2504 = vmatpush.msrb.mxu0 %v3737_v36 }
 0x4fa   : > { %3933 = vtanh.f32 %v2082_v63  ;;  %2360 = vmatpush.msrb.mxu1 %v2347_v20  ;;  %v2562_v45 = vld [vmem:[#allocation8 + $0x40] sm:$0xff]  ;;  %2580 = vmatpush.msrb.mxu2 %v2563_v59 }
 0x4fb   : > { %v5019_v5 = vadd.f32 %v2097_v56, %v2089_v30  ;;  %2505 = vmatpush.msrb.mxu0 %v3736_v29  ;;  %v5127_v63 = vld [vmem:[%s5466_s19] ss:$0 sm:$0xff]  ;;  %v5134_v30 = vld [vmem:[#allocation2 + $0x28] sm:$0xff] }
 0x4fc   : > { %2361 = vmatpush.msrb.mxu1 %v2346_v58  ;;  %2581 = vmatpush.msrb.mxu2 %v2562_v45 }
 0x4fd   : > { %2105 = vst.msk [vmem:[#allocation2 + $0x10] sm:$0xff] %vm1319_vm4, %v5019_v5  ;;  %3702 = vmatmul.msk.f32.gmra.mxu3 %vm1319_vm4, %v5019_v5  ;;  %3706 = vmatmul.msk.f32.gmra.mxu0 %vm1319_vm4, %v5019_v5 }
 0x4fe   : > { %3710 = vmatmul.msk.f32.gmra.mxu2 %vm1319_vm4, %v5019_v5  ;;  %2362 = vmatpush.msrb.mxu1 %v2345_v37 }
 0x500   : > { %v3934_v13 = vpop.eup %3933  ;;  %2363 = vmatpush.msrb.mxu1 %v2344_v50  ;;  %v5162_v50 = vld [vmem:[#allocation2 + $0x30] sm:$0xff] }
 0x501   : > { %v2098_v46 = vmul.f32 %v3934_v13, %v2094_v1  ;;  %3713 = vmatmul.msk.f32.gmra.mxu1 %vm950_vm3, %v5032_v21 }
 0x502   : > { %2540 = vmatpush.msra.mxu1 %v2527_v39  ;;  %v2649_v39 = vld [vmem:[#allocation7 + $0x8] sm:$0xff] }
 0x503   : > { %v5036_v6 = vadd.f32 %v2098_v46, %v2090_v0  ;;  %v5149_v0 = vld [vmem:[#allocation11] ss:$0 sm:$0xff] }
 0x504   : > { %2541 = vmatpush.msra.mxu1 %v2526_v55 }
 0x505   : > { %2106 = vst.msk [vmem:[#allocation2 + $0x18] sm:$0xff] %vm1319_vm4, %v5036_v6  ;;  %3703 = vmatmul.msk.f32.gmra.mxu3 %vm1319_vm4, %v5036_v6  ;;  %3707 = vmatmul.msk.f32.gmra.mxu0 %vm1319_vm4, %v5036_v6 }
 0x506   : > { %3711 = vmatmul.msk.f32.gmra.mxu2 %vm1319_vm4, %v5036_v6  ;;  %2284 = vmatpush.msra.mxu3 %v5036_v6 }
 0x507   : > { %2542 = vmatpush.msra.mxu1 %v2525_v27 }
 0x508   : > { %2285 = vmatpush.msra.mxu3 %v5019_v5 }
 0x509   : > { %2543 = vmatpush.msra.mxu1 %v2524_v53 }
 0x50d   : > { %3714 = vmatmul.msk.f32.vlgmr.msra.gmra.mxu3 %vm950_vm3, %v5051_v23 }
 0x515   : > { %3715 = vmatmul.msk.f32.gmra.mxu3 %vm950_vm3, %v5058_v35 }
 0x56a   : > { %v2188_v51 = vpop.f32.mrf.mxu0 }
 0x56b   : > { %v2203_v56 = vadd.f32 %v5127_v63, %v2188_v51 }
 0x570   : > { %v5074_v12 = vpop.f32.mrf.mxu3 }
 0x571   : > { %v2228_v60 = vpop.f32.mrf.mxu2  ;;  %v2163_v18 = vadd.f32 %v5132_v14, %v5074_v12 }
 0x572   : > { %v2191_v8 = vpop.f32.mrf.mxu0  ;;  %v2243_v46 = vadd.f32 %v5149_v0, %v2228_v60  ;;  %v2651_v60 = vld [vmem:[#allocation7 + $0x18] sm:$0xff] }
 0x573   : > { %v2204_v3 = vadd.f32 %v5127_v63, %v2191_v8  ;;  %v2650_v8 = vld [vmem:[#allocation7 + $0x10] sm:$0xff] }
 0x576   : > { %v2264_v44 = vpop.f32.mrf.mxu1 }
 0x577   : > { %3720 = vmatmul.msk.f32.vlgmr.msra.gmra.mxu0 %vm1319_vm4, %v2264_v44  ;;  %3724 = vmatmul.msk.f32.vlgmr.msrb.gmra.mxu1 %vm1319_vm4, %v2264_v44 }
 0x578   : > { %3728 = vmatmul.msk.f32.vlgmr.msra.gmra.mxu2 %vm1319_vm4, %v2264_v44  ;;  %v5079_v41 = vpop.f32.mrf.mxu3  ;;  %2699 = vmatpush.msrb.mxu1 %v5134_v30 }
 0x579   : > { %v2231_v15 = vpop.f32.mrf.mxu2  ;;  %v2164_v20 = vadd.f32 %v5132_v14, %v5079_v41  ;;  %2664 = vmatpush.msra.mxu0 %v2651_v60 }
 0x57a   : > { %v5102_v16 = vpop.f32.mrf.mxu0  ;;  %2700 = vmatpush.msrb.mxu1 %v5112_v10  ;;  %v2244_v54 = vadd.f32 %v5149_v0, %v2231_v15 }
 0x57b   : > { %2665 = vmatpush.msra.mxu0 %v2650_v8 }
 0x57d   : > { %2666 = vmatpush.msra.mxu0 %v2649_v39 }
 0x57e   : > { %v2267_v32 = vpop.f32.mrf.mxu1 }
 0x57f   : > { %3721 = vmatmul.msk.f32.gmra.mxu0 %vm1319_vm4, %v2267_v32  ;;  %3725 = vmatmul.msk.f32.gmra.mxu1 %vm1319_vm4, %v2267_v32 }
 0x580   : > { %3729 = vmatmul.msk.f32.gmra.mxu2 %vm1319_vm4, %v2267_v32  ;;  %2433 = vmatpush.msrb.mxu3 %v2267_v32  ;;  %v5084_v2 = vpop.f32.mrf.mxu3  ;;  %v5171_v32 = vld [vmem:[#allocation2 + $0x38] sm:$0xff] }
 0x581   : > { %v5107_v26 = vpop.f32.mrf.mxu2  ;;  %2722 = vmatpush.msra.mxu2 %v5171_v32 }
 0x582   : > { %2434 = vmatpush.msrb.mxu3 %v2264_v44  ;;  %v5120_v62 = vpop.f32.mrf.mxu0  ;;  %v2245_v17 = vadd.f32 %v5149_v0, %v5107_v26 }
 0x583   : > { %3732 = vmatmul.msk.f32.vlgmr.msrb.gmra.mxu3 %vm950_vm3, %v5015_v19  ;;  %2723 = vmatpush.msra.mxu2 %v5162_v50 }
 0x588   : > { %v5088_v28 = vpop.f32.mrf.mxu3 }
 0x589   : > { %v5140_v57 = vpop.f32.mrf.mxu2 }
 0x58b   : > { %3733 = vmatmul.msk.f32.gmra.mxu3 %vm950_vm3, %v5032_v21 }
 0x590   : > { %v2287_v4 = vpop.f32.mrf.mxu3 }
 0x591   : > { %3722 = vmatmul.msk.f32.gmra.mxu0 %vm1319_vm4, %v2287_v4  ;;  %3726 = vmatmul.msk.f32.gmra.mxu1 %vm1319_vm4, %v2287_v4 }
 0x592   : > { %3730 = vmatmul.msk.f32.gmra.mxu2 %vm1319_vm4, %v2287_v4 }
 0x598   : > { %v2290_v24 = vpop.f32.mrf.mxu3 }
 0x599   : > { %3723 = vmatmul.msk.f32.gmra.mxu0 %vm1319_vm4, %v2290_v24  ;;  %3727 = vmatmul.msk.f32.gmra.mxu1 %vm1319_vm4, %v2290_v24 }
 0x59a   : > { %3731 = vmatmul.msk.f32.gmra.mxu2 %vm1319_vm4, %v2290_v24  ;;  %2456 = vmatpush.msra.mxu3 %v2290_v24  ;;  %v2205_v24 = vadd.f32 %v5127_v63, %v5102_v16  ;;  %v2648_v16 = vld [vmem:[#allocation7] sm:$0xff] }
 0x59b   : > { %2667 = vmatpush.msra.mxu0 %v2648_v16 }
 0x59c   : > { %2457 = vmatpush.msra.mxu3 %v2287_v4  ;;  %v2165_v4 = vadd.f32 %v5132_v14, %v5084_v2 }
 0x59d   : > { %3734 = vmatmul.msk.f32.vlgmr.msra.gmra.mxu3 %vm950_vm3, %v5051_v23 }
 0x59e   : > { %2627 = vmatpush.msrb.mxu3 %v2602_v40 }
 0x5a0   : > { %2628 = vmatpush.msrb.mxu3 %v2601_v42 }
 0x5a2   : > { %2629 = vmatpush.msrb.mxu3 %v2600_v9 }
 0x5a4   : > { %2630 = vmatpush.msrb.mxu3 %v2599_v34 }
 0x5a5   : > { %3735 = vmatmul.msk.f32.gmra.mxu3 %vm950_vm3, %v5058_v35 }
 0x5ad   : > { %3752 = vmatmul.msk.f32.vlgmr.msrb.gmra.mxu3 %vm1319_vm4, %v5112_v10 }
 0x5b5   : > { %3753 = vmatmul.msk.f32.gmra.mxu3 %vm1319_vm4, %v5134_v30 }
 0x5bd   : > { %3754 = vmatmul.msk.f32.gmra.mxu3 %vm1319_vm4, %v5162_v50 }
 0x5c5   : > { %3755 = vmatmul.msk.f32.gmra.mxu3 %vm1319_vm4, %v5171_v32 }
 0x5f4   : > { %v2327_v22 = vpop.f32.mrf.mxu0  ;;  %v2365_v1 = vpop.f32.mrf.mxu1 }
 0x5f5   : > { %v5145_v13 = vadd.f32 %v2327_v22, %v2163_v18  ;;  %v5147_v49 = vadd.f32 %v2365_v1, %v2203_v56  ;;  %v2735_v56 = vld [vmem:[#allocation3 + $0x38] sm:$0xff]  ;;  %v2734_v22 = vld [vmem:[#allocation3 + $0x30] sm:$0xff] }
 0x5f6   : > { %v2785_v18 = vld [vmem:[#allocation7 + $0x38] sm:$0xff]  ;;  %2760 = vmatpush.msra.mxu3 %v2735_v56  ;;  %v2784_v1 = vld [vmem:[#allocation7 + $0x30] sm:$0xff] }
 0x5f8   : > { %2761 = vmatpush.msra.mxu3 %v2734_v22 }
 0x5fb   : > { %v2403_v33 = vpop.f32.mrf.mxu2 }
 0x5fc   : > { %v5155_v25 = vadd.f32 %v2403_v33, %v2243_v46  ;;  %v2330_v58 = vpop.f32.mrf.mxu0  ;;  %v2368_v48 = vpop.f32.mrf.mxu1 }
 0x5fd   : > { %v5157_v7 = vadd.f32 %v2330_v58, %v2164_v20  ;;  %v5159_v37 = vadd.f32 %v2368_v48, %v2204_v3  ;;  %v2783_v48 = vld [vmem:[#allocation7 + $0x28] sm:$0xff] }
 0x603   : > { %v2406_v43 = vpop.f32.mrf.mxu2 }
 0x604   : > { %v5164_v38 = vadd.f32 %v2406_v43, %v2244_v54  ;;  %v2732_v54 = vld [vmem:[#allocation3 + $0x20] sm:$0xff] }
 0x605   : > { %v2782_v43 = vld [vmem:[#allocation7 + $0x20] sm:$0xff] }
 0x606   : > { %v2436_v12 = vpop.f32.mrf.mxu3 }
 0x607   : > { %v2465_v44 = vmul.f32 2.0, %v2436_v12 }
 0x609   : > { %v2469_v41 = vsub.f32 %v2465_v44, %v4970_v52 }
 0x60b   : > { %3740 = vmatmul.msk.f32.vlgmr.msrb.gmra.mxu0 %vm1319_vm4, %v2469_v41  ;;  %3744 = vmatmul.msk.f32.vlgmr.msra.gmra.mxu1 %vm1319_vm4, %v2469_v41 }
 0x60c   : > { %3748 = vmatmul.msk.f32.vlgmr.msrb.gmra.mxu2 %vm1319_vm4, %v2469_v41  ;;  %2798 = vmatpush.msra.mxu1 %v2785_v18 }
 0x60e   : > { %v2439_v52 = vpop.f32.mrf.mxu3  ;;  %v2333_v51 = vpop.f32.mrf.mxu0  ;;  %2799 = vmatpush.msra.mxu1 %v2784_v1 }
 0x60f   : > { %v2466_v40 = vmul.f32 2.0, %v2439_v52  ;;  %v5181_v42 = vadd.f32 %v2333_v51, %v2165_v4  ;;  %v2371_v15 = vpop.f32.mrf.mxu1 }
 0x610   : > { %v5184_v31 = vadd.f32 %v2371_v15, %v2205_v24  ;;  %2800 = vmatpush.msra.mxu1 %v2783_v48 }
 0x611   : > { %v2470_v2 = vsub.f32 %v2466_v40, %v4993_v11 }
 0x612   : > { %2801 = vmatpush.msra.mxu1 %v2782_v43 }
 0x613   : > { %3741 = vmatmul.msk.f32.gmra.mxu0 %vm1319_vm4, %v2470_v2  ;;  %3745 = vmatmul.msk.f32.gmra.mxu1 %vm1319_vm4, %v2470_v2 }
 0x614   : > { %3749 = vmatmul.msk.f32.gmra.mxu2 %vm1319_vm4, %v2470_v2 }
 0x615   : > { %v2409_v9 = vpop.f32.mrf.mxu2 }
 0x616   : > { %v2417_v47 = vadd.f32 %v2409_v9, %v2245_v17 }
 0x61d   : > { %v5218_v27 = vpop.f32.mrf.mxu2 }
 0x620   : > { %v2459_v55 = vpop.f32.mrf.mxu3 }
 0x621   : > { %v2467_v61 = vmul.f32 2.0, %v2459_v55  ;;  %v2927_v55 = vld [vmem:[#allocation7 + $0x58] sm:$0xff] }
 0x623   : > { %v2471_v11 = vsub.f32 %v2467_v61, %v5019_v5  ;;  %v2336_v5 = vpop.f32.mrf.mxu0  ;;  %v2876_v61 = vld [vmem:[#allocation3 + $0x50] sm:$0xff] }
 0x625   : > { %3742 = vmatmul.msk.f32.gmra.mxu0 %vm1319_vm4, %v2471_v11  ;;  %3746 = vmatmul.msk.f32.gmra.mxu1 %vm1319_vm4, %v2471_v11 }
 0x626   : > { %3750 = vmatmul.msk.f32.gmra.mxu2 %vm1319_vm4, %v2471_v11  ;;  %v2926_v11 = vld [vmem:[#allocation7 + $0x50] sm:$0xff] }
 0x628   : > { %v2462_v34 = vpop.f32.mrf.mxu3 }
 0x629   : > { %v2468_v36 = vmul.f32 2.0, %v2462_v34  ;;  %v2875_v34 = vld [vmem:[#allocation3 + $0x48] sm:$0xff] }
 0x62b   : > { %v2472_v26 = vsub.f32 %v2468_v36, %v5036_v6  ;;  %v5216_v6 = vpop.f32.mrf.mxu1  ;;  %v2925_v36 = vld [vmem:[#allocation7 + $0x48] sm:$0xff] }
 0x62d   : > { %3743 = vmatmul.msk.f32.gmra.mxu0 %vm1319_vm4, %v2472_v26  ;;  %3747 = vmatmul.msk.f32.gmra.mxu1 %vm1319_vm4, %v2472_v26 }
 0x62e   : > { %3751 = vmatmul.msk.f32.gmra.mxu2 %vm1319_vm4, %v2472_v26  ;;  %v2874_v26 = vld [vmem:[#allocation3 + $0x40] sm:$0xff] }
 0x635   : > { %3756 = vmatmul.msk.f32.vlgmr.msra.gmra.mxu0 %vm1319_vm4, %v5112_v10  ;;  %3760 = vmatmul.msk.f32.vlgmr.msrb.gmra.mxu1 %vm950_vm3, %v5015_v19 }
 0x636   : > { %3762 = vmatmul.msk.f32.vlgmr.msra.gmra.mxu2 %vm950_vm3, %v5051_v23 }
 0x63d   : > { %3757 = vmatmul.msk.f32.gmra.mxu0 %vm1319_vm4, %v5134_v30  ;;  %3761 = vmatmul.msk.f32.gmra.mxu1 %vm950_vm3, %v5032_v21 }
 0x63e   : > { %3763 = vmatmul.msk.f32.gmra.mxu2 %vm950_vm3, %v5058_v35 }
 0x645   : > { %3758 = vmatmul.msk.f32.gmra.mxu0 %vm1319_vm4, %v5162_v50 }
 0x64d   : > { %3759 = vmatmul.msk.f32.gmra.mxu0 %vm1319_vm4, %v5171_v32 }
 0x688   : > { %v2507_v59 = vpop.f32.mrf.mxu0  ;;  %v2545_v29 = vpop.f32.mrf.mxu1 }
 0x689   : > { %v5221_v53 = vadd.f32 %v2507_v59, %v5145_v13  ;;  %v2557_v45 = vadd.f32 %v2545_v29, %v5147_v49  ;;  %v2733_v49 = vld [vmem:[#allocation3 + $0x28] sm:$0xff] }
 0x68a   : > { %2762 = vmatpush.msra.mxu3 %v2733_v49 }
 0x68c   : > { %2763 = vmatpush.msra.mxu3 %v2732_v54 }
 0x68e   : > { %2940 = vmatpush.msrb.mxu3 %v2927_v55 }
 0x68f   : > { %v2583_v46 = vpop.f32.mrf.mxu2 }
 0x690   : > { %v5225_v3 = vadd.f32 %v2583_v46, %v5155_v25  ;;  %v2510_v20 = vpop.f32.mrf.mxu0  ;;  %v2548_v33 = vpop.f32.mrf.mxu1  ;;  %2941 = vmatpush.msrb.mxu3 %v2926_v11 }
 0x691   : > { %v5228_v58 = vadd.f32 %v2510_v20, %v5157_v7  ;;  %v2558_v13 = vadd.f32 %v2548_v33, %v5159_v37  ;;  %v2166_v37 = vadd.f32 %v5132_v14, %v5088_v28 }
 0x692   : > { %2942 = vmatpush.msrb.mxu3 %v2925_v36 }
 0x693   : > { %v2342_v24 = vadd.f32 %v2336_v5, %v2166_v37  ;;  %v2924_v5 = vld [vmem:[#allocation7 + $0x40] sm:$0xff]  ;;  %v2632_v37 = vpop.f32.mrf.mxu3 }
 0x694   : > { %2943 = vmatpush.msrb.mxu3 %v2924_v5 }
 0x697   : > { %v2586_v12 = vpop.f32.mrf.mxu2 }
 0x698   : > { %v5232_v25 = vadd.f32 %v2586_v12, %v5164_v38 }
 0x6a2   : > { %v2513_v44 = vpop.f32.mrf.mxu0  ;;  %v2551_v41 = vpop.f32.mrf.mxu1 }
 0x6a3   : > { %v5235_v4 = vadd.f32 %v2513_v44, %v5181_v42  ;;  %v2559_v7 = vadd.f32 %v2551_v41, %v5184_v31 }
 0x6a9   : > { %v2589_v52 = vpop.f32.mrf.mxu2 }
 0x6aa   : > { %v5240_v51 = vadd.f32 %v2589_v52, %v2417_v47  ;;  %v2516_v60 = vpop.f32.mrf.mxu0  ;;  %v5242_v8 = vpop.f32.mrf.mxu1  ;;  %v2877_v47 = vld [vmem:[#allocation3 + $0x58] sm:$0xff] }
 0x6ab   : > { %v5244_v40 = vadd.f32 %v2516_v60, %v2342_v24  ;;  %v2635_v24 = vpop.f32.mrf.mxu3 }
 0x6ac   : > { %v2645_v36 = vadd.f32 %v2635_v24, %v5228_v58 }
 0x6b1   : > { %v5246_v38 = vpop.f32.mrf.mxu2 }
 0x6b2   : > { %v2669_v15 = vpop.f32.mrf.mxu0  ;;  %v2702_v2 = vpop.f32.mrf.mxu1 }
 0x6b3   : > { %v2681_v42 = vadd.f32 %v2669_v15, %v2557_v45  ;;  %3764 = vmatmul.msk.f32.vlgmr.msra.gmra.mxu3 %vm1319_vm4, %v2702_v2  ;;  %3768 = vmatmul.msk.f32.vlgmr.msra.gmra.mxu1 %vm1319_vm4, %v2702_v2  ;;  %v2638_v52 = vpop.f32.mrf.mxu3 }
 0x6b9   : > { %v2725_v31 = vpop.f32.mrf.mxu2 }
 0x6ba   : > { %v2672_v28 = vpop.f32.mrf.mxu0  ;;  %v2705_v14 = vpop.f32.mrf.mxu1 }
 0x6bb   : > { %v2682_v39 = vadd.f32 %v2672_v28, %v2558_v13  ;;  %3765 = vmatmul.msk.f32.gmra.mxu3 %vm1319_vm4, %v2705_v14  ;;  %3769 = vmatmul.msk.f32.gmra.mxu1 %vm1319_vm4, %v2705_v14  ;;  %v2641_v60 = vpop.f32.mrf.mxu3  ;;  %v2644_v28 = vadd.f32 %v2632_v37, %v5221_v53 }
 0x6bc   : > { %2833 = vmatpush.msrb.mxu2 %v2705_v14  ;;  %v3120_v14 = vld [vmem:[#allocation10 + $0x18] sm:$0xff] }
 0x6be   : > { %2834 = vmatpush.msrb.mxu2 %v2702_v2 }
 0x6bf   : > { %3772 = vmatmul.msk.f32.vlgmr.msrb.gmra.mxu2 %vm950_vm3, %v5015_v19 }
 0x6c0   : > { %2902 = vmatpush.msra.mxu2 %v2877_v47 }
 0x6c1   : > { %v2728_v16 = vpop.f32.mrf.mxu2 }
 0x6c2   : > { %v2675_v17 = vpop.f32.mrf.mxu0  ;;  %2856 = vmatpush.msrb.mxu0 %v2728_v16  ;;  %2903 = vmatpush.msra.mxu2 %v2876_v61  ;;  %v3118_v61 = vld [vmem:[#allocation10 + $0x8] sm:$0xff] }
 0x6c3   : > { %v2683_v9 = vadd.f32 %v2675_v17, %v2559_v7  ;;  %3766 = vmatmul.msk.f32.gmra.mxu3 %vm1319_vm4, %v2725_v31  ;;  %3770 = vmatmul.msk.f32.gmra.mxu1 %vm1319_vm4, %v2725_v31 }
 0x6c4   : > { %2857 = vmatpush.msrb.mxu0 %v2725_v31  ;;  %2904 = vmatpush.msra.mxu2 %v2875_v34  ;;  %v3117_v34 = vld [vmem:[#allocation10] sm:$0xff] }
 0x6c5   : > { %3774 = vmatmul.msk.f32.vlgmr.msrb.gmra.mxu0 %vm950_vm3, %v5051_v23 }
 0x6c6   : > { %2905 = vmatpush.msra.mxu2 %v2874_v26  ;;  %3145 = vmatpush.msra.mxu0 %v3120_v14 }
 0x6c7   : > { %3773 = vmatmul.msk.f32.gmra.mxu2 %vm950_vm3, %v5032_v21 }
 0x6ca   : > { %v5264_v1 = vpop.f32.mrf.mxu0 }
 0x6cb   : > { %3767 = vmatmul.msk.f32.gmra.mxu3 %vm1319_vm4, %v2728_v16  ;;  %3771 = vmatmul.msk.f32.gmra.mxu1 %vm1319_vm4, %v2728_v16  ;;  %v3119_v16 = vld [vmem:[#allocation10 + $0x10] sm:$0xff] }
 0x6cc   : > { %3146 = vmatpush.msra.mxu0 %v3119_v16 }
 0x6cd   : > { %3775 = vmatmul.msk.f32.gmra.mxu0 %vm950_vm3, %v5058_v35 }
 0x6ce   : > { %3147 = vmatpush.msra.mxu0 %v3118_v61 }
 0x6d0   : > { %3148 = vmatpush.msra.mxu0 %v3117_v34 }
 0x730   : > { %v2803_v59 = vpop.f32.mrf.mxu1 }
 0x731   : > { %v2815_v29 = vadd.f32 %v2803_v59, %v2681_v42 }
 0x736   : > { %v2765_v15 = vpop.f32.mrf.mxu3 }
 0x738   : > { %v2806_v45 = vpop.f32.mrf.mxu1 }
 0x739   : > { %v2816_v56 = vadd.f32 %v2806_v45, %v2682_v39  ;;  %v2777_v39 = vadd.f32 %v2765_v15, %v2644_v28 }
 0x73e   : > { %v2768_v2 = vpop.f32.mrf.mxu3 }
 0x73f   : > { %v2778_v26 = vadd.f32 %v2768_v2, %v2645_v36 }
 0x740   : > { %v2809_v18 = vpop.f32.mrf.mxu1 }
 0x741   : > { %v2817_v22 = vadd.f32 %v2809_v18, %v2683_v9 }
 0x742   : > { %v2836_v46 = vpop.f32.mrf.mxu2  ;;  %v2859_v49 = vpop.f32.mrf.mxu0 }
 0x743   : > { %v2865_v20 = vmul.f32 2.0, %v2836_v46  ;;  %v2867_v43 = vmul.f32 2.0, %v2859_v49 }
 0x745   : > { %v2869_v33 = vsub.f32 %v2865_v20, %v5112_v10  ;;  %v2871_v12 = vsub.f32 %v2867_v43, %v5162_v50 }
 0x746   : > { %v2771_v42 = vpop.f32.mrf.mxu3 }
 0x747   : > { %3776 = vmatmul.msk.f32.vlgmr.msra.gmra.mxu2 %vm1319_vm4, %v2869_v33  ;;  %3780 = vmatmul.msk.f32.vlgmr.msrb.gmra.mxu3 %vm1319_vm4, %v2869_v33 }
 0x74a   : > { %v2839_v13 = vpop.f32.mrf.mxu2  ;;  %v2862_v44 = vpop.f32.mrf.mxu0 }
 0x74b   : > { %v2866_v48 = vmul.f32 2.0, %v2839_v13  ;;  %v2868_v41 = vmul.f32 2.0, %v2862_v44 }
 0x74d   : > { %v2870_v54 = vsub.f32 %v2866_v48, %v5134_v30  ;;  %v2872_v7 = vsub.f32 %v2868_v41, %v5171_v32 }
 0x74e   : > { %v2774_v31 = vpop.f32.mrf.mxu3 }
 0x74f   : > { %3777 = vmatmul.msk.f32.gmra.mxu2 %vm1319_vm4, %v2870_v54  ;;  %3781 = vmatmul.msk.f32.gmra.mxu3 %vm1319_vm4, %v2870_v54 }
 0x757   : > { %3778 = vmatmul.msk.f32.gmra.mxu2 %vm1319_vm4, %v2871_v12  ;;  %3782 = vmatmul.msk.f32.gmra.mxu3 %vm1319_vm4, %v2871_v12 }
 0x75f   : > { %3779 = vmatmul.msk.f32.gmra.mxu2 %vm1319_vm4, %v2872_v7  ;;  %3783 = vmatmul.msk.f32.gmra.mxu3 %vm1319_vm4, %v2872_v7 }
 0x7ca   : > { %v2907_v17 = vpop.f32.mrf.mxu2  ;;  %v2945_v9 = vpop.f32.mrf.mxu3 }
 0x7cb   : > { %v2919_v47 = vadd.f32 %v2907_v17, %v2777_v39  ;;  %v5279_v55 = vadd.f32 %v2945_v9, %v2815_v29  ;;  %v2646_v29 = vadd.f32 %v2638_v52, %v5235_v4 }
 0x7cd   : > { %v3784_v11 = vmul.f32 -1.442695, %v2919_v47  ;;  %v2779_v33 = vadd.f32 %v2771_v42, %v2646_v29 }
 0x7cf   : > { %3935 = vpow2.f32 %v3784_v11 }
 0x7d2   : > { %v2910_v53 = vpop.f32.mrf.mxu2  ;;  %v2948_v5 = vpop.f32.mrf.mxu3 }
 0x7d3   : > { %v2920_v59 = vadd.f32 %v2910_v53, %v2778_v26  ;;  %v5282_v45 = vadd.f32 %v2948_v5, %v2816_v56  ;;  %v2647_v56 = vadd.f32 %v2641_v60, %v5244_v40 }
 0x7d5   : > { %v3936_v18 = vpop.eup %3935  ;;  %v3785_v46 = vmul.f32 -1.442695, %v2920_v59  ;;  %v2780_v37 = vadd.f32 %v2774_v31, %v2647_v56 }
 0x7d6   : > { %v2973_v20 = vadd.f32 1.0, %v3936_v18 }
 0x7d7   : > { %3937 = vpow2.f32 %v3785_v46 }
 0x7d8   : > { %3939 = vrcp.f32 %v2973_v20  ;;  %v2988_v4 = vand.u32 2147483648, %v2973_v20  ;;  %v2986_v15 = vand.u32 2147483647, %v2973_v20  ;;  %vm2982_vm10 = vweird.f32 %v2973_v20 }
 0x7da   : > { %v2913_v13 = vpop.f32.mrf.mxu2  ;;  %v2951_v49 = vpop.f32.mrf.mxu3  ;;  %v2989_v14 = vor.u32 1.1754944e-38, %v2988_v4  ;;  %vm2987_vm12 = vcmp.eq.f32.partialorder %v2986_v15, 8.507059e+37 }
 0x7db   : > { %v2921_v48 = vadd.f32 %v2913_v13, %v2779_v33  ;;  %v5285_v54 = vadd.f32 %v2951_v49, %v2817_v22 }
 0x7dd   : > { %v3938_v58 = vpop.eup %3937  ;;  %v3786_v43 = vmul.f32 -1.442695, %v2921_v48 }
 0x7de   : > { %v3940_v12 = vpop.eup %3939  ;;  %v2974_v44 = vadd.f32 1.0, %v3938_v58 }
 0x7df   : > { %v2978_v41 = vmul.f32 %v3940_v12, %v2973_v20  ;;  %3941 = vpow2.f32 %v3786_v43  ;;  %vm2983_vm9 = vweird.f32 %v3940_v12 }
 0x7e0   : > { %3943 = vrcp.f32 %v2974_v44  ;;  %vm2984_vm11 = vmor %vm2982_vm10, %vm2983_vm9  ;;  %v3003_v47 = vand.u32 2147483648, %v2974_v44  ;;  %v3001_v11 = vand.u32 2147483647, %v2974_v44  ;;  %vm2997_vm14 = vweird.f32 %v2974_v44 }
 0x7e1   : > { %v2979_v7 = vsub.f32 1.0, %v2978_v41 }
 0x7e2   : > { %v2916_v24 = vpop.f32.mrf.mxu2  ;;  %v3004_v26 = vor.u32 1.1754944e-38, %v3003_v47  ;;  %vm3002_vm0 = vcmp.eq.f32.partialorder %v3001_v11, 8.507059e+37 }
 0x7e3   : > { %v2980_v52 = vmul.f32 %v3940_v12, %v2979_v7  ;;  %v2922_v2 = vadd.f32 %v2916_v24, %v2780_v37 }
 0x7e5   : > { %v3942_v42 = vpop.eup %3941  ;;  %v2981_v22 = vadd.f32 %v3940_v12, %v2980_v52  ;;  %v3787_v16 = vmul.f32 -1.442695, %v2922_v2 }
 0x7e6   : > { %v3944_v28 = vpop.eup %3943  ;;  %v2975_v39 = vadd.f32 1.0, %v3942_v42 }
 0x7e7   : > { %v2985_v17 = vsel %vm2984_vm11, %v3940_v12, %v2981_v22  ;;  %v2993_v40 = vmul.f32 %v3944_v28, %v2974_v44  ;;  %vm2998_vm13 = vweird.f32 %v3944_v28 }
 0x7e8   : > { %3945 = vrcp.f32 %v2975_v39  ;;  %v2990_v60 = vsel %vm2987_vm12, %v2989_v14, %v2985_v17  ;;  %vm2999_vm15 = vmor %vm2997_vm14, %vm2998_vm13  ;;  %v3018_v33 = vand.u32 2147483648, %v2975_v39  ;;  %v3016_v49 = vand.u32 2147483647, %v2975_v39  ;;  %v3215_v14 = vld [vmem:[#allocation10 + $0x30] sm:$0xff] }
 0x7e9   : > { %v2994_v31 = vsub.f32 1.0, %v2993_v40  ;;  %3947 = vpow2.f32 %v3787_v16  ;;  %v5289_v9 = vmul.f32 %v2990_v60, %v5112_v10  ;;  %vm3012_vm2 = vweird.f32 %v2975_v39  ;;  %v3213_v16 = vld [vmem:[#allocation10 + $0x20] sm:$0xff]  ;;  %v2812_v60 = vpop.f32.mrf.mxu1 }
 0x7ea   : > { %v3019_v58 = vor.u32 1.1754944e-38, %v3018_v33  ;;  %vm3017_vm6 = vcmp.eq.f32.partialorder %v3016_v49, 8.507059e+37 }
 0x7eb   : > { %3792 = vmatmul.msk.f32.vlgmr.msra.gmra.mxu0 %vm1319_vm4, %v5289_v9  ;;  %v2995_v61 = vmul.f32 %v3944_v28, %v2994_v31 }
 0x7ed   : > { %v2996_v34 = vadd.f32 %v3944_v28, %v2995_v61 }
 0x7ee   : > { %v3946_v36 = vpop.eup %3945 }
 0x7ef   : > { %v3948_v53 = vpop.eup %3947  ;;  %v3008_v5 = vmul.f32 %v3946_v36, %v2975_v39  ;;  %v3000_v59 = vsel %vm2999_vm15, %v3944_v28, %v2996_v34  ;;  %vm3013_vm1 = vweird.f32 %v3946_v36  ;;  %v3216_v28 = vld [vmem:[#allocation10 + $0x38] sm:$0xff]  ;;  %v3214_v39 = vld [vmem:[#allocation10 + $0x28] sm:$0xff] }
 0x7f0   : > { %v2976_v18 = vadd.f32 1.0, %v3948_v53  ;;  %v3005_v46 = vsel %vm3002_vm0, %v3004_v26, %v3000_v59  ;;  %vm3014_vm5 = vmor %vm3012_vm2, %vm3013_vm1  ;;  %3241 = vmatpush.msrb.mxu2 %v3216_v28  ;;  %v3318_v26 = vld [vmem:[#allocation10 + $0x48] sm:$0xff]  ;;  %v3317_v53 = vld [vmem:[#allocation10 + $0x40] sm:$0xff] }
 0x7f1   : > { %v3009_v20 = vsub.f32 1.0, %v3008_v5  ;;  %v5294_v29 = vmul.f32 %v3005_v46, %v5134_v30 }
 0x7f2   : > { %3949 = vrcp.f32 %v2976_v18  ;;  %v3033_v37 = vand.u32 2147483648, %v2976_v18  ;;  %v3031_v24 = vand.u32 2147483647, %v2976_v18  ;;  %vm3027_vm8 = vweird.f32 %v2976_v18  ;;  %3242 = vmatpush.msrb.mxu2 %v3215_v14 }
 0x7f3   : > { %3793 = vmatmul.msk.f32.gmra.mxu0 %vm1319_vm4, %v5294_v29  ;;  %3180 = vmatpush.msrb.mxu1 %v5294_v29  ;;  %v3010_v13 = vmul.f32 %v3946_v36, %v3009_v20 }
 0x7f4   : > { %v3034_v15 = vor.u32 1.1754944e-38, %v3033_v37  ;;  %vm3032_vm10 = vcmp.eq.f32.partialorder %v3031_v24, 8.507059e+37  ;;  %3243 = vmatpush.msrb.mxu2 %v3214_v39 }
 0x7f5   : > { %3181 = vmatpush.msrb.mxu1 %v5289_v9  ;;  %v3011_v48 = vadd.f32 %v3946_v36, %v3010_v13 }
 0x7f6   : > { %3796 = vmatmul.msk.f32.vlgmr.msrb.gmra.mxu1 %vm950_vm3, %v5015_v19  ;;  %3244 = vmatpush.msrb.mxu2 %v3213_v16 }
 0x7f7   : > { %v3015_v43 = vsel %vm3014_vm5, %v3946_v36, %v3011_v48 }
 0x7f8   : > { %v3950_v12 = vpop.eup %3949  ;;  %v3020_v44 = vsel %vm3017_vm6, %v3019_v58, %v3015_v43  ;;  %v3788_v43 = vmul.f32 -1.442695, %v5279_v55 }
 0x7f9   : > { %v3023_v41 = vmul.f32 %v3950_v12, %v2976_v18  ;;  %v5303_v56 = vmul.f32 %v3020_v44, %v5162_v50  ;;  %vm3028_vm7 = vweird.f32 %v3950_v12  ;;  %v2206_v44 = vadd.f32 %v5127_v63, %v5120_v62 }
 0x7fa   : > { %vm3029_vm9 = vmor %vm3027_vm8, %vm3028_vm7  ;;  %3951 = vpow2.f32 %v3788_v43 }
 0x7fb   : > { %v3024_v7 = vsub.f32 1.0, %v3023_v41  ;;  %3794 = vmatmul.msk.f32.gmra.mxu0 %vm1319_vm4, %v5303_v56  ;;  %v2380_v41 = vadd.f32 %v5216_v6, %v2206_v44 }
 0x7fd   : > { %v3025_v4 = vmul.f32 %v3950_v12, %v3024_v7  ;;  %v2560_v7 = vadd.f32 %v5242_v8, %v2380_v41 }
 0x7fe   : > { %3797 = vmatmul.msk.f32.gmra.mxu1 %vm950_vm3, %v5032_v21 }
 0x7ff   : > { %v3026_v52 = vadd.f32 %v3950_v12, %v3025_v4  ;;  %v2684_v37 = vadd.f32 %v5264_v1, %v2560_v7  ;;  %v3790_v4 = vmul.f32 -1.442695, %v5285_v54 }
 0x801   : > { %v3030_v2 = vsel %vm3029_vm9, %v3950_v12, %v3026_v52  ;;  %v3789_v12 = vmul.f32 -1.442695, %v5282_v45  ;;  %v2818_v55 = vadd.f32 %v2812_v60, %v2684_v37 }
 0x802   : > { %v3035_v42 = vsel %vm3032_vm10, %v3034_v15, %v3030_v2 }
 0x803   : > { %v5310_v22 = vmul.f32 %v3035_v42, %v5171_v32  ;;  %3953 = vpow2.f32 %v3789_v12 }
 0x805   : > { %3795 = vmatmul.msk.f32.gmra.mxu0 %vm1319_vm4, %v5310_v22  ;;  %3203 = vmatpush.msra.mxu1 %v5310_v22 }
 0x807   : > { %3204 = vmatpush.msra.mxu1 %v5303_v56 }
 0x808   : > { %3798 = vmatmul.msk.f32.vlgmr.msra.gmra.mxu1 %vm950_vm3, %v5051_v23 }
 0x810   : > { %3799 = vmatmul.msk.f32.gmra.mxu1 %vm950_vm3, %v5058_v35 }
 0x868   : > { %v3150_v17 = vpop.f32.mrf.mxu0 }
 0x869   : > { %v5321_v40 = vadd.f32 %v3150_v17, %v5225_v3 }
 0x870   : > { %v3153_v31 = vpop.f32.mrf.mxu0 }
 0x871   : > { %v5324_v47 = vadd.f32 %v3153_v31, %v5232_v25 }
 0x873   : > { %v3183_v61 = vpop.f32.mrf.mxu1 }
 0x874   : > { %3800 = vmatmul.msk.f32.vlgmr.msrb.gmra.mxu2 %vm1319_vm4, %v3183_v61 }
 0x878   : > { %v3156_v11 = vpop.f32.mrf.mxu0 }
 0x879   : > { %v5328_v34 = vadd.f32 %v3156_v11, %v5240_v51  ;;  %v3320_v51 = vld [vmem:[#allocation10 + $0x58] sm:$0xff] }
 0x87a   : > { %3345 = vmatpush.msrb.mxu1 %v3320_v51 }
 0x87b   : > { %v3186_v36 = vpop.f32.mrf.mxu1 }
 0x87c   : > { %3801 = vmatmul.msk.f32.gmra.mxu2 %vm1319_vm4, %v3186_v36  ;;  %3276 = vmatpush.msra.mxu3 %v3186_v36 }
 0x87e   : > { %3277 = vmatpush.msra.mxu3 %v3183_v61 }
 0x87f   : > { %3804 = vmatmul.msk.f32.vlgmr.msra.gmra.mxu3 %vm950_vm3, %v5015_v19  ;;  %v3319_v19 = vld [vmem:[#allocation10 + $0x50] sm:$0xff] }
 0x880   : > { %3346 = vmatpush.msrb.mxu1 %v3319_v19 }
 0x882   : > { %3347 = vmatpush.msrb.mxu1 %v3318_v26  ;;  %v5342_v46 = vpop.f32.mrf.mxu0 }
 0x884   : > { %3348 = vmatpush.msrb.mxu1 %v3317_v53 }
 0x885   : > { %v3206_v3 = vpop.f32.mrf.mxu1 }
 0x886   : > { %3802 = vmatmul.msk.f32.gmra.mxu2 %vm1319_vm4, %v3206_v3 }
 0x887   : > { %3805 = vmatmul.msk.f32.gmra.mxu3 %vm950_vm3, %v5032_v21  ;;  %v2954_v21 = vpop.f32.mrf.mxu3 }
 0x888   : > { %v2960_v52 = vadd.f32 %v2954_v21, %v2818_v55 }
 0x88a   : > { %v3791_v2 = vmul.f32 -1.442695, %v2960_v52 }
 0x88d   : > { %v3209_v25 = vpop.f32.mrf.mxu1 }
 0x88e   : > { %3803 = vmatmul.msk.f32.gmra.mxu2 %vm1319_vm4, %v3209_v25  ;;  %3299 = vmatpush.msrb.mxu0 %v3209_v25 }
 0x890   : > { %3300 = vmatpush.msrb.mxu0 %v3206_v3 }
 0x891   : > { %3806 = vmatmul.msk.f32.vlgmr.msrb.gmra.mxu0 %vm950_vm3, %v5051_v23 }
 0x899   : > { %3807 = vmatmul.msk.f32.gmra.mxu0 %vm950_vm3, %v5058_v35 }
 0x8f7   : > { %v3246_v8 = vpop.f32.mrf.mxu2 }
 0x8f8   : > { %v3258_v31 = vadd.f32 %v3246_v8, %v5321_v40 }
 0x8ff   : > { %v3249_v61 = vpop.f32.mrf.mxu2 }
 0x902   : > { %v3279_v5 = vpop.f32.mrf.mxu3 }
 0x903   : > { %v3308_v59 = vmul.f32 2.0, %v3279_v5 }
 0x905   : > { %v3312_v18 = vsub.f32 %v3308_v59, %v5289_v9 }
 0x907   : > { %3808 = vmatmul.msk.f32.vlgmr.msrb.gmra.mxu1 %vm1319_vm4, %v3312_v18  ;;  %v3259_v18 = vadd.f32 %v3249_v61, %v5324_v47 }
 0x90a   : > { %v3282_v23 = vpop.f32.mrf.mxu3 }
 0x90b   : > { %v3309_v20 = vmul.f32 2.0, %v3282_v23 }
 0x90d   : > { %v3313_v35 = vsub.f32 %v3309_v20, %v5294_v29  ;;  %v3952_v29 = vpop.eup %3951 }
 0x90e   : > { %v3302_v33 = vpop.f32.mrf.mxu0  ;;  %v3954_v24 = vpop.eup %3953 }
 0x90f   : > { %3809 = vmatmul.msk.f32.gmra.mxu1 %vm1319_vm4, %v3313_v35  ;;  %v3310_v13 = vmul.f32 2.0, %v3302_v33  ;;  %v3050_v45 = vadd.f32 1.0, %v3954_v24 }
 0x911   : > { %v3314_v49 = vsub.f32 %v3310_v13, %v5303_v56  ;;  %v3049_v56 = vadd.f32 1.0, %v3952_v29  ;;  %v3079_v59 = vand.u32 2147483648, %v3050_v45  ;;  %vm3073_vm15 = vweird.f32 %v3050_v45 }
 0x912   : > { %v3077_v20 = vand.u32 2147483647, %v3050_v45 }
 0x913   : > { %3955 = vrcp.f32 %v3049_v56  ;;  %v3064_v60 = vand.u32 2147483648, %v3049_v56  ;;  %vm3058_vm11 = vweird.f32 %v3049_v56  ;;  %v3062_v11 = vand.u32 2147483647, %v3049_v56 }
 0x914   : > { %3957 = vpow2.f32 %v3790_v4  ;;  %v3080_v29 = vor.u32 1.1754944e-38, %v3079_v59  ;;  %vm3078_vm1 = vcmp.eq.f32.partialorder %v3077_v20, 8.507059e+37 }
 0x915   : > { %3959 = vrcp.f32 %v3050_v45  ;;  %v3065_v26 = vor.u32 1.1754944e-38, %v3064_v60  ;;  %vm3063_vm13 = vcmp.eq.f32.partialorder %v3062_v11, 8.507059e+37 }
 0x916   : > { %v3305_v48 = vpop.f32.mrf.mxu0  ;;  %3961 = vpow2.f32 %v3791_v2 }
 0x917   : > { %3810 = vmatmul.msk.f32.gmra.mxu1 %vm1319_vm4, %v3314_v49  ;;  %v3311_v58 = vmul.f32 2.0, %v3305_v48 }
 0x919   : > { %v3315_v9 = vsub.f32 %v3311_v58, %v5310_v22  ;;  %v3956_v15 = vpop.eup %3955 }
 0x91a   : > { %v3958_v62 = vpop.eup %3957  ;;  %v3054_v63 = vmul.f32 %v3956_v15, %v3049_v56  ;;  %vm3059_vm3 = vweird.f32 %v3956_v15  ;;  %v2246_v56 = vadd.f32 %v5149_v0, %v5140_v57 }
 0x91b   : > { %v5359_v6 = vadd.f32 1.0, %v3958_v62  ;;  %v3960_v22 = vpop.eup %3959  ;;  %vm3060_vm12 = vmor %vm3058_vm11, %vm3059_vm3 }
 0x91c   : > { %v3055_v42 = vsub.f32 1.0, %v3054_v63  ;;  %v3962_v1 = vpop.eup %3961  ;;  %v3069_v28 = vmul.f32 %v3960_v22, %v3050_v45  ;;  %vm3074_vm14 = vweird.f32 %v3960_v22  ;;  %v2418_v45 = vadd.f32 %v5218_v27, %v2246_v56 }
 0x91d   : > { %3963 = vrcp.f32 %v5359_v6  ;;  %v5362_v14 = vadd.f32 1.0, %v3962_v1  ;;  %vm3075_vm0 = vmor %vm3073_vm15, %vm3074_vm14  ;;  %v3094_v7 = vand.u32 2147483648, %v5359_v6  ;;  %vm3088_vm5 = vweird.f32 %v5359_v6 }
 0x91e   : > { %v3056_v54 = vmul.f32 %v3956_v15, %v3055_v42  ;;  %v3070_v39 = vsub.f32 1.0, %v3069_v28  ;;  %v3092_v24 = vand.u32 2147483647, %v5359_v6  ;;  %v2598_v62 = vadd.f32 %v5246_v38, %v2418_v45 }
 0x91f   : > { %3811 = vmatmul.msk.f32.gmra.mxu1 %vm1319_vm4, %v3315_v9  ;;  %3965 = vrcp.f32 %v5362_v14  ;;  %v3252_v9 = vpop.f32.mrf.mxu2  ;;  %v3095_v63 = vor.u32 1.1754944e-38, %v3094_v7  ;;  %vm3103_vm9 = vweird.f32 %v5362_v14 }
 0x920   : > { %v3057_v16 = vadd.f32 %v3956_v15, %v3056_v54  ;;  %v3071_v25 = vmul.f32 %v3960_v22, %v3070_v39  ;;  %v3260_v37 = vadd.f32 %v3252_v9, %v5328_v34  ;;  %vm3093_vm7 = vcmp.eq.f32.partialorder %v3092_v24, 8.507059e+37 }
 0x921   : > { %v3165_v8 = vadd.f32 %v5342_v46, %v2598_v62  ;;  %v3107_v54 = vand.u32 2147483647, %v5362_v14 }
 0x922   : > { %v3061_v19 = vsel %vm3060_vm12, %v3956_v15, %v3057_v16  ;;  %v3072_v5 = vadd.f32 %v3960_v22, %v3071_v25 }
 0x923   : > { %v5364_v17 = vpop.eup %3963  ;;  %v3066_v53 = vsel %vm3063_vm13, %v3065_v26, %v3061_v19  ;;  %vm3108_vm3 = vcmp.eq.f32.partialorder %v3107_v54, 8.507059e+37 }
 0x924   : > { %v3084_v51 = vmul.f32 %v5364_v17, %v5359_v6  ;;  %v3374_v23 = vsub.f32 1.0, %v3066_v53  ;;  %v3370_v13 = vmul.f32 %v3066_v53, %v5112_v10  ;;  %v3076_v12 = vsel %vm3075_vm0, %v3960_v22, %v3072_v5 }
 0x925   : > { %v5370_v40 = vpop.eup %3965  ;;  %v3081_v44 = vsel %vm3078_vm1, %v3080_v29, %v3076_v12  ;;  %vm3089_vm2 = vweird.f32 %v5364_v17 }
 0x926   : > { %v3085_v21 = vsub.f32 1.0, %v3084_v51  ;;  %v3099_v58 = vmul.f32 %v5370_v40, %v5362_v14  ;;  %v3375_v4 = vsub.f32 1.0, %v3081_v44  ;;  %vm3090_vm6 = vmor %vm3088_vm5, %vm3089_vm2  ;;  %v3371_v57 = vmul.f32 %v3081_v44, %v5134_v30 }
 0x927   : > { %v3255_v42 = vpop.f32.mrf.mxu2  ;;  %vm3104_vm8 = vweird.f32 %v5370_v40  ;;  %v3109_v30 = vand.u32 2147483648, %v5362_v14 }
 0x928   : > { %v3086_v48 = vmul.f32 %v5364_v17, %v3085_v21  ;;  %v3100_v41 = vsub.f32 1.0, %v3099_v58  ;;  %v3261_v1 = vadd.f32 %v3255_v42, %v3165_v8  ;;  %vm3105_vm10 = vmor %vm3103_vm9, %vm3104_vm8 }
 0x92a   : > { %v3087_v10 = vadd.f32 %v5364_v17, %v3086_v48  ;;  %v3101_v2 = vmul.f32 %v5370_v40, %v3100_v41 }
 0x92c   : > { %v3091_v34 = vsel %vm3090_vm6, %v5364_v17, %v3087_v10  ;;  %v3102_v22 = vadd.f32 %v5370_v40, %v3101_v2 }
 0x92d   : > { %v3096_v27 = vsel %vm3093_vm7, %v3095_v63, %v3091_v34 }
 0x92e   : > { %v3376_v38 = vsub.f32 1.0, %v3096_v27  ;;  %v3372_v16 = vmul.f32 %v3096_v27, %v5162_v50  ;;  %v3106_v60 = vsel %vm3105_vm10, %v5370_v40, %v3102_v22 }
 0x984   : > { %v3350_v36 = vpop.f32.mrf.mxu1 }
 0x985   : > { %v3362_v3 = vadd.f32 %v3350_v36, %v3258_v31  ;;  %v3110_v31 = vor.u32 1.1754944e-38, %v3109_v30 }
 0x987   : > { %3967 = vtanh.f32 %v3362_v3  ;;  %v3111_v11 = vsel %vm3108_vm3, %v3110_v31, %v3106_v60 }
 0x988   : > { %v3377_v14 = vsub.f32 1.0, %v3111_v11  ;;  %v3373_v3 = vmul.f32 %v3111_v11, %v5171_v32 }
 0x98c   : > { %v3353_v35 = vpop.f32.mrf.mxu1 }
 0x98d   : > { %v3968_v33 = vpop.eup %3967  ;;  %v3363_v49 = vadd.f32 %v3353_v35, %v3259_v18 }
 0x98e   : > { %v3378_v43 = vmul.f32 %v3968_v33, %v3374_v23 }
 0x98f   : > { %3969 = vtanh.f32 %v3363_v49 }
 0x990   : > { %v3382_v47 = vadd.f32 %v3378_v43, %v3370_v13 }
 0x992   : > { %3386 = vst.msk [vmem:[#allocation2 + $0x20] sm:$0xff] %vm1319_vm4, %v3382_v47 }
 0x993   : > { %3390 = vst.msk [vmem:[%s4390_s4] sm:$0xff] %vm1319_vm4, %v3382_v47 }
 0x994   : > { %v3356_v55 = vpop.f32.mrf.mxu1 }
 0x995   : > { %v3970_v52 = vpop.eup %3969  ;;  %v3364_v15 = vadd.f32 %v3356_v55, %v3260_v37 }
 0x996   : > { %v3379_v0 = vmul.f32 %v3970_v52, %v3375_v4 }
 0x997   : > { %3971 = vtanh.f32 %v3364_v15 }
 0x998   : > { %v3383_v6 = vadd.f32 %v3379_v0, %v3371_v57 }
 0x99a   : > { %3387 = vst.msk [vmem:[#allocation2 + $0x28] sm:$0xff] %vm1319_vm4, %v3383_v6 }
 0x99b   : > { %3391 = vst.msk [vmem:[%s4390_s4 + $0x8] sm:$0xff] %vm1319_vm4, %v3383_v6 }
 0x99c   : > { %v3359_v28 = vpop.f32.mrf.mxu1 }
 0x99d   : > { %v3972_v46 = vpop.eup %3971  ;;  %v3365_v39 = vadd.f32 %v3359_v28, %v3261_v1 }
 0x99e   : > { %v3380_v17 = vmul.f32 %v3972_v46, %v3376_v38 }
 0x99f   : > { %3973 = vtanh.f32 %v3365_v39 }
 0x9a0   : > { %v3384_v61 = vadd.f32 %v3380_v17, %v3372_v16 }
 0x9a2   : > { %3388 = vst.msk [vmem:[#allocation2 + $0x30] sm:$0xff] %vm1319_vm4, %v3384_v61 }
 0x9a3   : > { %3392 = vst.msk [vmem:[%s4390_s4 + $0x10] sm:$0xff] %vm1319_vm4, %v3384_v61 }
 0x9a5   : > { %v3974_v36 = vpop.eup %3973 }
 0x9a6   : > { %v3381_v25 = vmul.f32 %v3974_v36, %v3377_v14 }
 0x9a7   : > { %3397 = sbr.rel (%p3812_p8) target bundleno = 2485 (0x9b5), region = 136 }
 0x9a8   : > { %v3385_v51 = vadd.f32 %v3381_v25, %v3373_v3 }
 0x9aa   : > { %3389 = vst.msk [vmem:[#allocation2 + $0x38] sm:$0xff] %vm1319_vm4, %v3385_v51 }
 0x9ab   : > { %3393 = vst.msk [vmem:[%s4390_s4 + $0x18] sm:$0xff] %vm1319_vm4, %v3385_v51 }
 0x9ac   : > { %v3398_v50 = vld [vmem:[#allocation2] sm:$0xff]  ;;  %v3399_v19 = vld [vmem:[#allocation2 + $0x8] sm:$0xff]  ;;  %v3400_v26 = vld [vmem:[#allocation2 + $0x10] sm:$0xff] }
 0x9ad   : > { %3406 = vst.msk [vmem:[%s5469_s22] sm:$0xff] %vm1319_vm4, %v3398_v50  ;;  %v3401_v53 = vld [vmem:[#allocation2 + $0x18] sm:$0xff]  ;;  %v3402_v32 = vld [vmem:[#allocation2 + $0x20] sm:$0xff]  ;;  %v3403_v21 = vld [vmem:[#allocation2 + $0x28] sm:$0xff] }
 0x9ae   : > { %3407 = vst.msk [vmem:[%s5469_s22 + $0x8] sm:$0xff] %vm1319_vm4, %v3399_v19  ;;  %v3404_v5 = vld [vmem:[#allocation2 + $0x30] sm:$0xff] }
 0x9af   : > { %3408 = vst.msk [vmem:[%s5469_s22 + $0x10] sm:$0xff] %vm1319_vm4, %v3400_v26 }
 0x9b0   : > { %3409 = vst.msk [vmem:[%s5469_s22 + $0x18] sm:$0xff] %vm1319_vm4, %v3401_v53 }
 0x9b1   : > { %3410 = vst.msk [vmem:[%s5469_s22 + $0x20] sm:$0xff] %vm1319_vm4, %v3402_v32  ;;  %v3405_v40 = vld [vmem:[#allocation2 + $0x38] sm:$0xff] }
 0x9b2   : > { %3411 = vst.msk [vmem:[%s5469_s22 + $0x28] sm:$0xff] %vm1319_vm4, %v3403_v21 }
 0x9b3   : > { %3412 = vst.msk [vmem:[%s5469_s22 + $0x30] sm:$0xff] %vm1319_vm4, %v3404_v5 }
 0x9b4   : > { %3413 = vst.msk [vmem:[%s5469_s22 + $0x38] sm:$0xff] %vm1319_vm4, %v3405_v40 }
 0x9b5 PF: > { %s5501_s4 = sld [smem:[#allocation17_spill]] }
 0x9bb   : > { %s37_s3 = sadd.s32 1, %s5501_s4  }
 0x9bc   : > { %p34_p9 = scmp.ge.s32.totalorder %s37_s3, 10  }
 0x9be   :  { %36 = sbr.rel (!%p34_p9) target bundleno = 15 (0xf), region = 200 }
 0x9c3   :  { %3441 = vsyncpa [#allocation4], 1 }
 0x9c4   :  { %3443 = vsyncpa [#allocation4 + $0x1], 1 }
 0x9c5   :  { %3444 = vsyncpa [#allocation6], 1 }
 0x9c6   :  { %3445 = vsyncpa [#allocation9], 1 }
 0x9c7   :  { %3446 = vsyncpa [#allocation12], 1 }

</bundles_post_ra>
